<compile_context>
chip_gen: v5e
topology: v5e:2x2
jax: 0.10.0
libtpu: 0.0.40
codegen_flags: <defaults>
</compile_context>

<pallas_src>
import jax
import jax.numpy as jnp
from jax.experimental import pallas as pl
from jax.experimental.pallas import tpu as pltpu

# ----------------------------- config -----------------------------------
HIDDEN = 32
NUM_HEADS = 4
HEAD_DIM = HIDDEN // NUM_HEADS
INTERMEDIATE = 64
RMS_EPS = 1e-6
ROPE_THETA = 10000.0
N_DEC_LAYERS = 3
HEAD_SIZES = [HIDDEN, 1024, 128, 1]   # Discriminator mlp_layer_list sizes
OUT_PAD = 128                          # lane-dense padded output width


# ----------------------------- in-kernel helpers -------------------------
def _rmsnorm(x, w):
    var = jnp.mean(x * x, axis=-1, keepdims=True)
    return x * jax.lax.rsqrt(var + RMS_EPS) * w


def _silu(x):
    return x * jax.nn.sigmoid(x)


# ----------------------------- fused kernel ------------------------------
def _disc_kernel(h_ref, cos_ref, sin_ref, rot_ref, *refs):
    # refs = [ln1, wqkv, wo, ln2, wgu, wd] * N_DEC_LAYERS
    #        + [w1, b1, w2, b2, w3p, b3p] + (out_ref,)
    out_ref = refs[-1]
    wrefs = refs[:-1]

    H, D, I = HIDDEN, HEAD_DIM, INTERMEDIATE
    scale = 1.0 / (D ** 0.5)

    h = h_ref[0].astype(jnp.float32)          # (S, H)
    cos = cos_ref[...]                        # (S, H)  head-tiled
    sin = sin_ref[...]                        # (S, H)  head-tiled
    rot = rot_ref[...]                        # (H, H)  rotate_half as matmul

    idx = 0
    for _ in range(N_DEC_LAYERS):
        ln1 = wrefs[idx][...]
        wqkv = wrefs[idx + 1][...]
        wo = wrefs[idx + 2][...]
        ln2 = wrefs[idx + 3][...]
        wgu = wrefs[idx + 4][...]
        wd = wrefs[idx + 5][...]
        idx += 6

        # --- self-attention block (pre-RMSNorm, fused QKV) ---
        x = _rmsnorm(h, ln1)                                          # (S, H)
        qkv = jnp.dot(x, wqkv, preferred_element_type=jnp.float32)    # (S, 3H)
        q = qkv[:, :H]
        k = qkv[:, H:2 * H]
        v = qkv[:, 2 * H:]

        # RoPE on all heads at once: rotate_half == q @ rot (block-diag).
        q = q * cos + jnp.dot(q, rot, preferred_element_type=jnp.float32) * sin
        k = k * cos + jnp.dot(k, rot, preferred_element_type=jnp.float32) * sin

        head_outs = []
        for hh in range(NUM_HEADS):
            sl = slice(hh * D, (hh + 1) * D)
            qh, kh, vh = q[:, sl], k[:, sl], v[:, sl]
            s = jnp.dot(qh, kh.T, preferred_element_type=jnp.float32) * scale
            s = s - jnp.max(s, axis=-1, keepdims=True)
            p = jnp.exp(s)
            p = p * pl.reciprocal(jnp.sum(p, axis=-1, keepdims=True),
                                  approx=True)
            head_outs.append(jnp.dot(p, vh,
                                     preferred_element_type=jnp.float32))
        attn = jnp.concatenate(head_outs, axis=-1)                    # (S, H)
        h = h + jnp.dot(attn, wo, preferred_element_type=jnp.float32)

        # --- gated MLP block (pre-RMSNorm, fused gate/up) ---
        x = _rmsnorm(h, ln2)
        gu = jnp.dot(x, wgu, preferred_element_type=jnp.float32)      # (S, 2I)
        gated = _silu(gu[:, :I]) * gu[:, I:]
        h = h + jnp.dot(gated, wd, preferred_element_type=jnp.float32)

    # --- MLP head: H -> 1024 -> 128 -> 1 (last layer padded to 128 lanes) ---
    w1 = wrefs[idx][...]
    b1 = wrefs[idx + 1][...]
    w2 = wrefs[idx + 2][...]
    b2 = wrefs[idx + 3][...]
    w3p = wrefs[idx + 4][...]     # (128, OUT_PAD) zero-padded
    b3p = wrefs[idx + 5][...]     # (1, OUT_PAD) zero-padded

    h1 = _silu(jnp.dot(h, w1, preferred_element_type=jnp.float32) + b1)
    h2 = _silu(jnp.dot(h1, w2, preferred_element_type=jnp.float32) + b2)
    out_ref[0] = jnp.dot(h2, w3p, preferred_element_type=jnp.float32) + b3p


# ----------------------------- host-side helpers --------------------------
def rope_cos_sin(seq_len, head_dim, theta=ROPE_THETA):
    inv_freq = 1.0 / (theta ** (jnp.arange(0, head_dim, 2, dtype=jnp.float32)
                                / head_dim))
    t = jnp.arange(seq_len, dtype=jnp.float32)
    freqs = jnp.outer(t, inv_freq)                       # (S, D/2)
    emb = jnp.concatenate([freqs, freqs], axis=-1)       # (S, D)
    return jnp.cos(emb), jnp.sin(emb)


def rope_rotation_matrix():
    # Block-diagonal (H, H) matrix R with  x @ R == rotate_half(x)  per head.
    half = HEAD_DIM // 2
    eye = jnp.eye(half, dtype=jnp.float32)
    z = jnp.zeros((half, half), jnp.float32)
    rot_single = jnp.block([[z, eye], [-eye, z]])        # (D, D)
    return jnp.kron(jnp.eye(NUM_HEADS, dtype=jnp.float32), rot_single)


def _full_block_spec(w):
    nd = w.ndim
    return pl.BlockSpec(w.shape, lambda *args, _nd=nd: (0,) * _nd)


def discriminator_forward(params, hidden_states, attention_mask=None,
                          position_ids=None):
    # TODO(synk): only attention_mask=None is supported (no additive/causal
    # mask), matching the direct-call semantics of the reference module.
    B, S, H = hidden_states.shape
    cos, sin = rope_cos_sin(S, HEAD_DIM)
    cos_h = jnp.tile(cos, (1, NUM_HEADS))                # (S, H)
    sin_h = jnp.tile(sin, (1, NUM_HEADS))                # (S, H)
    rot = rope_rotation_matrix()                         # (H, H)

    flat_weights = []
    in_specs = [
        pl.BlockSpec((1, S, H), lambda b: (b, 0, 0)),        # hidden_states
        pl.BlockSpec((S, H), lambda b: (0, 0)),              # cos (tiled)
        pl.BlockSpec((S, H), lambda b: (0, 0)),              # sin (tiled)
        pl.BlockSpec((H, H), lambda b: (0, 0)),              # rotate_half mat
    ]

    def add_w(w):
        flat_weights.append(w)
        in_specs.append(_full_block_spec(w))

    for lp in params["layers"]:
        for name in ("ln1", "wqkv", "wo", "ln2", "wgu", "wd"):
            add_w(lp[name])

    (w1, b1), (w2, b2), (w3, b3) = params["head"]
    # Zero-pad the final (128, 1) / (1, 1) weights to a lane-dense width so
    # the kernel's output store is unmasked.
    w3p = jnp.zeros((w3.shape[0], OUT_PAD), jnp.float32).at[:, :1].set(w3)
    b3p = jnp.zeros((1, OUT_PAD), jnp.float32).at[:, :1].set(b3)
    for w in (w1, b1, w2, b2, w3p, b3p):
        add_w(w)

    out_padded = pl.pallas_call(
        _disc_kernel,
        out_shape=jax.ShapeDtypeStruct((B, S, OUT_PAD), jnp.float32),
        grid=(B,),
        in_specs=in_specs,
        out_specs=pl.BlockSpec((1, S, OUT_PAD), lambda b: (b, 0, 0)),
        compiler_params=pltpu.CompilerParams(
            dimension_semantics=("parallel",)),
    )(hidden_states.astype(jnp.float32), cos_h, sin_h, rot, *flat_weights)

    return out_padded[..., :1]                               # (B, S, 1)


# ----------------------------- parameter init ----------------------------
def init_params(key):
    def nrm(k, shape):
        return 0.05 * jax.random.normal(k, shape, jnp.float32)

    params = {"layers": [], "head": []}
    for _ in range(N_DEC_LAYERS):
        key, *ks = jax.random.split(key, 8)
        wq = nrm(ks[0], (HIDDEN, HIDDEN))
        wk = nrm(ks[1], (HIDDEN, HIDDEN))
        wv = nrm(ks[2], (HIDDEN, HIDDEN))
        wo = nrm(ks[3], (HIDDEN, HIDDEN))
        wg = nrm(ks[4], (HIDDEN, INTERMEDIATE))
        wu = nrm(ks[5], (HIDDEN, INTERMEDIATE))
        wd = nrm(ks[6], (INTERMEDIATE, HIDDEN))
        params["layers"].append(dict(
            wqkv=jnp.concatenate([wq, wk, wv], axis=1),       # (H, 3H)
            wo=wo,                                            # (H, H)
            wgu=jnp.concatenate([wg, wu], axis=1),            # (H, 2I)
            wd=wd,                                            # (I, H)
            ln1=jnp.ones((1, HIDDEN), jnp.float32),
            ln2=jnp.ones((1, HIDDEN), jnp.float32),
        ))
    for i in range(3):
        key, kw, kb = jax.random.split(key, 3)
        w = nrm(kw, (HEAD_SIZES[i], HEAD_SIZES[i + 1]))
        b = nrm(kb, (1, HEAD_SIZES[i + 1]))
        params["head"].append((w, b))
    return params


# ----------------------------- main ---------------------------------------
if __name__ == "__main__":
    key = jax.random.PRNGKey(0)
    key_p, key_x = jax.random.split(key)
    params = init_params(key_p)

    B, S = 2, 8
    hidden_states = jax.random.normal(key_x, (B, S, HIDDEN), jnp.float32)

    out = discriminator_forward(params, hidden_states)
    out = jax.block_until_ready(out)

    assert out.shape == (B, S, 1), out.shape
    assert jnp.all(jnp.isfinite(out))
    print("KERNEL_OK")
</pallas_src>

<mosaic_0001>
module attributes {stable_mosaic.version = 11 : i64} {
  func.func @_disc_kernel(%arg0: i32, %arg1: memref<1x8x32xf32, #tpu.memory_space<vmem>>, %arg2: memref<8x32xf32, #tpu.memory_space<vmem>>, %arg3: memref<8x32xf32, #tpu.memory_space<vmem>>, %arg4: memref<32x32xf32, #tpu.memory_space<vmem>>, %arg5: memref<1x32xf32, #tpu.memory_space<vmem>>, %arg6: memref<32x96xf32, #tpu.memory_space<vmem>>, %arg7: memref<32x32xf32, #tpu.memory_space<vmem>>, %arg8: memref<1x32xf32, #tpu.memory_space<vmem>>, %arg9: memref<32x128xf32, #tpu.memory_space<vmem>>, %arg10: memref<64x32xf32, #tpu.memory_space<vmem>>, %arg11: memref<1x32xf32, #tpu.memory_space<vmem>>, %arg12: memref<32x96xf32, #tpu.memory_space<vmem>>, %arg13: memref<32x32xf32, #tpu.memory_space<vmem>>, %arg14: memref<1x32xf32, #tpu.memory_space<vmem>>, %arg15: memref<32x128xf32, #tpu.memory_space<vmem>>, %arg16: memref<64x32xf32, #tpu.memory_space<vmem>>, %arg17: memref<1x32xf32, #tpu.memory_space<vmem>>, %arg18: memref<32x96xf32, #tpu.memory_space<vmem>>, %arg19: memref<32x32xf32, #tpu.memory_space<vmem>>, %arg20: memref<1x32xf32, #tpu.memory_space<vmem>>, %arg21: memref<32x128xf32, #tpu.memory_space<vmem>>, %arg22: memref<64x32xf32, #tpu.memory_space<vmem>>, %arg23: memref<32x1024xf32, #tpu.memory_space<vmem>>, %arg24: memref<1x1024xf32, #tpu.memory_space<vmem>>, %arg25: memref<1024x128xf32, #tpu.memory_space<vmem>>, %arg26: memref<1x128xf32, #tpu.memory_space<vmem>>, %arg27: memref<128x128xf32, #tpu.memory_space<vmem>>, %arg28: memref<1x128xf32, #tpu.memory_space<vmem>>, %arg29: memref<1x8x128xf32, #tpu.memory_space<vmem>>) attributes {dimension_semantics = [#tpu.dimension_semantics<parallel>], iteration_bounds = array<i64: 2>, scalar_prefetch = 0 : i64, scratch_operands = 0 : i64, tpu.core_type = #tpu.core_type<tc>, window_params = [{transform_indices = @transform_0, window_bounds = array<i64: 1, 8, 32>}, {pipeline_mode = #tpu.pipeline_mode<synchronous>, transform_indices = @transform_1, window_bounds = array<i64: 8, 32>}, {pipeline_mode = #tpu.pipeline_mode<synchronous>, transform_indices = @transform_2, window_bounds = array<i64: 8, 32>}, {pipeline_mode = #tpu.pipeline_mode<synchronous>, transform_indices = @transform_3, window_bounds = array<i64: 32, 32>}, {pipeline_mode = #tpu.pipeline_mode<synchronous>, transform_indices = @transform_4, window_bounds = array<i64: 1, 32>}, {pipeline_mode = #tpu.pipeline_mode<synchronous>, transform_indices = @transform_5, window_bounds = array<i64: 32, 96>}, {pipeline_mode = #tpu.pipeline_mode<synchronous>, transform_indices = @transform_6, window_bounds = array<i64: 32, 32>}, {pipeline_mode = #tpu.pipeline_mode<synchronous>, transform_indices = @transform_7, window_bounds = array<i64: 1, 32>}, {pipeline_mode = #tpu.pipeline_mode<synchronous>, transform_indices = @transform_8, window_bounds = array<i64: 32, 128>}, {pipeline_mode = #tpu.pipeline_mode<synchronous>, transform_indices = @transform_9, window_bounds = array<i64: 64, 32>}, {pipeline_mode = #tpu.pipeline_mode<synchronous>, transform_indices = @transform_10, window_bounds = array<i64: 1, 32>}, {pipeline_mode = #tpu.pipeline_mode<synchronous>, transform_indices = @transform_11, window_bounds = array<i64: 32, 96>}, {pipeline_mode = #tpu.pipeline_mode<synchronous>, transform_indices = @transform_12, window_bounds = array<i64: 32, 32>}, {pipeline_mode = #tpu.pipeline_mode<synchronous>, transform_indices = @transform_13, window_bounds = array<i64: 1, 32>}, {pipeline_mode = #tpu.pipeline_mode<synchronous>, transform_indices = @transform_14, window_bounds = array<i64: 32, 128>}, {pipeline_mode = #tpu.pipeline_mode<synchronous>, transform_indices = @transform_15, window_bounds = array<i64: 64, 32>}, {pipeline_mode = #tpu.pipeline_mode<synchronous>, transform_indices = @transform_16, window_bounds = array<i64: 1, 32>}, {pipeline_mode = #tpu.pipeline_mode<synchronous>, transform_indices = @transform_17, window_bounds = array<i64: 32, 96>}, {pipeline_mode = #tpu.pipeline_mode<synchronous>, transform_indices = @transform_18, window_bounds = array<i64: 32, 32>}, {pipeline_mode = #tpu.pipeline_mode<synchronous>, transform_indices = @transform_19, window_bounds = array<i64: 1, 32>}, {pipeline_mode = #tpu.pipeline_mode<synchronous>, transform_indices = @transform_20, window_bounds = array<i64: 32, 128>}, {pipeline_mode = #tpu.pipeline_mode<synchronous>, transform_indices = @transform_21, window_bounds = array<i64: 64, 32>}, {pipeline_mode = #tpu.pipeline_mode<synchronous>, transform_indices = @transform_22, window_bounds = array<i64: 32, 1024>}, {pipeline_mode = #tpu.pipeline_mode<synchronous>, transform_indices = @transform_23, window_bounds = array<i64: 1, 1024>}, {pipeline_mode = #tpu.pipeline_mode<synchronous>, transform_indices = @transform_24, window_bounds = array<i64: 1024, 128>}, {pipeline_mode = #tpu.pipeline_mode<synchronous>, transform_indices = @transform_25, window_bounds = array<i64: 1, 128>}, {pipeline_mode = #tpu.pipeline_mode<synchronous>, transform_indices = @transform_26, window_bounds = array<i64: 128, 128>}, {pipeline_mode = #tpu.pipeline_mode<synchronous>, transform_indices = @transform_27, window_bounds = array<i64: 1, 128>}, {transform_indices = @transform_28, window_bounds = array<i64: 1, 8, 128>}]} {
    %c0 = arith.constant 0 : index
    %c0_0 = arith.constant 0 : index
    %c0_1 = arith.constant 0 : index
    %0 = vector.load %arg1[%c0, %c0_0, %c0_1] : memref<1x8x32xf32, #tpu.memory_space<vmem>>, vector<1x8x32xf32>
    %1 = vector.shape_cast %0 : vector<1x8x32xf32> to vector<8x32xf32>
    %c0_2 = arith.constant 0 : index
    %c0_3 = arith.constant 0 : index
    %2 = vector.load %arg2[%c0_2, %c0_3] : memref<8x32xf32, #tpu.memory_space<vmem>>, vector<8x32xf32>
    %c0_4 = arith.constant 0 : index
    %c0_5 = arith.constant 0 : index
    %3 = vector.load %arg3[%c0_4, %c0_5] : memref<8x32xf32, #tpu.memory_space<vmem>>, vector<8x32xf32>
    %c0_6 = arith.constant 0 : index
    %c0_7 = arith.constant 0 : index
    %4 = vector.load %arg4[%c0_6, %c0_7] : memref<32x32xf32, #tpu.memory_space<vmem>>, vector<32x32xf32>
    %c0_8 = arith.constant 0 : index
    %c0_9 = arith.constant 0 : index
    %5 = vector.load %arg5[%c0_8, %c0_9] : memref<1x32xf32, #tpu.memory_space<vmem>>, vector<1x32xf32>
    %c0_10 = arith.constant 0 : index
    %c0_11 = arith.constant 0 : index
    %6 = vector.load %arg6[%c0_10, %c0_11] : memref<32x96xf32, #tpu.memory_space<vmem>>, vector<32x96xf32>
    %c0_12 = arith.constant 0 : index
    %c0_13 = arith.constant 0 : index
    %7 = vector.load %arg7[%c0_12, %c0_13] : memref<32x32xf32, #tpu.memory_space<vmem>>, vector<32x32xf32>
    %c0_14 = arith.constant 0 : index
    %c0_15 = arith.constant 0 : index
    %8 = vector.load %arg8[%c0_14, %c0_15] : memref<1x32xf32, #tpu.memory_space<vmem>>, vector<1x32xf32>
    %c0_16 = arith.constant 0 : index
    %c0_17 = arith.constant 0 : index
    %9 = vector.load %arg9[%c0_16, %c0_17] : memref<32x128xf32, #tpu.memory_space<vmem>>, vector<32x128xf32>
    %c0_18 = arith.constant 0 : index
    %c0_19 = arith.constant 0 : index
    %10 = vector.load %arg10[%c0_18, %c0_19] : memref<64x32xf32, #tpu.memory_space<vmem>>, vector<64x32xf32>
    %11 = arith.mulf %1, %1 : vector<8x32xf32>
    %cst = arith.constant dense<0.000000e+00> : vector<8xf32>
    %12 = vector.multi_reduction <add>, %11, %cst [1] : vector<8x32xf32> to vector<8xf32>
    %13 = vector.shape_cast %12 : vector<8xf32> to vector<8x1xf32>
    %cst_20 = arith.constant 3.200000e+01 : f32
    %14 = vector.broadcast %cst_20 : f32 to vector<8x1xf32>
    %15 = arith.divf %13, %14 : vector<8x1xf32>
    %cst_21 = arith.constant 9.99999997E-7 : f32
    %16 = vector.broadcast %cst_21 : f32 to vector<8x1xf32>
    %17 = arith.addf %15, %16 : vector<8x1xf32>
    %18 = math.rsqrt %17 : vector<8x1xf32>
    %19 = vector.broadcast %18 : vector<8x1xf32> to vector<8x32xf32>
    %20 = arith.mulf %1, %19 : vector<8x32xf32>
    %21 = vector.broadcast %5 : vector<1x32xf32> to vector<8x32xf32>
    %22 = arith.mulf %20, %21 : vector<8x32xf32>
    %cst_22 = arith.constant dense<0.000000e+00> : vector<8x96xf32>
    %23 = tpu.matmul %22, %6, %cst_22 {dimension_numbers = #tpu.dot_dimension_numbers<[1], [0], [0], [1], [0, 0, 1, 1], [], []>} : vector<8x32xf32>, vector<32x96xf32>, vector<8x96xf32> -> vector<8x96xf32>
    %24 = vector.extract_strided_slice %23 {offsets = [0, 0], sizes = [8, 32], strides = [1, 1]} : vector<8x96xf32> to vector<8x32xf32>
    %25 = vector.extract_strided_slice %23 {offsets = [0, 32], sizes = [8, 32], strides = [1, 1]} : vector<8x96xf32> to vector<8x32xf32>
    %26 = vector.extract_strided_slice %23 {offsets = [0, 64], sizes = [8, 32], strides = [1, 1]} : vector<8x96xf32> to vector<8x32xf32>
    %27 = arith.mulf %24, %2 : vector<8x32xf32>
    %cst_23 = arith.constant dense<0.000000e+00> : vector<8x32xf32>
    %28 = tpu.matmul %24, %4, %cst_23 {dimension_numbers = #tpu.dot_dimension_numbers<[1], [0], [0], [1], [0, 0, 1, 1], [], []>} : vector<8x32xf32>, vector<32x32xf32>, vector<8x32xf32> -> vector<8x32xf32>
    %29 = arith.mulf %28, %3 : vector<8x32xf32>
    %30 = arith.addf %27, %29 : vector<8x32xf32>
    %31 = arith.mulf %25, %2 : vector<8x32xf32>
    %cst_24 = arith.constant dense<0.000000e+00> : vector<8x32xf32>
    %32 = tpu.matmul %25, %4, %cst_24 {dimension_numbers = #tpu.dot_dimension_numbers<[1], [0], [0], [1], [0, 0, 1, 1], [], []>} : vector<8x32xf32>, vector<32x32xf32>, vector<8x32xf32> -> vector<8x32xf32>
    %33 = arith.mulf %32, %3 : vector<8x32xf32>
    %34 = arith.addf %31, %33 : vector<8x32xf32>
    %35 = vector.extract_strided_slice %30 {offsets = [0, 0], sizes = [8, 8], strides = [1, 1]} : vector<8x32xf32> to vector<8x8xf32>
    %36 = vector.extract_strided_slice %34 {offsets = [0, 0], sizes = [8, 8], strides = [1, 1]} : vector<8x32xf32> to vector<8x8xf32>
    %37 = vector.extract_strided_slice %26 {offsets = [0, 0], sizes = [8, 8], strides = [1, 1]} : vector<8x32xf32> to vector<8x8xf32>
    %38 = tpu.transpose %36, [1, 0] : vector<8x8xf32> -> vector<8x8xf32>
    %cst_25 = arith.constant dense<0.000000e+00> : vector<8x8xf32>
    %39 = tpu.matmul %35, %38, %cst_25 {dimension_numbers = #tpu.dot_dimension_numbers<[1], [0], [0], [1], [0, 0, 1, 1], [], []>} : vector<8x8xf32>, vector<8x8xf32>, vector<8x8xf32> -> vector<8x8xf32>
    %cst_26 = arith.constant 0.353553385 : f32
    %40 = vector.broadcast %cst_26 : f32 to vector<8x8xf32>
    %41 = arith.mulf %39, %40 : vector<8x8xf32>
    %cst_27 = arith.constant dense<0xFF800000> : vector<8xf32>
    %42 = vector.multi_reduction <maximumf>, %41, %cst_27 [1] : vector<8x8xf32> to vector<8xf32>
    %43 = vector.shape_cast %42 : vector<8xf32> to vector<8x1xf32>
    %44 = vector.broadcast %43 : vector<8x1xf32> to vector<8x8xf32>
    %45 = arith.subf %41, %44 : vector<8x8xf32>
    %46 = math.exp %45 : vector<8x8xf32>
    %cst_28 = arith.constant dense<0.000000e+00> : vector<8xf32>
    %47 = vector.multi_reduction <add>, %46, %cst_28 [1] : vector<8x8xf32> to vector<8xf32>
    %48 = vector.shape_cast %47 : vector<8xf32> to vector<8x1xf32>
    %49 = tpu.reciprocal %48 {approx = true} : vector<8x1xf32> -> vector<8x1xf32>
    %50 = vector.broadcast %49 : vector<8x1xf32> to vector<8x8xf32>
    %51 = arith.mulf %46, %50 : vector<8x8xf32>
    %cst_29 = arith.constant dense<0.000000e+00> : vector<8x8xf32>
    %52 = tpu.matmul %51, %37, %cst_29 {dimension_numbers = #tpu.dot_dimension_numbers<[1], [0], [0], [1], [0, 0, 1, 1], [], []>} : vector<8x8xf32>, vector<8x8xf32>, vector<8x8xf32> -> vector<8x8xf32>
    %53 = vector.extract_strided_slice %30 {offsets = [0, 8], sizes = [8, 8], strides = [1, 1]} : vector<8x32xf32> to vector<8x8xf32>
    %54 = vector.extract_strided_slice %34 {offsets = [0, 8], sizes = [8, 8], strides = [1, 1]} : vector<8x32xf32> to vector<8x8xf32>
    %55 = vector.extract_strided_slice %26 {offsets = [0, 8], sizes = [8, 8], strides = [1, 1]} : vector<8x32xf32> to vector<8x8xf32>
    %56 = tpu.transpose %54, [1, 0] : vector<8x8xf32> -> vector<8x8xf32>
    %cst_30 = arith.constant dense<0.000000e+00> : vector<8x8xf32>
    %57 = tpu.matmul %53, %56, %cst_30 {dimension_numbers = #tpu.dot_dimension_numbers<[1], [0], [0], [1], [0, 0, 1, 1], [], []>} : vector<8x8xf32>, vector<8x8xf32>, vector<8x8xf32> -> vector<8x8xf32>
    %cst_31 = arith.constant 0.353553385 : f32
    %58 = vector.broadcast %cst_31 : f32 to vector<8x8xf32>
    %59 = arith.mulf %57, %58 : vector<8x8xf32>
    %cst_32 = arith.constant dense<0xFF800000> : vector<8xf32>
    %60 = vector.multi_reduction <maximumf>, %59, %cst_32 [1] : vector<8x8xf32> to vector<8xf32>
    %61 = vector.shape_cast %60 : vector<8xf32> to vector<8x1xf32>
    %62 = vector.broadcast %61 : vector<8x1xf32> to vector<8x8xf32>
    %63 = arith.subf %59, %62 : vector<8x8xf32>
    %64 = math.exp %63 : vector<8x8xf32>
    %cst_33 = arith.constant dense<0.000000e+00> : vector<8xf32>
    %65 = vector.multi_reduction <add>, %64, %cst_33 [1] : vector<8x8xf32> to vector<8xf32>
    %66 = vector.shape_cast %65 : vector<8xf32> to vector<8x1xf32>
    %67 = tpu.reciprocal %66 {approx = true} : vector<8x1xf32> -> vector<8x1xf32>
    %68 = vector.broadcast %67 : vector<8x1xf32> to vector<8x8xf32>
    %69 = arith.mulf %64, %68 : vector<8x8xf32>
    %cst_34 = arith.constant dense<0.000000e+00> : vector<8x8xf32>
    %70 = tpu.matmul %69, %55, %cst_34 {dimension_numbers = #tpu.dot_dimension_numbers<[1], [0], [0], [1], [0, 0, 1, 1], [], []>} : vector<8x8xf32>, vector<8x8xf32>, vector<8x8xf32> -> vector<8x8xf32>
    %71 = vector.extract_strided_slice %30 {offsets = [0, 16], sizes = [8, 8], strides = [1, 1]} : vector<8x32xf32> to vector<8x8xf32>
    %72 = vector.extract_strided_slice %34 {offsets = [0, 16], sizes = [8, 8], strides = [1, 1]} : vector<8x32xf32> to vector<8x8xf32>
    %73 = vector.extract_strided_slice %26 {offsets = [0, 16], sizes = [8, 8], strides = [1, 1]} : vector<8x32xf32> to vector<8x8xf32>
    %74 = tpu.transpose %72, [1, 0] : vector<8x8xf32> -> vector<8x8xf32>
    %cst_35 = arith.constant dense<0.000000e+00> : vector<8x8xf32>
    %75 = tpu.matmul %71, %74, %cst_35 {dimension_numbers = #tpu.dot_dimension_numbers<[1], [0], [0], [1], [0, 0, 1, 1], [], []>} : vector<8x8xf32>, vector<8x8xf32>, vector<8x8xf32> -> vector<8x8xf32>
    %cst_36 = arith.constant 0.353553385 : f32
    %76 = vector.broadcast %cst_36 : f32 to vector<8x8xf32>
    %77 = arith.mulf %75, %76 : vector<8x8xf32>
    %cst_37 = arith.constant dense<0xFF800000> : vector<8xf32>
    %78 = vector.multi_reduction <maximumf>, %77, %cst_37 [1] : vector<8x8xf32> to vector<8xf32>
    %79 = vector.shape_cast %78 : vector<8xf32> to vector<8x1xf32>
    %80 = vector.broadcast %79 : vector<8x1xf32> to vector<8x8xf32>
    %81 = arith.subf %77, %80 : vector<8x8xf32>
    %82 = math.exp %81 : vector<8x8xf32>
    %cst_38 = arith.constant dense<0.000000e+00> : vector<8xf32>
    %83 = vector.multi_reduction <add>, %82, %cst_38 [1] : vector<8x8xf32> to vector<8xf32>
    %84 = vector.shape_cast %83 : vector<8xf32> to vector<8x1xf32>
    %85 = tpu.reciprocal %84 {approx = true} : vector<8x1xf32> -> vector<8x1xf32>
    %86 = vector.broadcast %85 : vector<8x1xf32> to vector<8x8xf32>
    %87 = arith.mulf %82, %86 : vector<8x8xf32>
    %cst_39 = arith.constant dense<0.000000e+00> : vector<8x8xf32>
    %88 = tpu.matmul %87, %73, %cst_39 {dimension_numbers = #tpu.dot_dimension_numbers<[1], [0], [0], [1], [0, 0, 1, 1], [], []>} : vector<8x8xf32>, vector<8x8xf32>, vector<8x8xf32> -> vector<8x8xf32>
    %89 = vector.extract_strided_slice %30 {offsets = [0, 24], sizes = [8, 8], strides = [1, 1]} : vector<8x32xf32> to vector<8x8xf32>
    %90 = vector.extract_strided_slice %34 {offsets = [0, 24], sizes = [8, 8], strides = [1, 1]} : vector<8x32xf32> to vector<8x8xf32>
    %91 = vector.extract_strided_slice %26 {offsets = [0, 24], sizes = [8, 8], strides = [1, 1]} : vector<8x32xf32> to vector<8x8xf32>
    %92 = tpu.transpose %90, [1, 0] : vector<8x8xf32> -> vector<8x8xf32>
    %cst_40 = arith.constant dense<0.000000e+00> : vector<8x8xf32>
    %93 = tpu.matmul %89, %92, %cst_40 {dimension_numbers = #tpu.dot_dimension_numbers<[1], [0], [0], [1], [0, 0, 1, 1], [], []>} : vector<8x8xf32>, vector<8x8xf32>, vector<8x8xf32> -> vector<8x8xf32>
    %cst_41 = arith.constant 0.353553385 : f32
    %94 = vector.broadcast %cst_41 : f32 to vector<8x8xf32>
    %95 = arith.mulf %93, %94 : vector<8x8xf32>
    %cst_42 = arith.constant dense<0xFF800000> : vector<8xf32>
    %96 = vector.multi_reduction <maximumf>, %95, %cst_42 [1] : vector<8x8xf32> to vector<8xf32>
    %97 = vector.shape_cast %96 : vector<8xf32> to vector<8x1xf32>
    %98 = vector.broadcast %97 : vector<8x1xf32> to vector<8x8xf32>
    %99 = arith.subf %95, %98 : vector<8x8xf32>
    %100 = math.exp %99 : vector<8x8xf32>
    %cst_43 = arith.constant dense<0.000000e+00> : vector<8xf32>
    %101 = vector.multi_reduction <add>, %100, %cst_43 [1] : vector<8x8xf32> to vector<8xf32>
    %102 = vector.shape_cast %101 : vector<8xf32> to vector<8x1xf32>
    %103 = tpu.reciprocal %102 {approx = true} : vector<8x1xf32> -> vector<8x1xf32>
    %104 = vector.broadcast %103 : vector<8x1xf32> to vector<8x8xf32>
    %105 = arith.mulf %100, %104 : vector<8x8xf32>
    %cst_44 = arith.constant dense<0.000000e+00> : vector<8x8xf32>
    %106 = tpu.matmul %105, %91, %cst_44 {dimension_numbers = #tpu.dot_dimension_numbers<[1], [0], [0], [1], [0, 0, 1, 1], [], []>} : vector<8x8xf32>, vector<8x8xf32>, vector<8x8xf32> -> vector<8x8xf32>
    %107 = tpu.concatenate %52, %70, %88, %106 in 1 : vector<8x8xf32>, vector<8x8xf32>, vector<8x8xf32>, vector<8x8xf32> -> vector<8x32xf32>
    %cst_45 = arith.constant dense<0.000000e+00> : vector<8x32xf32>
    %108 = tpu.matmul %107, %7, %cst_45 {dimension_numbers = #tpu.dot_dimension_numbers<[1], [0], [0], [1], [0, 0, 1, 1], [], []>} : vector<8x32xf32>, vector<32x32xf32>, vector<8x32xf32> -> vector<8x32xf32>
    %109 = arith.addf %1, %108 : vector<8x32xf32>
    %110 = arith.mulf %109, %109 : vector<8x32xf32>
    %cst_46 = arith.constant dense<0.000000e+00> : vector<8xf32>
    %111 = vector.multi_reduction <add>, %110, %cst_46 [1] : vector<8x32xf32> to vector<8xf32>
    %112 = vector.shape_cast %111 : vector<8xf32> to vector<8x1xf32>
    %cst_47 = arith.constant 3.200000e+01 : f32
    %113 = vector.broadcast %cst_47 : f32 to vector<8x1xf32>
    %114 = arith.divf %112, %113 : vector<8x1xf32>
    %cst_48 = arith.constant 9.99999997E-7 : f32
    %115 = vector.broadcast %cst_48 : f32 to vector<8x1xf32>
    %116 = arith.addf %114, %115 : vector<8x1xf32>
    %117 = math.rsqrt %116 : vector<8x1xf32>
    %118 = vector.broadcast %117 : vector<8x1xf32> to vector<8x32xf32>
    %119 = arith.mulf %109, %118 : vector<8x32xf32>
    %120 = vector.broadcast %8 : vector<1x32xf32> to vector<8x32xf32>
    %121 = arith.mulf %119, %120 : vector<8x32xf32>
    %cst_49 = arith.constant dense<0.000000e+00> : vector<8x128xf32>
    %122 = tpu.matmul %121, %9, %cst_49 {dimension_numbers = #tpu.dot_dimension_numbers<[1], [0], [0], [1], [0, 0, 1, 1], [], []>} : vector<8x32xf32>, vector<32x128xf32>, vector<8x128xf32> -> vector<8x128xf32>
    %123 = vector.extract_strided_slice %122 {offsets = [0, 0], sizes = [8, 64], strides = [1, 1]} : vector<8x128xf32> to vector<8x64xf32>
    %124 = arith.negf %123 : vector<8x64xf32>
    %125 = math.exp %124 : vector<8x64xf32>
    %cst_50 = arith.constant 1.000000e+00 : f32
    %126 = vector.broadcast %cst_50 : f32 to vector<8x64xf32>
    %127 = arith.addf %126, %125 : vector<8x64xf32>
    %128 = arith.divf %126, %127 : vector<8x64xf32>
    %129 = arith.mulf %123, %128 : vector<8x64xf32>
    %130 = vector.extract_strided_slice %122 {offsets = [0, 64], sizes = [8, 64], strides = [1, 1]} : vector<8x128xf32> to vector<8x64xf32>
    %131 = arith.mulf %129, %130 : vector<8x64xf32>
    %cst_51 = arith.constant dense<0.000000e+00> : vector<8x32xf32>
    %132 = tpu.matmul %131, %10, %cst_51 {dimension_numbers = #tpu.dot_dimension_numbers<[1], [0], [0], [1], [0, 0, 1, 1], [], []>} : vector<8x64xf32>, vector<64x32xf32>, vector<8x32xf32> -> vector<8x32xf32>
    %133 = arith.addf %109, %132 : vector<8x32xf32>
    %c0_52 = arith.constant 0 : index
    %c0_53 = arith.constant 0 : index
    %134 = vector.load %arg11[%c0_52, %c0_53] : memref<1x32xf32, #tpu.memory_space<vmem>>, vector<1x32xf32>
    %c0_54 = arith.constant 0 : index
    %c0_55 = arith.constant 0 : index
    %135 = vector.load %arg12[%c0_54, %c0_55] : memref<32x96xf32, #tpu.memory_space<vmem>>, vector<32x96xf32>
    %c0_56 = arith.constant 0 : index
    %c0_57 = arith.constant 0 : index
    %136 = vector.load %arg13[%c0_56, %c0_57] : memref<32x32xf32, #tpu.memory_space<vmem>>, vector<32x32xf32>
    %c0_58 = arith.constant 0 : index
    %c0_59 = arith.constant 0 : index
    %137 = vector.load %arg14[%c0_58, %c0_59] : memref<1x32xf32, #tpu.memory_space<vmem>>, vector<1x32xf32>
    %c0_60 = arith.constant 0 : index
    %c0_61 = arith.constant 0 : index
    %138 = vector.load %arg15[%c0_60, %c0_61] : memref<32x128xf32, #tpu.memory_space<vmem>>, vector<32x128xf32>
    %c0_62 = arith.constant 0 : index
    %c0_63 = arith.constant 0 : index
    %139 = vector.load %arg16[%c0_62, %c0_63] : memref<64x32xf32, #tpu.memory_space<vmem>>, vector<64x32xf32>
    %140 = arith.mulf %133, %133 : vector<8x32xf32>
    %cst_64 = arith.constant dense<0.000000e+00> : vector<8xf32>
    %141 = vector.multi_reduction <add>, %140, %cst_64 [1] : vector<8x32xf32> to vector<8xf32>
    %142 = vector.shape_cast %141 : vector<8xf32> to vector<8x1xf32>
    %cst_65 = arith.constant 3.200000e+01 : f32
    %143 = vector.broadcast %cst_65 : f32 to vector<8x1xf32>
    %144 = arith.divf %142, %143 : vector<8x1xf32>
    %cst_66 = arith.constant 9.99999997E-7 : f32
    %145 = vector.broadcast %cst_66 : f32 to vector<8x1xf32>
    %146 = arith.addf %144, %145 : vector<8x1xf32>
    %147 = math.rsqrt %146 : vector<8x1xf32>
    %148 = vector.broadcast %147 : vector<8x1xf32> to vector<8x32xf32>
    %149 = arith.mulf %133, %148 : vector<8x32xf32>
    %150 = vector.broadcast %134 : vector<1x32xf32> to vector<8x32xf32>
    %151 = arith.mulf %149, %150 : vector<8x32xf32>
    %cst_67 = arith.constant dense<0.000000e+00> : vector<8x96xf32>
    %152 = tpu.matmul %151, %135, %cst_67 {dimension_numbers = #tpu.dot_dimension_numbers<[1], [0], [0], [1], [0, 0, 1, 1], [], []>} : vector<8x32xf32>, vector<32x96xf32>, vector<8x96xf32> -> vector<8x96xf32>
    %153 = vector.extract_strided_slice %152 {offsets = [0, 0], sizes = [8, 32], strides = [1, 1]} : vector<8x96xf32> to vector<8x32xf32>
    %154 = vector.extract_strided_slice %152 {offsets = [0, 32], sizes = [8, 32], strides = [1, 1]} : vector<8x96xf32> to vector<8x32xf32>
    %155 = vector.extract_strided_slice %152 {offsets = [0, 64], sizes = [8, 32], strides = [1, 1]} : vector<8x96xf32> to vector<8x32xf32>
    %156 = arith.mulf %153, %2 : vector<8x32xf32>
    %cst_68 = arith.constant dense<0.000000e+00> : vector<8x32xf32>
    %157 = tpu.matmul %153, %4, %cst_68 {dimension_numbers = #tpu.dot_dimension_numbers<[1], [0], [0], [1], [0, 0, 1, 1], [], []>} : vector<8x32xf32>, vector<32x32xf32>, vector<8x32xf32> -> vector<8x32xf32>
    %158 = arith.mulf %157, %3 : vector<8x32xf32>
    %159 = arith.addf %156, %158 : vector<8x32xf32>
    %160 = arith.mulf %154, %2 : vector<8x32xf32>
    %cst_69 = arith.constant dense<0.000000e+00> : vector<8x32xf32>
    %161 = tpu.matmul %154, %4, %cst_69 {dimension_numbers = #tpu.dot_dimension_numbers<[1], [0], [0], [1], [0, 0, 1, 1], [], []>} : vector<8x32xf32>, vector<32x32xf32>, vector<8x32xf32> -> vector<8x32xf32>
    %162 = arith.mulf %161, %3 : vector<8x32xf32>
    %163 = arith.addf %160, %162 : vector<8x32xf32>
    %164 = vector.extract_strided_slice %159 {offsets = [0, 0], sizes = [8, 8], strides = [1, 1]} : vector<8x32xf32> to vector<8x8xf32>
    %165 = vector.extract_strided_slice %163 {offsets = [0, 0], sizes = [8, 8], strides = [1, 1]} : vector<8x32xf32> to vector<8x8xf32>
    %166 = vector.extract_strided_slice %155 {offsets = [0, 0], sizes = [8, 8], strides = [1, 1]} : vector<8x32xf32> to vector<8x8xf32>
    %167 = tpu.transpose %165, [1, 0] : vector<8x8xf32> -> vector<8x8xf32>
    %cst_70 = arith.constant dense<0.000000e+00> : vector<8x8xf32>
    %168 = tpu.matmul %164, %167, %cst_70 {dimension_numbers = #tpu.dot_dimension_numbers<[1], [0], [0], [1], [0, 0, 1, 1], [], []>} : vector<8x8xf32>, vector<8x8xf32>, vector<8x8xf32> -> vector<8x8xf32>
    %cst_71 = arith.constant 0.353553385 : f32
    %169 = vector.broadcast %cst_71 : f32 to vector<8x8xf32>
    %170 = arith.mulf %168, %169 : vector<8x8xf32>
    %cst_72 = arith.constant dense<0xFF800000> : vector<8xf32>
    %171 = vector.multi_reduction <maximumf>, %170, %cst_72 [1] : vector<8x8xf32> to vector<8xf32>
    %172 = vector.shape_cast %171 : vector<8xf32> to vector<8x1xf32>
    %173 = vector.broadcast %172 : vector<8x1xf32> to vector<8x8xf32>
    %174 = arith.subf %170, %173 : vector<8x8xf32>
    %175 = math.exp %174 : vector<8x8xf32>
    %cst_73 = arith.constant dense<0.000000e+00> : vector<8xf32>
    %176 = vector.multi_reduction <add>, %175, %cst_73 [1] : vector<8x8xf32> to vector<8xf32>
    %177 = vector.shape_cast %176 : vector<8xf32> to vector<8x1xf32>
    %178 = tpu.reciprocal %177 {approx = true} : vector<8x1xf32> -> vector<8x1xf32>
    %179 = vector.broadcast %178 : vector<8x1xf32> to vector<8x8xf32>
    %180 = arith.mulf %175, %179 : vector<8x8xf32>
    %cst_74 = arith.constant dense<0.000000e+00> : vector<8x8xf32>
    %181 = tpu.matmul %180, %166, %cst_74 {dimension_numbers = #tpu.dot_dimension_numbers<[1], [0], [0], [1], [0, 0, 1, 1], [], []>} : vector<8x8xf32>, vector<8x8xf32>, vector<8x8xf32> -> vector<8x8xf32>
    %182 = vector.extract_strided_slice %159 {offsets = [0, 8], sizes = [8, 8], strides = [1, 1]} : vector<8x32xf32> to vector<8x8xf32>
    %183 = vector.extract_strided_slice %163 {offsets = [0, 8], sizes = [8, 8], strides = [1, 1]} : vector<8x32xf32> to vector<8x8xf32>
    %184 = vector.extract_strided_slice %155 {offsets = [0, 8], sizes = [8, 8], strides = [1, 1]} : vector<8x32xf32> to vector<8x8xf32>
    %185 = tpu.transpose %183, [1, 0] : vector<8x8xf32> -> vector<8x8xf32>
    %cst_75 = arith.constant dense<0.000000e+00> : vector<8x8xf32>
    %186 = tpu.matmul %182, %185, %cst_75 {dimension_numbers = #tpu.dot_dimension_numbers<[1], [0], [0], [1], [0, 0, 1, 1], [], []>} : vector<8x8xf32>, vector<8x8xf32>, vector<8x8xf32> -> vector<8x8xf32>
    %cst_76 = arith.constant 0.353553385 : f32
    %187 = vector.broadcast %cst_76 : f32 to vector<8x8xf32>
    %188 = arith.mulf %186, %187 : vector<8x8xf32>
    %cst_77 = arith.constant dense<0xFF800000> : vector<8xf32>
    %189 = vector.multi_reduction <maximumf>, %188, %cst_77 [1] : vector<8x8xf32> to vector<8xf32>
    %190 = vector.shape_cast %189 : vector<8xf32> to vector<8x1xf32>
    %191 = vector.broadcast %190 : vector<8x1xf32> to vector<8x8xf32>
    %192 = arith.subf %188, %191 : vector<8x8xf32>
    %193 = math.exp %192 : vector<8x8xf32>
    %cst_78 = arith.constant dense<0.000000e+00> : vector<8xf32>
    %194 = vector.multi_reduction <add>, %193, %cst_78 [1] : vector<8x8xf32> to vector<8xf32>
    %195 = vector.shape_cast %194 : vector<8xf32> to vector<8x1xf32>
    %196 = tpu.reciprocal %195 {approx = true} : vector<8x1xf32> -> vector<8x1xf32>
    %197 = vector.broadcast %196 : vector<8x1xf32> to vector<8x8xf32>
    %198 = arith.mulf %193, %197 : vector<8x8xf32>
    %cst_79 = arith.constant dense<0.000000e+00> : vector<8x8xf32>
    %199 = tpu.matmul %198, %184, %cst_79 {dimension_numbers = #tpu.dot_dimension_numbers<[1], [0], [0], [1], [0, 0, 1, 1], [], []>} : vector<8x8xf32>, vector<8x8xf32>, vector<8x8xf32> -> vector<8x8xf32>
    %200 = vector.extract_strided_slice %159 {offsets = [0, 16], sizes = [8, 8], strides = [1, 1]} : vector<8x32xf32> to vector<8x8xf32>
    %201 = vector.extract_strided_slice %163 {offsets = [0, 16], sizes = [8, 8], strides = [1, 1]} : vector<8x32xf32> to vector<8x8xf32>
    %202 = vector.extract_strided_slice %155 {offsets = [0, 16], sizes = [8, 8], strides = [1, 1]} : vector<8x32xf32> to vector<8x8xf32>
    %203 = tpu.transpose %201, [1, 0] : vector<8x8xf32> -> vector<8x8xf32>
    %cst_80 = arith.constant dense<0.000000e+00> : vector<8x8xf32>
    %204 = tpu.matmul %200, %203, %cst_80 {dimension_numbers = #tpu.dot_dimension_numbers<[1], [0], [0], [1], [0, 0, 1, 1], [], []>} : vector<8x8xf32>, vector<8x8xf32>, vector<8x8xf32> -> vector<8x8xf32>
    %cst_81 = arith.constant 0.353553385 : f32
    %205 = vector.broadcast %cst_81 : f32 to vector<8x8xf32>
    %206 = arith.mulf %204, %205 : vector<8x8xf32>
    %cst_82 = arith.constant dense<0xFF800000> : vector<8xf32>
    %207 = vector.multi_reduction <maximumf>, %206, %cst_82 [1] : vector<8x8xf32> to vector<8xf32>
    %208 = vector.shape_cast %207 : vector<8xf32> to vector<8x1xf32>
    %209 = vector.broadcast %208 : vector<8x1xf32> to vector<8x8xf32>
    %210 = arith.subf %206, %209 : vector<8x8xf32>
    %211 = math.exp %210 : vector<8x8xf32>
    %cst_83 = arith.constant dense<0.000000e+00> : vector<8xf32>
    %212 = vector.multi_reduction <add>, %211, %cst_83 [1] : vector<8x8xf32> to vector<8xf32>
    %213 = vector.shape_cast %212 : vector<8xf32> to vector<8x1xf32>
    %214 = tpu.reciprocal %213 {approx = true} : vector<8x1xf32> -> vector<8x1xf32>
    %215 = vector.broadcast %214 : vector<8x1xf32> to vector<8x8xf32>
    %216 = arith.mulf %211, %215 : vector<8x8xf32>
    %cst_84 = arith.constant dense<0.000000e+00> : vector<8x8xf32>
    %217 = tpu.matmul %216, %202, %cst_84 {dimension_numbers = #tpu.dot_dimension_numbers<[1], [0], [0], [1], [0, 0, 1, 1], [], []>} : vector<8x8xf32>, vector<8x8xf32>, vector<8x8xf32> -> vector<8x8xf32>
    %218 = vector.extract_strided_slice %159 {offsets = [0, 24], sizes = [8, 8], strides = [1, 1]} : vector<8x32xf32> to vector<8x8xf32>
    %219 = vector.extract_strided_slice %163 {offsets = [0, 24], sizes = [8, 8], strides = [1, 1]} : vector<8x32xf32> to vector<8x8xf32>
    %220 = vector.extract_strided_slice %155 {offsets = [0, 24], sizes = [8, 8], strides = [1, 1]} : vector<8x32xf32> to vector<8x8xf32>
    %221 = tpu.transpose %219, [1, 0] : vector<8x8xf32> -> vector<8x8xf32>
    %cst_85 = arith.constant dense<0.000000e+00> : vector<8x8xf32>
    %222 = tpu.matmul %218, %221, %cst_85 {dimension_numbers = #tpu.dot_dimension_numbers<[1], [0], [0], [1], [0, 0, 1, 1], [], []>} : vector<8x8xf32>, vector<8x8xf32>, vector<8x8xf32> -> vector<8x8xf32>
    %cst_86 = arith.constant 0.353553385 : f32
    %223 = vector.broadcast %cst_86 : f32 to vector<8x8xf32>
    %224 = arith.mulf %222, %223 : vector<8x8xf32>
    %cst_87 = arith.constant dense<0xFF800000> : vector<8xf32>
    %225 = vector.multi_reduction <maximumf>, %224, %cst_87 [1] : vector<8x8xf32> to vector<8xf32>
    %226 = vector.shape_cast %225 : vector<8xf32> to vector<8x1xf32>
    %227 = vector.broadcast %226 : vector<8x1xf32> to vector<8x8xf32>
    %228 = arith.subf %224, %227 : vector<8x8xf32>
    %229 = math.exp %228 : vector<8x8xf32>
    %cst_88 = arith.constant dense<0.000000e+00> : vector<8xf32>
    %230 = vector.multi_reduction <add>, %229, %cst_88 [1] : vector<8x8xf32> to vector<8xf32>
    %231 = vector.shape_cast %230 : vector<8xf32> to vector<8x1xf32>
    %232 = tpu.reciprocal %231 {approx = true} : vector<8x1xf32> -> vector<8x1xf32>
    %233 = vector.broadcast %232 : vector<8x1xf32> to vector<8x8xf32>
    %234 = arith.mulf %229, %233 : vector<8x8xf32>
    %cst_89 = arith.constant dense<0.000000e+00> : vector<8x8xf32>
    %235 = tpu.matmul %234, %220, %cst_89 {dimension_numbers = #tpu.dot_dimension_numbers<[1], [0], [0], [1], [0, 0, 1, 1], [], []>} : vector<8x8xf32>, vector<8x8xf32>, vector<8x8xf32> -> vector<8x8xf32>
    %236 = tpu.concatenate %181, %199, %217, %235 in 1 : vector<8x8xf32>, vector<8x8xf32>, vector<8x8xf32>, vector<8x8xf32> -> vector<8x32xf32>
    %cst_90 = arith.constant dense<0.000000e+00> : vector<8x32xf32>
    %237 = tpu.matmul %236, %136, %cst_90 {dimension_numbers = #tpu.dot_dimension_numbers<[1], [0], [0], [1], [0, 0, 1, 1], [], []>} : vector<8x32xf32>, vector<32x32xf32>, vector<8x32xf32> -> vector<8x32xf32>
    %238 = arith.addf %133, %237 : vector<8x32xf32>
    %239 = arith.mulf %238, %238 : vector<8x32xf32>
    %cst_91 = arith.constant dense<0.000000e+00> : vector<8xf32>
    %240 = vector.multi_reduction <add>, %239, %cst_91 [1] : vector<8x32xf32> to vector<8xf32>
    %241 = vector.shape_cast %240 : vector<8xf32> to vector<8x1xf32>
    %cst_92 = arith.constant 3.200000e+01 : f32
    %242 = vector.broadcast %cst_92 : f32 to vector<8x1xf32>
    %243 = arith.divf %241, %242 : vector<8x1xf32>
    %cst_93 = arith.constant 9.99999997E-7 : f32
    %244 = vector.broadcast %cst_93 : f32 to vector<8x1xf32>
    %245 = arith.addf %243, %244 : vector<8x1xf32>
    %246 = math.rsqrt %245 : vector<8x1xf32>
    %247 = vector.broadcast %246 : vector<8x1xf32> to vector<8x32xf32>
    %248 = arith.mulf %238, %247 : vector<8x32xf32>
    %249 = vector.broadcast %137 : vector<1x32xf32> to vector<8x32xf32>
    %250 = arith.mulf %248, %249 : vector<8x32xf32>
    %cst_94 = arith.constant dense<0.000000e+00> : vector<8x128xf32>
    %251 = tpu.matmul %250, %138, %cst_94 {dimension_numbers = #tpu.dot_dimension_numbers<[1], [0], [0], [1], [0, 0, 1, 1], [], []>} : vector<8x32xf32>, vector<32x128xf32>, vector<8x128xf32> -> vector<8x128xf32>
    %252 = vector.extract_strided_slice %251 {offsets = [0, 0], sizes = [8, 64], strides = [1, 1]} : vector<8x128xf32> to vector<8x64xf32>
    %253 = arith.negf %252 : vector<8x64xf32>
    %254 = math.exp %253 : vector<8x64xf32>
    %cst_95 = arith.constant 1.000000e+00 : f32
    %255 = vector.broadcast %cst_95 : f32 to vector<8x64xf32>
    %256 = arith.addf %255, %254 : vector<8x64xf32>
    %257 = arith.divf %255, %256 : vector<8x64xf32>
    %258 = arith.mulf %252, %257 : vector<8x64xf32>
    %259 = vector.extract_strided_slice %251 {offsets = [0, 64], sizes = [8, 64], strides = [1, 1]} : vector<8x128xf32> to vector<8x64xf32>
    %260 = arith.mulf %258, %259 : vector<8x64xf32>
    %cst_96 = arith.constant dense<0.000000e+00> : vector<8x32xf32>
    %261 = tpu.matmul %260, %139, %cst_96 {dimension_numbers = #tpu.dot_dimension_numbers<[1], [0], [0], [1], [0, 0, 1, 1], [], []>} : vector<8x64xf32>, vector<64x32xf32>, vector<8x32xf32> -> vector<8x32xf32>
    %262 = arith.addf %238, %261 : vector<8x32xf32>
    %c0_97 = arith.constant 0 : index
    %c0_98 = arith.constant 0 : index
    %263 = vector.load %arg17[%c0_97, %c0_98] : memref<1x32xf32, #tpu.memory_space<vmem>>, vector<1x32xf32>
    %c0_99 = arith.constant 0 : index
    %c0_100 = arith.constant 0 : index
    %264 = vector.load %arg18[%c0_99, %c0_100] : memref<32x96xf32, #tpu.memory_space<vmem>>, vector<32x96xf32>
    %c0_101 = arith.constant 0 : index
    %c0_102 = arith.constant 0 : index
    %265 = vector.load %arg19[%c0_101, %c0_102] : memref<32x32xf32, #tpu.memory_space<vmem>>, vector<32x32xf32>
    %c0_103 = arith.constant 0 : index
    %c0_104 = arith.constant 0 : index
    %266 = vector.load %arg20[%c0_103, %c0_104] : memref<1x32xf32, #tpu.memory_space<vmem>>, vector<1x32xf32>
    %c0_105 = arith.constant 0 : index
    %c0_106 = arith.constant 0 : index
    %267 = vector.load %arg21[%c0_105, %c0_106] : memref<32x128xf32, #tpu.memory_space<vmem>>, vector<32x128xf32>
    %c0_107 = arith.constant 0 : index
    %c0_108 = arith.constant 0 : index
    %268 = vector.load %arg22[%c0_107, %c0_108] : memref<64x32xf32, #tpu.memory_space<vmem>>, vector<64x32xf32>
    %269 = arith.mulf %262, %262 : vector<8x32xf32>
    %cst_109 = arith.constant dense<0.000000e+00> : vector<8xf32>
    %270 = vector.multi_reduction <add>, %269, %cst_109 [1] : vector<8x32xf32> to vector<8xf32>
    %271 = vector.shape_cast %270 : vector<8xf32> to vector<8x1xf32>
    %cst_110 = arith.constant 3.200000e+01 : f32
    %272 = vector.broadcast %cst_110 : f32 to vector<8x1xf32>
    %273 = arith.divf %271, %272 : vector<8x1xf32>
    %cst_111 = arith.constant 9.99999997E-7 : f32
    %274 = vector.broadcast %cst_111 : f32 to vector<8x1xf32>
    %275 = arith.addf %273, %274 : vector<8x1xf32>
    %276 = math.rsqrt %275 : vector<8x1xf32>
    %277 = vector.broadcast %276 : vector<8x1xf32> to vector<8x32xf32>
    %278 = arith.mulf %262, %277 : vector<8x32xf32>
    %279 = vector.broadcast %263 : vector<1x32xf32> to vector<8x32xf32>
    %280 = arith.mulf %278, %279 : vector<8x32xf32>
    %cst_112 = arith.constant dense<0.000000e+00> : vector<8x96xf32>
    %281 = tpu.matmul %280, %264, %cst_112 {dimension_numbers = #tpu.dot_dimension_numbers<[1], [0], [0], [1], [0, 0, 1, 1], [], []>} : vector<8x32xf32>, vector<32x96xf32>, vector<8x96xf32> -> vector<8x96xf32>
    %282 = vector.extract_strided_slice %281 {offsets = [0, 0], sizes = [8, 32], strides = [1, 1]} : vector<8x96xf32> to vector<8x32xf32>
    %283 = vector.extract_strided_slice %281 {offsets = [0, 32], sizes = [8, 32], strides = [1, 1]} : vector<8x96xf32> to vector<8x32xf32>
    %284 = vector.extract_strided_slice %281 {offsets = [0, 64], sizes = [8, 32], strides = [1, 1]} : vector<8x96xf32> to vector<8x32xf32>
    %285 = arith.mulf %282, %2 : vector<8x32xf32>
    %cst_113 = arith.constant dense<0.000000e+00> : vector<8x32xf32>
    %286 = tpu.matmul %282, %4, %cst_113 {dimension_numbers = #tpu.dot_dimension_numbers<[1], [0], [0], [1], [0, 0, 1, 1], [], []>} : vector<8x32xf32>, vector<32x32xf32>, vector<8x32xf32> -> vector<8x32xf32>
    %287 = arith.mulf %286, %3 : vector<8x32xf32>
    %288 = arith.addf %285, %287 : vector<8x32xf32>
    %289 = arith.mulf %283, %2 : vector<8x32xf32>
    %cst_114 = arith.constant dense<0.000000e+00> : vector<8x32xf32>
    %290 = tpu.matmul %283, %4, %cst_114 {dimension_numbers = #tpu.dot_dimension_numbers<[1], [0], [0], [1], [0, 0, 1, 1], [], []>} : vector<8x32xf32>, vector<32x32xf32>, vector<8x32xf32> -> vector<8x32xf32>
    %291 = arith.mulf %290, %3 : vector<8x32xf32>
    %292 = arith.addf %289, %291 : vector<8x32xf32>
    %293 = vector.extract_strided_slice %288 {offsets = [0, 0], sizes = [8, 8], strides = [1, 1]} : vector<8x32xf32> to vector<8x8xf32>
    %294 = vector.extract_strided_slice %292 {offsets = [0, 0], sizes = [8, 8], strides = [1, 1]} : vector<8x32xf32> to vector<8x8xf32>
    %295 = vector.extract_strided_slice %284 {offsets = [0, 0], sizes = [8, 8], strides = [1, 1]} : vector<8x32xf32> to vector<8x8xf32>
    %296 = tpu.transpose %294, [1, 0] : vector<8x8xf32> -> vector<8x8xf32>
    %cst_115 = arith.constant dense<0.000000e+00> : vector<8x8xf32>
    %297 = tpu.matmul %293, %296, %cst_115 {dimension_numbers = #tpu.dot_dimension_numbers<[1], [0], [0], [1], [0, 0, 1, 1], [], []>} : vector<8x8xf32>, vector<8x8xf32>, vector<8x8xf32> -> vector<8x8xf32>
    %cst_116 = arith.constant 0.353553385 : f32
    %298 = vector.broadcast %cst_116 : f32 to vector<8x8xf32>
    %299 = arith.mulf %297, %298 : vector<8x8xf32>
    %cst_117 = arith.constant dense<0xFF800000> : vector<8xf32>
    %300 = vector.multi_reduction <maximumf>, %299, %cst_117 [1] : vector<8x8xf32> to vector<8xf32>
    %301 = vector.shape_cast %300 : vector<8xf32> to vector<8x1xf32>
    %302 = vector.broadcast %301 : vector<8x1xf32> to vector<8x8xf32>
    %303 = arith.subf %299, %302 : vector<8x8xf32>
    %304 = math.exp %303 : vector<8x8xf32>
    %cst_118 = arith.constant dense<0.000000e+00> : vector<8xf32>
    %305 = vector.multi_reduction <add>, %304, %cst_118 [1] : vector<8x8xf32> to vector<8xf32>
    %306 = vector.shape_cast %305 : vector<8xf32> to vector<8x1xf32>
    %307 = tpu.reciprocal %306 {approx = true} : vector<8x1xf32> -> vector<8x1xf32>
    %308 = vector.broadcast %307 : vector<8x1xf32> to vector<8x8xf32>
    %309 = arith.mulf %304, %308 : vector<8x8xf32>
    %cst_119 = arith.constant dense<0.000000e+00> : vector<8x8xf32>
    %310 = tpu.matmul %309, %295, %cst_119 {dimension_numbers = #tpu.dot_dimension_numbers<[1], [0], [0], [1], [0, 0, 1, 1], [], []>} : vector<8x8xf32>, vector<8x8xf32>, vector<8x8xf32> -> vector<8x8xf32>
    %311 = vector.extract_strided_slice %288 {offsets = [0, 8], sizes = [8, 8], strides = [1, 1]} : vector<8x32xf32> to vector<8x8xf32>
    %312 = vector.extract_strided_slice %292 {offsets = [0, 8], sizes = [8, 8], strides = [1, 1]} : vector<8x32xf32> to vector<8x8xf32>
    %313 = vector.extract_strided_slice %284 {offsets = [0, 8], sizes = [8, 8], strides = [1, 1]} : vector<8x32xf32> to vector<8x8xf32>
    %314 = tpu.transpose %312, [1, 0] : vector<8x8xf32> -> vector<8x8xf32>
    %cst_120 = arith.constant dense<0.000000e+00> : vector<8x8xf32>
    %315 = tpu.matmul %311, %314, %cst_120 {dimension_numbers = #tpu.dot_dimension_numbers<[1], [0], [0], [1], [0, 0, 1, 1], [], []>} : vector<8x8xf32>, vector<8x8xf32>, vector<8x8xf32> -> vector<8x8xf32>
    %cst_121 = arith.constant 0.353553385 : f32
    %316 = vector.broadcast %cst_121 : f32 to vector<8x8xf32>
    %317 = arith.mulf %315, %316 : vector<8x8xf32>
    %cst_122 = arith.constant dense<0xFF800000> : vector<8xf32>
    %318 = vector.multi_reduction <maximumf>, %317, %cst_122 [1] : vector<8x8xf32> to vector<8xf32>
    %319 = vector.shape_cast %318 : vector<8xf32> to vector<8x1xf32>
    %320 = vector.broadcast %319 : vector<8x1xf32> to vector<8x8xf32>
    %321 = arith.subf %317, %320 : vector<8x8xf32>
    %322 = math.exp %321 : vector<8x8xf32>
    %cst_123 = arith.constant dense<0.000000e+00> : vector<8xf32>
    %323 = vector.multi_reduction <add>, %322, %cst_123 [1] : vector<8x8xf32> to vector<8xf32>
    %324 = vector.shape_cast %323 : vector<8xf32> to vector<8x1xf32>
    %325 = tpu.reciprocal %324 {approx = true} : vector<8x1xf32> -> vector<8x1xf32>
    %326 = vector.broadcast %325 : vector<8x1xf32> to vector<8x8xf32>
    %327 = arith.mulf %322, %326 : vector<8x8xf32>
    %cst_124 = arith.constant dense<0.000000e+00> : vector<8x8xf32>
    %328 = tpu.matmul %327, %313, %cst_124 {dimension_numbers = #tpu.dot_dimension_numbers<[1], [0], [0], [1], [0, 0, 1, 1], [], []>} : vector<8x8xf32>, vector<8x8xf32>, vector<8x8xf32> -> vector<8x8xf32>
    %329 = vector.extract_strided_slice %288 {offsets = [0, 16], sizes = [8, 8], strides = [1, 1]} : vector<8x32xf32> to vector<8x8xf32>
    %330 = vector.extract_strided_slice %292 {offsets = [0, 16], sizes = [8, 8], strides = [1, 1]} : vector<8x32xf32> to vector<8x8xf32>
    %331 = vector.extract_strided_slice %284 {offsets = [0, 16], sizes = [8, 8], strides = [1, 1]} : vector<8x32xf32> to vector<8x8xf32>
    %332 = tpu.transpose %330, [1, 0] : vector<8x8xf32> -> vector<8x8xf32>
    %cst_125 = arith.constant dense<0.000000e+00> : vector<8x8xf32>
    %333 = tpu.matmul %329, %332, %cst_125 {dimension_numbers = #tpu.dot_dimension_numbers<[1], [0], [0], [1], [0, 0, 1, 1], [], []>} : vector<8x8xf32>, vector<8x8xf32>, vector<8x8xf32> -> vector<8x8xf32>
    %cst_126 = arith.constant 0.353553385 : f32
    %334 = vector.broadcast %cst_126 : f32 to vector<8x8xf32>
    %335 = arith.mulf %333, %334 : vector<8x8xf32>
    %cst_127 = arith.constant dense<0xFF800000> : vector<8xf32>
    %336 = vector.multi_reduction <maximumf>, %335, %cst_127 [1] : vector<8x8xf32> to vector<8xf32>
    %337 = vector.shape_cast %336 : vector<8xf32> to vector<8x1xf32>
    %338 = vector.broadcast %337 : vector<8x1xf32> to vector<8x8xf32>
    %339 = arith.subf %335, %338 : vector<8x8xf32>
    %340 = math.exp %339 : vector<8x8xf32>
    %cst_128 = arith.constant dense<0.000000e+00> : vector<8xf32>
    %341 = vector.multi_reduction <add>, %340, %cst_128 [1] : vector<8x8xf32> to vector<8xf32>
    %342 = vector.shape_cast %341 : vector<8xf32> to vector<8x1xf32>
    %343 = tpu.reciprocal %342 {approx = true} : vector<8x1xf32> -> vector<8x1xf32>
    %344 = vector.broadcast %343 : vector<8x1xf32> to vector<8x8xf32>
    %345 = arith.mulf %340, %344 : vector<8x8xf32>
    %cst_129 = arith.constant dense<0.000000e+00> : vector<8x8xf32>
    %346 = tpu.matmul %345, %331, %cst_129 {dimension_numbers = #tpu.dot_dimension_numbers<[1], [0], [0], [1], [0, 0, 1, 1], [], []>} : vector<8x8xf32>, vector<8x8xf32>, vector<8x8xf32> -> vector<8x8xf32>
    %347 = vector.extract_strided_slice %288 {offsets = [0, 24], sizes = [8, 8], strides = [1, 1]} : vector<8x32xf32> to vector<8x8xf32>
    %348 = vector.extract_strided_slice %292 {offsets = [0, 24], sizes = [8, 8], strides = [1, 1]} : vector<8x32xf32> to vector<8x8xf32>
    %349 = vector.extract_strided_slice %284 {offsets = [0, 24], sizes = [8, 8], strides = [1, 1]} : vector<8x32xf32> to vector<8x8xf32>
    %350 = tpu.transpose %348, [1, 0] : vector<8x8xf32> -> vector<8x8xf32>
    %cst_130 = arith.constant dense<0.000000e+00> : vector<8x8xf32>
    %351 = tpu.matmul %347, %350, %cst_130 {dimension_numbers = #tpu.dot_dimension_numbers<[1], [0], [0], [1], [0, 0, 1, 1], [], []>} : vector<8x8xf32>, vector<8x8xf32>, vector<8x8xf32> -> vector<8x8xf32>
    %cst_131 = arith.constant 0.353553385 : f32
    %352 = vector.broadcast %cst_131 : f32 to vector<8x8xf32>
    %353 = arith.mulf %351, %352 : vector<8x8xf32>
    %cst_132 = arith.constant dense<0xFF800000> : vector<8xf32>
    %354 = vector.multi_reduction <maximumf>, %353, %cst_132 [1] : vector<8x8xf32> to vector<8xf32>
    %355 = vector.shape_cast %354 : vector<8xf32> to vector<8x1xf32>
    %356 = vector.broadcast %355 : vector<8x1xf32> to vector<8x8xf32>
    %357 = arith.subf %353, %356 : vector<8x8xf32>
    %358 = math.exp %357 : vector<8x8xf32>
    %cst_133 = arith.constant dense<0.000000e+00> : vector<8xf32>
    %359 = vector.multi_reduction <add>, %358, %cst_133 [1] : vector<8x8xf32> to vector<8xf32>
    %360 = vector.shape_cast %359 : vector<8xf32> to vector<8x1xf32>
    %361 = tpu.reciprocal %360 {approx = true} : vector<8x1xf32> -> vector<8x1xf32>
    %362 = vector.broadcast %361 : vector<8x1xf32> to vector<8x8xf32>
    %363 = arith.mulf %358, %362 : vector<8x8xf32>
    %cst_134 = arith.constant dense<0.000000e+00> : vector<8x8xf32>
    %364 = tpu.matmul %363, %349, %cst_134 {dimension_numbers = #tpu.dot_dimension_numbers<[1], [0], [0], [1], [0, 0, 1, 1], [], []>} : vector<8x8xf32>, vector<8x8xf32>, vector<8x8xf32> -> vector<8x8xf32>
    %365 = tpu.concatenate %310, %328, %346, %364 in 1 : vector<8x8xf32>, vector<8x8xf32>, vector<8x8xf32>, vector<8x8xf32> -> vector<8x32xf32>
    %cst_135 = arith.constant dense<0.000000e+00> : vector<8x32xf32>
    %366 = tpu.matmul %365, %265, %cst_135 {dimension_numbers = #tpu.dot_dimension_numbers<[1], [0], [0], [1], [0, 0, 1, 1], [], []>} : vector<8x32xf32>, vector<32x32xf32>, vector<8x32xf32> -> vector<8x32xf32>
    %367 = arith.addf %262, %366 : vector<8x32xf32>
    %368 = arith.mulf %367, %367 : vector<8x32xf32>
    %cst_136 = arith.constant dense<0.000000e+00> : vector<8xf32>
    %369 = vector.multi_reduction <add>, %368, %cst_136 [1] : vector<8x32xf32> to vector<8xf32>
    %370 = vector.shape_cast %369 : vector<8xf32> to vector<8x1xf32>
    %cst_137 = arith.constant 3.200000e+01 : f32
    %371 = vector.broadcast %cst_137 : f32 to vector<8x1xf32>
    %372 = arith.divf %370, %371 : vector<8x1xf32>
    %cst_138 = arith.constant 9.99999997E-7 : f32
    %373 = vector.broadcast %cst_138 : f32 to vector<8x1xf32>
    %374 = arith.addf %372, %373 : vector<8x1xf32>
    %375 = math.rsqrt %374 : vector<8x1xf32>
    %376 = vector.broadcast %375 : vector<8x1xf32> to vector<8x32xf32>
    %377 = arith.mulf %367, %376 : vector<8x32xf32>
    %378 = vector.broadcast %266 : vector<1x32xf32> to vector<8x32xf32>
    %379 = arith.mulf %377, %378 : vector<8x32xf32>
    %cst_139 = arith.constant dense<0.000000e+00> : vector<8x128xf32>
    %380 = tpu.matmul %379, %267, %cst_139 {dimension_numbers = #tpu.dot_dimension_numbers<[1], [0], [0], [1], [0, 0, 1, 1], [], []>} : vector<8x32xf32>, vector<32x128xf32>, vector<8x128xf32> -> vector<8x128xf32>
    %381 = vector.extract_strided_slice %380 {offsets = [0, 0], sizes = [8, 64], strides = [1, 1]} : vector<8x128xf32> to vector<8x64xf32>
    %382 = arith.negf %381 : vector<8x64xf32>
    %383 = math.exp %382 : vector<8x64xf32>
    %cst_140 = arith.constant 1.000000e+00 : f32
    %384 = vector.broadcast %cst_140 : f32 to vector<8x64xf32>
    %385 = arith.addf %384, %383 : vector<8x64xf32>
    %386 = arith.divf %384, %385 : vector<8x64xf32>
    %387 = arith.mulf %381, %386 : vector<8x64xf32>
    %388 = vector.extract_strided_slice %380 {offsets = [0, 64], sizes = [8, 64], strides = [1, 1]} : vector<8x128xf32> to vector<8x64xf32>
    %389 = arith.mulf %387, %388 : vector<8x64xf32>
    %cst_141 = arith.constant dense<0.000000e+00> : vector<8x32xf32>
    %390 = tpu.matmul %389, %268, %cst_141 {dimension_numbers = #tpu.dot_dimension_numbers<[1], [0], [0], [1], [0, 0, 1, 1], [], []>} : vector<8x64xf32>, vector<64x32xf32>, vector<8x32xf32> -> vector<8x32xf32>
    %391 = arith.addf %367, %390 : vector<8x32xf32>
    %c0_142 = arith.constant 0 : index
    %c0_143 = arith.constant 0 : index
    %392 = vector.load %arg23[%c0_142, %c0_143] : memref<32x1024xf32, #tpu.memory_space<vmem>>, vector<32x1024xf32>
    %c0_144 = arith.constant 0 : index
    %c0_145 = arith.constant 0 : index
    %393 = vector.load %arg24[%c0_144, %c0_145] : memref<1x1024xf32, #tpu.memory_space<vmem>>, vector<1x1024xf32>
    %c0_146 = arith.constant 0 : index
    %c0_147 = arith.constant 0 : index
    %394 = vector.load %arg25[%c0_146, %c0_147] : memref<1024x128xf32, #tpu.memory_space<vmem>>, vector<1024x128xf32>
    %c0_148 = arith.constant 0 : index
    %c0_149 = arith.constant 0 : index
    %395 = vector.load %arg26[%c0_148, %c0_149] : memref<1x128xf32, #tpu.memory_space<vmem>>, vector<1x128xf32>
    %c0_150 = arith.constant 0 : index
    %c0_151 = arith.constant 0 : index
    %396 = vector.load %arg27[%c0_150, %c0_151] : memref<128x128xf32, #tpu.memory_space<vmem>>, vector<128x128xf32>
    %c0_152 = arith.constant 0 : index
    %c0_153 = arith.constant 0 : index
    %397 = vector.load %arg28[%c0_152, %c0_153] : memref<1x128xf32, #tpu.memory_space<vmem>>, vector<1x128xf32>
    %cst_154 = arith.constant dense<0.000000e+00> : vector<8x1024xf32>
    %398 = tpu.matmul %391, %392, %cst_154 {dimension_numbers = #tpu.dot_dimension_numbers<[1], [0], [0], [1], [0, 0, 1, 1], [], []>} : vector<8x32xf32>, vector<32x1024xf32>, vector<8x1024xf32> -> vector<8x1024xf32>
    %399 = vector.broadcast %393 : vector<1x1024xf32> to vector<8x1024xf32>
    %400 = arith.addf %398, %399 : vector<8x1024xf32>
    %401 = arith.negf %400 : vector<8x1024xf32>
    %402 = math.exp %401 : vector<8x1024xf32>
    %cst_155 = arith.constant 1.000000e+00 : f32
    %403 = vector.broadcast %cst_155 : f32 to vector<8x1024xf32>
    %404 = arith.addf %403, %402 : vector<8x1024xf32>
    %405 = arith.divf %403, %404 : vector<8x1024xf32>
    %406 = arith.mulf %400, %405 : vector<8x1024xf32>
    %cst_156 = arith.constant dense<0.000000e+00> : vector<8x128xf32>
    %407 = tpu.matmul %406, %394, %cst_156 {dimension_numbers = #tpu.dot_dimension_numbers<[1], [0], [0], [1], [0, 0, 1, 1], [], []>} : vector<8x1024xf32>, vector<1024x128xf32>, vector<8x128xf32> -> vector<8x128xf32>
    %408 = vector.broadcast %395 : vector<1x128xf32> to vector<8x128xf32>
    %409 = arith.addf %407, %408 : vector<8x128xf32>
    %410 = arith.negf %409 : vector<8x128xf32>
    %411 = math.exp %410 : vector<8x128xf32>
    %cst_157 = arith.constant 1.000000e+00 : f32
    %412 = vector.broadcast %cst_157 : f32 to vector<8x128xf32>
    %413 = arith.addf %412, %411 : vector<8x128xf32>
    %414 = arith.divf %412, %413 : vector<8x128xf32>
    %415 = arith.mulf %409, %414 : vector<8x128xf32>
    %cst_158 = arith.constant dense<0.000000e+00> : vector<8x128xf32>
    %416 = tpu.matmul %415, %396, %cst_158 {dimension_numbers = #tpu.dot_dimension_numbers<[1], [0], [0], [1], [0, 0, 1, 1], [], []>} : vector<8x128xf32>, vector<128x128xf32>, vector<8x128xf32> -> vector<8x128xf32>
    %417 = vector.broadcast %397 : vector<1x128xf32> to vector<8x128xf32>
    %418 = arith.addf %416, %417 : vector<8x128xf32>
    %c0_159 = arith.constant 0 : index
    %c0_160 = arith.constant 0 : index
    %c0_161 = arith.constant 0 : index
    %419 = vector.load %arg29[%c0_159, %c0_160, %c0_161] : memref<1x8x128xf32, #tpu.memory_space<vmem>>, vector<1x8x128xf32>
    %420 = vector.shape_cast %419 : vector<1x8x128xf32> to vector<8x128xf32>
    %421 = vector.shape_cast %418 : vector<8x128xf32> to vector<1x8x128xf32>
    tpu.vector_store %arg29[%c0_159, %c0_160, %c0_161], %421 {strides = array<i32>} : memref<1x8x128xf32, #tpu.memory_space<vmem>>, vector<1x8x128xf32>,
    return
  }
  func.func @transform_0(%arg0: i32) -> (i32, i32, i32) {
    %c0_i32 = arith.constant 0 : i32
    %c0_i32_0 = arith.constant 0 : i32
    %c0_i32_1 = arith.constant 0 : i32
    return %arg0, %c0_i32, %c0_i32_0 : i32, i32, i32
  }
  func.func @transform_1(%arg0: i32) -> (i32, i32) {
    %c0_i32 = arith.constant 0 : i32
    %c0_i32_0 = arith.constant 0 : i32
    %c0_i32_1 = arith.constant 0 : i32
    return %c0_i32, %c0_i32_0 : i32, i32
  }
  func.func @transform_2(%arg0: i32) -> (i32, i32) {
    %c0_i32 = arith.constant 0 : i32
    %c0_i32_0 = arith.constant 0 : i32
    %c0_i32_1 = arith.constant 0 : i32
    return %c0_i32, %c0_i32_0 : i32, i32
  }
  func.func @transform_3(%arg0: i32) -> (i32, i32) {
    %c0_i32 = arith.constant 0 : i32
    %c0_i32_0 = arith.constant 0 : i32
    %c0_i32_1 = arith.constant 0 : i32
    return %c0_i32, %c0_i32_0 : i32, i32
  }
  func.func @transform_4(%arg0: i32) -> (i32, i32) {
    %c0_i32 = arith.constant 0 : i32
    %c0_i32_0 = arith.constant 0 : i32
    %c0_i32_1 = arith.constant 0 : i32
    return %c0_i32, %c0_i32_0 : i32, i32
  }
  func.func @transform_5(%arg0: i32) -> (i32, i32) {
    %c0_i32 = arith.constant 0 : i32
    %c0_i32_0 = arith.constant 0 : i32
    %c0_i32_1 = arith.constant 0 : i32
    return %c0_i32, %c0_i32_0 : i32, i32
  }
  func.func @transform_6(%arg0: i32) -> (i32, i32) {
    %c0_i32 = arith.constant 0 : i32
    %c0_i32_0 = arith.constant 0 : i32
    %c0_i32_1 = arith.constant 0 : i32
    return %c0_i32, %c0_i32_0 : i32, i32
  }
  func.func @transform_7(%arg0: i32) -> (i32, i32) {
    %c0_i32 = arith.constant 0 : i32
    %c0_i32_0 = arith.constant 0 : i32
    %c0_i32_1 = arith.constant 0 : i32
    return %c0_i32, %c0_i32_0 : i32, i32
  }
  func.func @transform_8(%arg0: i32) -> (i32, i32) {
    %c0_i32 = arith.constant 0 : i32
    %c0_i32_0 = arith.constant 0 : i32
    %c0_i32_1 = arith.constant 0 : i32
    return %c0_i32, %c0_i32_0 : i32, i32
  }
  func.func @transform_9(%arg0: i32) -> (i32, i32) {
    %c0_i32 = arith.constant 0 : i32
    %c0_i32_0 = arith.constant 0 : i32
    %c0_i32_1 = arith.constant 0 : i32
    return %c0_i32, %c0_i32_0 : i32, i32
  }
  func.func @transform_10(%arg0: i32) -> (i32, i32) {
    %c0_i32 = arith.constant 0 : i32
    %c0_i32_0 = arith.constant 0 : i32
    %c0_i32_1 = arith.constant 0 : i32
    return %c0_i32, %c0_i32_0 : i32, i32
  }
  func.func @transform_11(%arg0: i32) -> (i32, i32) {
    %c0_i32 = arith.constant 0 : i32
    %c0_i32_0 = arith.constant 0 : i32
    %c0_i32_1 = arith.constant 0 : i32
    return %c0_i32, %c0_i32_0 : i32, i32
  }
  func.func @transform_12(%arg0: i32) -> (i32, i32) {
    %c0_i32 = arith.constant 0 : i32
    %c0_i32_0 = arith.constant 0 : i32
    %c0_i32_1 = arith.constant 0 : i32
    return %c0_i32, %c0_i32_0 : i32, i32
  }
  func.func @transform_13(%arg0: i32) -> (i32, i32) {
    %c0_i32 = arith.constant 0 : i32
    %c0_i32_0 = arith.constant 0 : i32
    %c0_i32_1 = arith.constant 0 : i32
    return %c0_i32, %c0_i32_0 : i32, i32
  }
  func.func @transform_14(%arg0: i32) -> (i32, i32) {
    %c0_i32 = arith.constant 0 : i32
    %c0_i32_0 = arith.constant 0 : i32
    %c0_i32_1 = arith.constant 0 : i32
    return %c0_i32, %c0_i32_0 : i32, i32
  }
  func.func @transform_15(%arg0: i32) -> (i32, i32) {
    %c0_i32 = arith.constant 0 : i32
    %c0_i32_0 = arith.constant 0 : i32
    %c0_i32_1 = arith.constant 0 : i32
    return %c0_i32, %c0_i32_0 : i32, i32
  }
  func.func @transform_16(%arg0: i32) -> (i32, i32) {
    %c0_i32 = arith.constant 0 : i32
    %c0_i32_0 = arith.constant 0 : i32
    %c0_i32_1 = arith.constant 0 : i32
    return %c0_i32, %c0_i32_0 : i32, i32
  }
  func.func @transform_17(%arg0: i32) -> (i32, i32) {
    %c0_i32 = arith.constant 0 : i32
    %c0_i32_0 = arith.constant 0 : i32
    %c0_i32_1 = arith.constant 0 : i32
    return %c0_i32, %c0_i32_0 : i32, i32
  }
  func.func @transform_18(%arg0: i32) -> (i32, i32) {
    %c0_i32 = arith.constant 0 : i32
    %c0_i32_0 = arith.constant 0 : i32
    %c0_i32_1 = arith.constant 0 : i32
    return %c0_i32, %c0_i32_0 : i32, i32
  }
  func.func @transform_19(%arg0: i32) -> (i32, i32) {
    %c0_i32 = arith.constant 0 : i32
    %c0_i32_0 = arith.constant 0 : i32
    %c0_i32_1 = arith.constant 0 : i32
    return %c0_i32, %c0_i32_0 : i32, i32
  }
  func.func @transform_20(%arg0: i32) -> (i32, i32) {
    %c0_i32 = arith.constant 0 : i32
    %c0_i32_0 = arith.constant 0 : i32
    %c0_i32_1 = arith.constant 0 : i32
    return %c0_i32, %c0_i32_0 : i32, i32
  }
  func.func @transform_21(%arg0: i32) -> (i32, i32) {
    %c0_i32 = arith.constant 0 : i32
    %c0_i32_0 = arith.constant 0 : i32
    %c0_i32_1 = arith.constant 0 : i32
    return %c0_i32, %c0_i32_0 : i32, i32
  }
  func.func @transform_22(%arg0: i32) -> (i32, i32) {
    %c0_i32 = arith.constant 0 : i32
    %c0_i32_0 = arith.constant 0 : i32
    %c0_i32_1 = arith.constant 0 : i32
    return %c0_i32, %c0_i32_0 : i32, i32
  }
  func.func @transform_23(%arg0: i32) -> (i32, i32) {
    %c0_i32 = arith.constant 0 : i32
    %c0_i32_0 = arith.constant 0 : i32
    %c0_i32_1 = arith.constant 0 : i32
    return %c0_i32, %c0_i32_0 : i32, i32
  }
  func.func @transform_24(%arg0: i32) -> (i32, i32) {
    %c0_i32 = arith.constant 0 : i32
    %c0_i32_0 = arith.constant 0 : i32
    %c0_i32_1 = arith.constant 0 : i32
    return %c0_i32, %c0_i32_0 : i32, i32
  }
  func.func @transform_25(%arg0: i32) -> (i32, i32) {
    %c0_i32 = arith.constant 0 : i32
    %c0_i32_0 = arith.constant 0 : i32
    %c0_i32_1 = arith.constant 0 : i32
    return %c0_i32, %c0_i32_0 : i32, i32
  }
  func.func @transform_26(%arg0: i32) -> (i32, i32) {
    %c0_i32 = arith.constant 0 : i32
    %c0_i32_0 = arith.constant 0 : i32
    %c0_i32_1 = arith.constant 0 : i32
    return %c0_i32, %c0_i32_0 : i32, i32
  }
  func.func @transform_27(%arg0: i32) -> (i32, i32) {
    %c0_i32 = arith.constant 0 : i32
    %c0_i32_0 = arith.constant 0 : i32
    %c0_i32_1 = arith.constant 0 : i32
    return %c0_i32, %c0_i32_0 : i32, i32
  }
  func.func @transform_28(%arg0: i32) -> (i32, i32, i32) {
    %c0_i32 = arith.constant 0 : i32
    %c0_i32_0 = arith.constant 0 : i32
    %c0_i32_1 = arith.constant 0 : i32
    return %arg0, %c0_i32, %c0_i32_0 : i32, i32, i32
  }
}

</mosaic_0001>

<bundles_post_ra>
// kernel: tpu_custom_call.1
= control target key start
LH: loop header
LB: loop body
LE: loop exit
PB: predicated region body
PF: predicated region fallthrough
CT: control target
= control target key end

     0   :  { %s5505_s0 = inlined_call_operand.hbm [shape: f32[2,8,32], index: 0, kind: input, shape index: {}]   ;;  %s5506_s1 = inlined_call_operand.hbm [shape: f32[8,32], index: 1, kind: input, shape index: {}]   ;;  %s5507_s2 = inlined_call_operand.hbm [shape: f32[8,32], index: 2, kind: input, shape index: {}]   ;;  %s5508_s3 = inlined_call_operand.vmem [shape: f32[32,32], index: 3, kind: input, shape index: {}]   ;;  %s5509_s4 = inlined_call_operand.vmem [shape: f32[1,32], index: 4, kind: input, shape index: {}]   ;;  %s5510_s5 = inlined_call_operand.vmem [shape: f32[32,96], index: 5, kind: input, shape index: {}]   ;;  %s5511_s6 = inlined_call_operand.vmem [shape: f32[32,32], index: 6, kind: input, shape index: {}]   ;;  %s5512_s7 = inlined_call_operand.vmem [shape: f32[1,32], index: 7, kind: input, shape index: {}]   ;;  %s5513_s8 = inlined_call_operand.hbm [shape: f32[32,128], index: 8, kind: input, shape index: {}]   ;;  %s5514_s9 = inlined_call_operand.vmem [shape: f32[64,32], index: 9, kind: input, shape index: {}]   ;;  %s5515_s10 = inlined_call_operand.vmem [shape: f32[1,32], index: 10, kind: input, shape index: {}]   ;;  %s5516_s11 = inlined_call_operand.hbm [shape: f32[32,96], index: 11, kind: input, shape index: {}]   ;;  %s5517_s12 = inlined_call_operand.hbm [shape: f32[32,32], index: 12, kind: input, shape index: {}]   ;;  %s5518_s13 = inlined_call_operand.hbm [shape: f32[1,32], index: 13, kind: input, shape index: {}]   ;;  %s5519_s14 = inlined_call_operand.hbm [shape: f32[32,128], index: 14, kind: input, shape index: {}]   ;;  %s5520_s15 = inlined_call_operand.vmem [shape: f32[64,32], index: 15, kind: input, shape index: {}]   ;;  %s5521_s16 = inlined_call_operand.vmem [shape: f32[1,32], index: 16, kind: input, shape index: {}]   ;;  %s5522_s17 = inlined_call_operand.hbm [shape: f32[32,96], index: 17, kind: input, shape index: {}]   ;;  %s5523_s18 = inlined_call_operand.hbm [shape: f32[32,32], index: 18, kind: input, shape index: {}]   ;;  %s5524_s19 = inlined_call_operand.vmem [shape: f32[1,32], index: 19, kind: input, shape index: {}]   ;;  %s5525_s20 = inlined_call_operand.hbm [shape: f32[32,128], index: 20, kind: input, shape index: {}]   ;;  %s5526_s21 = inlined_call_operand.vmem [shape: f32[64,32], index: 21, kind: input, shape index: {}]   ;;  %s5527_s22 = inlined_call_operand.hbm [shape: f32[32,1024], index: 22, kind: input, shape index: {}]   ;;  %s5528_s23 = inlined_call_operand.vmem [shape: f32[1,1024], index: 23, kind: input, shape index: {}]   ;;  %s5529_s24 = inlined_call_operand.hbm [shape: f32[1024,128], index: 24, kind: input, shape index: {}]   ;;  %s5530_s25 = inlined_call_operand.vmem [shape: f32[1,128], index: 25, kind: input, shape index: {}]   ;;  %s5531_s26 = inlined_call_operand.vmem [shape: f32[128,128], index: 26, kind: input, shape index: {}]   ;;  %s5532_s27 = inlined_call_operand.vmem [shape: f32[1,128], index: 27, kind: input, shape index: {}]   ;;  %s5533_s28 = inlined_call_operand.hbm [shape: f32[2,8,128], index: 28, kind: output, shape index: {}]  }
   0x1   :  { %5588 = sst [smem:[#allocation38_spill]] %s5505_s0 }
   0x2   :  { %5589 = sst [smem:[#allocation39_spill]] %s5506_s1 }
   0x3   :  { %5590 = sst [smem:[#allocation40_spill]] %s5507_s2 }
   0x4   :  { %5591 = sst [smem:[#allocation41_spill]] %s5508_s3 }
   0x5   :  { %5592 = sst [smem:[#allocation42_spill]] %s5509_s4 }
   0x6   :  { %5593 = sst [smem:[#allocation43_spill]] %s5510_s5 }
   0x7   :  { %5594 = sst [smem:[#allocation44_spill]] %s5511_s6 }
   0x8   :  { %5595 = sst [smem:[#allocation45_spill]] %s5512_s7 }
   0x9   :  { %5596 = sst [smem:[#allocation46_spill]] %s5513_s8 }
   0xa   :  { %5597 = sst [smem:[#allocation47_spill]] %s5514_s9 }
   0xb   :  { %5598 = sst [smem:[#allocation48_spill]] %s5515_s10 }
   0xc   :  { %5599 = sst [smem:[#allocation49_spill]] %s5516_s11 }
   0xd   :  { %5600 = sst [smem:[#allocation50_spill]] %s5517_s12 }
   0xe   :  { %5601 = sst [smem:[#allocation51_spill]] %s5518_s13 }
   0xf   :  { %5602 = sst [smem:[#allocation52_spill]] %s5519_s14 }
  0x10   :  { %5603 = sst [smem:[#allocation53_spill]] %s5522_s17 }
  0x11   :  { %5604 = sst [smem:[#allocation54_spill]] %s5523_s18 }
  0x12   :  { %5605 = sst [smem:[#allocation55_spill]] %s5525_s20 }
  0x13   :  { %5606 = sst [smem:[#allocation56_spill]] %s5526_s21 }
  0x14   :  { %5607 = sst [smem:[#allocation57_spill]] %s5527_s22 }
  0x15   :  { %5608 = sst [smem:[#allocation58_spill]] %s5528_s23 }
  0x16   :  { %5609 = sst [smem:[#allocation59_spill]] %s5529_s24 }
  0x17   :  { %5610 = sst [smem:[#allocation60_spill]] %s5530_s25 }
  0x18   :  { %5611 = sst [smem:[#allocation61_spill]] %s5531_s26 }
  0x19   :  { %5612 = sst [smem:[#allocation62_spill]] %s5532_s27 }
  0x1a   :  { %5613 = sst [smem:[#allocation63_spill]] %s5533_s28 }
  0x1b   :  { %33 = vsyncpa [#allocation3], 0 }
  0x1c   :  { %35 = vsyncpa [#allocation3 + $0x1], 0 }
  0x1d   :  { %36 = vsyncpa [#allocation6], 0 }
  0x1e   :  { %37 = vsyncpa [#allocation9], 0 }
  0x1f   :  { %38 = vsyncpa [#allocation12], 0 }
  0x20   :  { %39 = vsyncpa [#allocation15], 0 }
  0x21   :  { %40 = vsyncpa [#allocation18], 0 }
  0x22   :  { %41 = vsyncpa [#allocation21], 0 }
  0x23   :  { %42 = vsyncpa [#allocation4], 0 }
  0x24   :  { %44 = vsyncpa [#allocation4 + $0x1], 0  ;;  %s4637_s8 = smov 0   ;;  %s4639_s5 = smov 0  }
  0x25   :  { %s4641_s9 = smov 0   ;;  %s4643_s30 = smov 0  }
  0x26 LB: > { %5614 = sst [smem:[#allocation32_spill]] %s4450_s5  ;;  %s4661_s11 = sadd.s32 4294967295, %s4458_s30   ;;  %s4458_s30 = sphi %s4643_s30, %s5682_s30   ;;  %s4454_s9 = sphi %s4641_s9, %s5685_s9   ;;  %s4450_s5 = sphi %s4639_s5, %s5684_s5   ;;  %s4446_s8 = sphi %s4637_s8, %s5683_s8  }
  0x27   : > { %5615 = sst [smem:[#allocation33_spill]] %s4454_s9  ;;  %p3562_p0 = scmp.ge.s32.totalorder %s4458_s30, 1 }
  0x28   : > { %5616 = sst [smem:[#allocation34_spill]] %s4458_s30  ;;  %p71_p1 = scmp.eq.s32.totalorder %s4661_s11, 0 }
  0x29   : > { %s5617_s10 = sld [smem:[#allocation39_spill]]  ;;  %p674_p2 = scmp.lt.s32.totalorder %s4458_s30, 3 }
  0x2a   : > { %s4460_s2 = smov [#allocation5]   ;;  %s5619_s4 = sld [smem:[#allocation46_spill]] }
  0x2b   : > { %p4666_p3 = pnand %p3562_p0, %p674_p2  ;;  %s688_s7 = sshll.u32 %s4460_s2, 4  ;;  %s689_s7 = int_to_ptr.vmem [resolvable:$true] %s688_s7 }
  0x2c   : > { %s5542_s2 = smov 128   ;;  %s5544_s28 = smov 8  }
  0x2d   : > { %p3723_p5 = pneg %p4666_p3  ;;  %s4464_s26 = smov [#allocation11]  }
  0x2e   : > { %s760_s23 = sshll.u32 %s4464_s26, 4  ;;  %s5622_s14 = sld [smem:[#allocation52_spill]]  ;;  %s761_s23 = int_to_ptr.vmem [resolvable:$true] %s760_s23 }
  0x2f   : > { %s686_s0 = sshll.u32 %s5617_s10, 4  ;;  %p4678_p6 = pnand %p3723_p5, %p71_p1  ;;  %s687_s0 = int_to_ptr.hbm [resolvable:$true] %s686_s0 }
  0x30   : > { %s724_s3 = sshll.u32 %s5619_s4, 4  ;;  %s4461_s10 = smov [#allocation8]   ;;  %s725_s3 = int_to_ptr.hbm [resolvable:$true] %s724_s3 }
  0x31   : > { %s726_s27 = sshll.u32 %s4461_s10, 4  ;;  %s5621_s4 = sld [smem:[#allocation50_spill]]  ;;  %s727_s27 = int_to_ptr.vmem [resolvable:$true] %s726_s27 }
  0x32   : > { %3726 = dma.hbm_to_vmem [thread:$0]  (!%p4678_p6), %s687_s0, 128, %s689_s7, [#allocation6]  }
  0x33   : > { %3732 = dma.hbm_to_vmem [thread:$0]  (!%p4678_p6), %s725_s3, 512, %s727_s27, [#allocation9], %s5542_s2, %s5542_s2, %s5544_s28  }
  0x34   : > { %s784_s0 = sshll.u32 %s5622_s14, 4  ;;  %s4465_s27 = smov [#allocation14]   ;;  %s785_s0 = int_to_ptr.hbm [resolvable:$true] %s784_s0 }
  0x35   : > { %s786_s7 = sshll.u32 %s4465_s27, 4  ;;  %s5623_s18 = sld [smem:[#allocation54_spill]]  ;;  %s787_s7 = int_to_ptr.vmem [resolvable:$true] %s786_s7 }
  0x36   : > { %3744 = dma.hbm_to_vmem [thread:$0]  (!%p4678_p6), %s785_s0, 512, %s787_s7, [#allocation15], %s5542_s2, %s5542_s2, %s5544_s28  }
  0x37   : > { %s758_s25 = sshll.u32 %s5621_s4, 4  ;;  %s5624_s22 = sld [smem:[#allocation57_spill]]  ;;  %s759_s25 = int_to_ptr.hbm [resolvable:$true] %s758_s25 }
  0x38   : > { %3738 = dma.hbm_to_vmem [thread:$0]  (!%p4678_p6), %s759_s25, 512, %s761_s23, [#allocation12], %s5542_s2, %s5542_s2, %s5544_s28  }
  0x39   : > { %s4466_s23 = smov [#allocation17]   ;;  %s4467_s10 = smov [#allocation20]  }
  0x3a   : > { %s820_s25 = sshll.u32 %s4466_s23, 4  ;;  %s854_s27 = sshll.u32 %s4467_s10, 4  ;;  %s821_s25 = int_to_ptr.vmem [resolvable:$true] %s820_s25  ;;  %s855_s27 = int_to_ptr.vmem [resolvable:$true] %s854_s27 }
  0x3b   : > { %s818_s1 = sshll.u32 %s5623_s18, 4  ;;  %s4468_s3 = smov 1024   ;;  %s819_s1 = int_to_ptr.hbm [resolvable:$true] %s818_s1 }
  0x3c   : > { %3750 = dma.hbm_to_vmem [thread:$0]  (!%p4678_p6), %s819_s1, 512, %s821_s25, [#allocation18], %s5542_s2, %s5542_s2, %s5544_s28  }
  0x3d   : > { %s852_s4 = sshll.u32 %s5624_s22, 4  ;;  %s4469_s0 = smov 64   ;;  %s853_s4 = int_to_ptr.hbm [resolvable:$true] %s852_s4 }
  0x3e   : > { %3756 = dma.hbm_to_vmem [thread:$0]  (!%p4678_p6), %s853_s4, 4096, %s855_s27, [#allocation21], %s4468_s3, %s4468_s3, %s4469_s0  }
  0x3f   : > { %s5625_s21 = sld [smem:[#allocation40_spill]]  ;;  %s4470_s23 = smov [#allocation7]  }
  0x40   : > { %s700_s14 = sshll.u32 %s4470_s23, 4  ;;  %s5626_s1 = sld [smem:[#allocation49_spill]]  ;;  %s701_s14 = int_to_ptr.vmem [resolvable:$true] %s700_s14 }
  0x41   : > { %s4471_s10 = smov [#allocation10]   ;;  %s5627_s13 = sld [smem:[#allocation51_spill]] }
  0x42   : > { %s746_s2 = sshll.u32 %s4471_s10, 4  ;;  %s5628_s3 = smov 8   ;;  %s747_s2 = int_to_ptr.vmem [resolvable:$true] %s746_s2 }
  0x43   : > { %s5629_s0 = smov 128   ;;  %s5630_s17 = sld [smem:[#allocation53_spill]] }
  0x44   : > { %s4473_s28 = smov [#allocation16]   ;;  %s5631_s20 = sld [smem:[#allocation55_spill]] }
  0x45   : > { %s698_s26 = sshll.u32 %s5625_s21, 4  ;;  %s806_s21 = sshll.u32 %s4473_s28, 4  ;;  %s699_s26 = int_to_ptr.hbm [resolvable:$true] %s698_s26  ;;  %s807_s21 = int_to_ptr.vmem [resolvable:$true] %s806_s21 }
  0x46   : > { %s744_s25 = sshll.u32 %s5626_s1, 4  ;;  %s5632_s24 = sld [smem:[#allocation59_spill]]  ;;  %s745_s25 = int_to_ptr.hbm [resolvable:$true] %s744_s25 }
  0x47   : > { %3729 = dma.hbm_to_vmem [thread:$0]  (!%p4678_p6), %s699_s26, 128, %s701_s14, [#allocation6]  }
  0x48   : > { %s773_s27 = sshll.u32 %s5627_s13, 4  ;;  %s4472_s14 = smov [#allocation13]   ;;  %s774_s27 = int_to_ptr.hbm [resolvable:$true] %s773_s27 }
  0x49   : > { %3735 = dma.hbm_to_vmem [thread:$0]  (!%p4678_p6), %s745_s25, 512, %s747_s2, [#allocation9], %s5629_s0, %s5629_s0, %s5628_s3  }
  0x4a   : > { %s804_s22 = sshll.u32 %s5630_s17, 4  ;;  %s775_s12 = sshll.u32 %s4472_s14, 4  ;;  %s805_s22 = int_to_ptr.hbm [resolvable:$true] %s804_s22  ;;  %s776_s12 = int_to_ptr.vmem [resolvable:$true] %s775_s12 }
  0x4b   : > { %3741 = dma.hbm_to_vmem [thread:$0]  (!%p4678_p6), %s774_s27, 16, %s776_s12, [#allocation12]  }
  0x4c   : > { %s835_s2 = sshll.u32 %s5631_s20, 4  ;;  %s869_s10 = sshll.u32 %s5632_s24, 4  ;;  %s836_s2 = int_to_ptr.hbm [resolvable:$true] %s835_s2  ;;  %s870_s10 = int_to_ptr.hbm [resolvable:$true] %s869_s10 }
  0x4d   : > { %3747 = dma.hbm_to_vmem [thread:$0]  (!%p4678_p6), %s805_s22, 512, %s807_s21, [#allocation15], %s5629_s0, %s5629_s0, %s5628_s3  }
  0x4e   : > { %s4474_s4 = smov [#allocation19]   ;;  %s4475_s7 = smov [#allocation22]  }
  0x4f   : > { %s837_s27 = sshll.u32 %s4474_s4, 4  ;;  %s871_s18 = sshll.u32 %s4475_s7, 4  ;;  %s838_s27 = int_to_ptr.vmem [resolvable:$true] %s837_s27  ;;  %s872_s18 = int_to_ptr.vmem [resolvable:$true] %s871_s18 }
  0x50   : > { %3753 = dma.hbm_to_vmem [thread:$0]  (!%p4678_p6), %s836_s2, 512, %s838_s27, [#allocation18], %s5629_s0, %s5629_s0, %s5628_s3  }
  0x51   : > { %3759 = dma.hbm_to_vmem [thread:$0]  (!%p4678_p6), %s870_s10, 16384, %s872_s18, [#allocation21], %s5629_s0, %s5629_s0, %s5628_s3  }
  0x52   : > { %s3561_s22 = sadd.s32 4294967294, %s4458_s30   ;;  %s4762_s14 = sadd.s32 1, %s4458_s30  }
  0x53   : > { %5633 = sst [smem:[#allocation35_spill]] %s4762_s14  ;;  %s54_s12 = ssub.s32 %s4458_s30, %s4762_s14 }
  0x54   : > { %s57_s28 = sadd.s32 1, %s4454_s9  ;;  %p55_p7 = scmp.eq.s32.totalorder %s54_s12, 0 }
  0x55   : > { %p64_p8 = scmp.ne.s32.totalorder %s4454_s9, %s4450_s5  ;;  %p65_p9 = scmp.eq.s32.totalorder %s4458_s30, 0 }
  0x56   : > { %p70_p10 = scmp.ne.s32.totalorder %s4450_s5, %s4446_s8  ;;  %p661_p13 = scmp.eq.s32.totalorder %s4661_s11, 1 }
  0x57   : > { %s4773_s21 = scalar_select %p55_p7, %s4454_s9, %s57_s28  }
  0x58   : > { %p4775_p11 = por %p65_p9, %p64_p8  ;;  %p4781_p12 = por %p71_p1, %p70_p10 }
  0x59   : > { %5634 = sst [smem:[#allocation36_spill]] %s4773_s21  ;;  %p667_p0 = scmp.eq.s32.totalorder %s3561_s22, 1 }
  0x5a   : > { %p3780_p2 = scmp.lt.s32.totalorder %s4458_s30, 2  ;;  %s894_s0 = sand.u32 1, %s4454_s9  }
  0x5b   : > { %p4788_p5 = por %p661_p13, %p64_p8  ;;  %p4792_p6 = por %p667_p0, %p70_p10 }
  0x5c   : > { %s3576_s2 = sshll.u32 %s894_s0, 3  ;;  %s3577_s1 = sshll.u32 %s4458_s30, 3 }
  0x5d   : > { %s5638_s23 = scalar_select %p4792_p6, 1, 0 }
  0x5e   : > { %s5640_s4 = sld [smem:[#allocation38_spill]]  ;;  %s898_s7 = scalar_lea.vmem [#allocation2], %s3576_s2 }
  0x5f   : > { %5639 = sst [smem:[#allocation37_spill]] %s5638_s23  ;;  %s906_s18 = sshll.u32 %s898_s7, 4  ;;  %s907_s18 = int_to_ptr.vmem [resolvable:$true] %s906_s18 }
  0x60   : > { %p4802_p7 = pnand %p3780_p2, %p4775_p11  ;;  %s895_s28 = scalar_lea.sflag [#allocation3], %s894_s0 }
  0x62   : > { %p4342_p9 = pneg %p4802_p7 }
  0x64   : > { %s902_s27 = scalar_lea.hbm %s5640_s4, %s3577_s1  ;;  %s4345_s25 = scalar_lea.hbm %s5640_s4, 16 }
  0x65   : > { %s904_s12 = sshll.u32 %s902_s27, 4  ;;  %s905_s12 = int_to_ptr.hbm [resolvable:$true] %s904_s12 }
  0x66   : > { %s4338_s13 = sshra.s32 %s905_s12, 4  ;;  %s4339_s13 = int_to_ptr.hbm [resolvable:$true] %s4338_s13 }
  0x67   : > { %s4340_s17 = scalar_lea.hbm %s4339_s13, 8  ;;  %p4346_p11 = scmp.lt.s32.totalorder %s4339_s13, %s5640_s4 }
  0x68   : > { %p4341_p8 = scmp.ne.s32.totalorder %s4339_s13, %s4340_s17  ;;  %p4347_p0 = scmp.lt.s32.totalorder %s4345_s25, %s4340_s17 }
  0x6a   : > { %p4343_p10 = pnand %p4342_p9, %p4341_p8  ;;  %p4348_p2 = por %p4347_p0, %p4346_p11 }
  0x6c   : > { %p4344_p13 = pneg %p4343_p10 }
  0x6e   : > { %p4349_p4 = pnand %p4348_p2, %p4344_p13 }
  0x70   : > { %4352 = shalt.err (!%p4349_p4)
}
  0x71   : > { %3763 = dma.hbm_to_vmem [thread:$0]  (!%p4802_p7), %s905_s12, 128, %s907_s18, %s895_s28  }
  0x72   : > { %915 = sbr.rel (%p4666_p3) target bundleno = 7050 (0x1b8a), region = 132  ;;  %s4819_s0 = sand.u32 (!%p4666_p3), 1, %s4450_s5  }
  0x73   : > { %s5546_s27 = sshll.u32 (!%p4666_p3), %s4819_s0, 3  ;;  %s918_s7 = scalar_lea.sflag (!%p4666_p3), [#allocation3], %s4819_s0 }
  0x74   : > { %s921_s13 = scalar_lea.vmem (!%p4666_p3), [#allocation2], %s5546_s27 }
  0x77   : > { %4413 = dma.done.wait (%p4781_p12), %s918_s7, 128  }
  0x78   : > { %4415 = vsyncadd (%p4781_p12), %s918_s7, 4294967168 }
  0x79   : > { %4417 = dma.done.wait (%p71_p1), [#allocation6], 256  }
  0x7a   : > { %4419 = vsyncadd (%p71_p1), [#allocation6], 4294967040 }
  0x7b   : > { %4421 = dma.done.wait (%p71_p1), [#allocation9], 1024  }
  0x7c   : > { %4423 = vsyncadd (%p71_p1), [#allocation9], 4294966272 }
  0x7d   : > { %4425 = dma.done.wait (%p71_p1), [#allocation12], 528  }
  0x7e   : > { %4427 = vsyncadd (%p71_p1), [#allocation12], 4294966768 }
  0x7f   : > { %4429 = dma.done.wait (%p71_p1), [#allocation15], 1024  }
  0x80   : > { %4431 = vsyncadd (%p71_p1), [#allocation15], 4294966272 }
  0x81   : > { %4433 = dma.done.wait (%p71_p1), [#allocation18], 1024  }
  0x82   : > { %4435 = vsyncadd (%p71_p1), [#allocation18], 4294966272 }
  0x83   : > { %4437 = dma.done.wait (%p71_p1), [#allocation21], 20480  }
  0x84   : > { %4439 = vsyncadd (%p71_p1), [#allocation21], 4294946816  ;;  %v4853_v0 = vld [vmem:[%s921_s13] sm:$0xff]  ;;  %vm1085_vm0 = vcmask 261120   ;;  %v4476_v3 = vmov 32.0   ;;  %s5642_s3 = sld [smem:[#allocation43_spill]] }
  0x85   : > { %v1084_v1 = vmul.f32 %v4853_v0, %v4853_v0  ;;  %3866 = vrcp.f32 %v4476_v3  ;;  %v4870_v13 = vld [vmem:[#allocation5] sm:$0xff]  ;;  %s5643_s6 = sld [smem:[#allocation41_spill]]  ;;  %s5571_s17 = smov 32   ;;  %v4917_v34 = vld [vmem:[#allocation7] sm:$0xff]  ;;  %vm1200_vm5 = vcmask 64512   ;;  %vm1475_vm6 = vcmask 130048  }
  0x86   : > { %1163 = vrot.lane.b32.xlu1 %v4870_v13, %s5571_s17  ;;  %s5644_s1 = sld [smem:[#allocation42_spill]]  ;;  %s5573_s25 = smov 96   ;;  %vm1477_vm7 = vcmask 195584   ;;  %vm1572_vm15 = vcmask 523264  }
  0x87   : > { %v1086_v2 = vsel %vm1085_vm0, %v1084_v1, 0.0  ;;  %s5557_s10 = smov 80   ;;  %s5563_s7 = smov 88  }
  0x88   : > { %1087 = vadd.xlane.f32.xlu0 %v1086_v2  ;;  %s5555_s13 = smov 112   ;;  %s5559_s29 = smov 120  }
  0x89   : > { %s5551_s18 = smov 56   ;;  %s5567_s12 = smov 72  }
  0x8a   : > { %v1066_v7 = vld [vmem:[%s5642_s3 + $0x18] sm:$0xff]  ;;  %v1065_v8 = vld [vmem:[%s5642_s3 + $0x10] sm:$0xff]  ;;  %v1064_v9 = vld [vmem:[%s5642_s3 + $0x8] sm:$0xff]  ;;  %s5561_s22 = smov 104   ;;  %s5575_s28 = smov 64  }
  0x8b   : > { %v3867_v4 = vpop.eup %3866  ;;  %1128 = vmatpush.msra.mxu2 %v1066_v7  ;;  %v1063_v11 = vld [vmem:[%s5642_s3] sm:$0xff]  ;;  %v4875_v14 = vld [vmem:[%s5643_s6 + $0x18] sm:$0xff]  ;;  %v4880_v15 = vld [vmem:[%s5643_s6 + $0x10] sm:$0xff]  ;;  %s5553_s2 = smov 40   ;;  %s5549_s27 = smov 48  }
  0x8c   : > { %v1090_v5 = vmul.f32 32.0, %v3867_v4  ;;  %vm1094_vm1 = vweird.f32 %v3867_v4  ;;  %1152 = vmatpush.msra.mxu1 %v4875_v14  ;;  %v4888_v16 = vld [vmem:[%s5643_s6 + $0x8] sm:$0xff]  ;;  %v4897_v18 = vld [vmem:[%s5643_s6] sm:$0xff]  ;;  %s5660_s3 = smov 8   ;;  %s5661_s4 = smov 24  }
  0x8d   : > { %1129 = vmatpush.msra.mxu2 %v1065_v8  ;;  %v3858_v28 = vld [vmem:[%s5644_s1] ss:$0 sm:$0xff]  ;;  %s5547_s1 = smov 8   ;;  %s5662_s6 = smov 16  }
  0x8e   : > { %v1091_v6 = vsub.f32 1.0, %v1090_v5  ;;  %1153 = vmatpush.msra.mxu1 %v4880_v15  ;;  %s5663_s5 = smov 64   ;;  %s5665_s30 = sld [smem:[#allocation58_spill]] }
  0x8f   : > { %1130 = vmatpush.msra.mxu2 %v1064_v9  ;;  %s5674_s23 = sld [smem:[#allocation61_spill]] }
  0x90   : > { %v1092_v10 = vmul.f32 %v3867_v4, %v1091_v6  ;;  %1154 = vmatpush.msra.mxu1 %v4888_v16  ;;  %s5677_s9 = sld [smem:[#allocation62_spill]] }
  0x91   : > { %1131 = vmatpush.msra.mxu2 %v1063_v11 }
  0x92   : > { %v1093_v12 = vadd.f32 %v3867_v4, %v1092_v10  ;;  %1155 = vmatpush.msra.mxu1 %v4897_v18 }
  0x93   : > { %1183 = vmatpush.msrb.mxu2 %v4875_v14 }
  0x94   : > { %v4891_v17 = vsel %vm1094_vm1, %v3867_v4, %v1093_v12 }
  0x95   : > { %1184 = vmatpush.msrb.mxu2 %v4880_v15 }
  0x97   : > { %1185 = vmatpush.msrb.mxu2 %v4888_v16 }
  0x99   : > { %1186 = vmatpush.msrb.mxu2 %v4897_v18 }
  0xf8   : > { %v4921_v37 = vpop.permute.xlu1 %1163 }
  0xfb   : > { %v1088_v19 = vpop.xlane.xlu0 %1087 }
  0xfc   : > { %v1096_v20 = vmul.f32 %v4891_v17, %v1088_v19 }
  0xfe   : > { %v1097_v21 = vadd.f32 1e-06, %v1096_v20 }
 0x100   : > { %3868 = vrsqrt.f32 %v1097_v21  ;;  %vm1104_vm3 = vweird.f32 %v1097_v21 }
 0x106   : > { %v3869_v22 = vpop.eup %3868 }
 0x107   : > { %v1099_v23 = vmul.f32 %v3869_v22, %v1097_v21  ;;  %vm1105_vm2 = vweird.f32 %v3869_v22 }
 0x108   : > { %vm1106_vm4 = vmor %vm1104_vm3, %vm1105_vm2 }
 0x109   : > { %v1100_v24 = vmul.f32 %v3869_v22, %v1099_v23 }
 0x10b   : > { %v1101_v25 = vmul.f32 0.5, %v1100_v24 }
 0x10d   : > { %v1102_v26 = vsub.f32 1.5, %v1101_v25 }
 0x10f   : > { %v1103_v27 = vmul.f32 %v3869_v22, %v1102_v26 }
 0x111   : > { %v1107_v29 = vsel %vm1106_vm4, %v3869_v22, %v1103_v27 }
 0x112   : > { %v1108_v30 = vmul.f32 %v1107_v29, %v4853_v0 }
 0x114   : > { %v1112_v31 = vmul.f32 %v3858_v28, %v1108_v30 }
 0x116   : > { %3593 = vmatmul.msk.f32.vlgmr.msra.gmra.mxu2 %vm1085_vm0, %v1112_v31 }
 0x199   : > { %v4910_v32 = vpop.f32.mrf.mxu2 }
 0x19a   : > { %1167 = vrot.lane.b32.xlu0 %v4910_v32, %s5573_s25  ;;  %3594 = vmatmul.msk.f32.vlgmr.msra.gmra.mxu1 %vm1085_vm0, %v4910_v32  ;;  %v1166_v38 = vmul.f32 %v4921_v37, %v4910_v32  ;;  %v1136_v43 = vmul.f32 %v4910_v32, %v4870_v13 }
 0x20c   : > { %v1168_v33 = vpop.permute.xlu0 %1167 }
 0x20d   : > { %3595 = vmatmul.msk.f32.vlgmr.msrb.gmra.mxu2 %vm1085_vm0, %v1168_v33 }
 0x217   : > { %v1157_v41 = vpop.f32.mrf.mxu1 }
 0x218   : > { %v1160_v42 = vmul.f32 %v1157_v41, %v4917_v34 }
 0x21a   : > { %v1161_v44 = vadd.f32 %v1160_v42, %v1136_v43 }
 0x290   : > { %v1188_v35 = vpop.f32.mrf.mxu2 }
 0x291   : > { %v1191_v36 = vmul.f32 %v1188_v35, %v4917_v34 }
 0x293   : > { %1193 = vrot.lane.b32.xlu1 %v1191_v36, %s5571_s17  ;;  %s5655_s17 = smov 80  }
 0x305   : > { %v1194_v39 = vpop.permute.xlu1 %1193 }
 0x306   : > { %v1196_v40 = vadd.f32 %v1194_v39, %v1166_v38 }
 0x308   : > { %1332 = vrot.lane.b32.xlu0 %v1196_v40, %s5557_s10  ;;  %1266 = vrot.lane.b32.xlu2 %v1196_v40, %s5563_s7  ;;  %s5648_s7 = sld [smem:[#allocation48_spill]]  ;;  %s5657_s10 = smov 40  }
 0x310   : > { %1330 = vrot.lane.b32.xlu0 %v1161_v44, %s5555_s13  ;;  %1264 = vrot.lane.b32.xlu2 %v1161_v44, %s5559_s29  ;;  %s5645_s13 = sld [smem:[#allocation44_spill]] }
 0x311   : > { %s5646_s29 = sld [smem:[#allocation45_spill]] }
 0x318   : > { %1304 = vrot.lane.b32.xlu0 %v4910_v32, %s5551_s18  ;;  %1198 = vrot.lane.b32.xlu2 %v1196_v40, %s5573_s25  ;;  %s5650_s18 = smov 32   ;;  %s5656_s25 = smov 112  }
 0x320   : > { %1398 = vrot.lane.b32.xlu0 %v1196_v40, %s5567_s12  ;;  %s5651_s12 = smov 72  }
 0x362   : > { %v1267_v45 = vpop.permute.xlu2 %1266 }
 0x363   : > { %3599 = vmatpush.xpose.msk.msra.mxu0 %vm1200_vm5, %v1267_v45 }
 0x36a   : > { %v1265_v46 = vpop.permute.xlu2 %1264 }
 0x36b   : > { %3600 = vmatmul.msk.f32.vlgmr.msra.gmra.mxu0 %vm1200_vm5, %v1265_v46 }
 0x372   : > { %v1199_v47 = vpop.permute.xlu2 %1198 }
 0x373   : > { %3596 = vmatpush.xpose.msk.msra.mxu3 %vm1200_vm5, %v1199_v47 }
 0x376   : > { %3597 = vmatmul.msk.f32.vlgmr.msra.gmra.mxu3 %vm1200_vm5, %v1161_v44 }
 0x37a   : > { %v1333_v48 = vpop.permute.xlu0 %1332 }
 0x37b   : > { %3602 = vmatpush.xpose.msk.msra.mxu2 %vm1200_vm5, %v1333_v48 }
 0x382   : > { %v1331_v49 = vpop.permute.xlu0 %1330 }
 0x383   : > { %3603 = vmatmul.msk.f32.vlgmr.msra.gmra.mxu2 %vm1200_vm5, %v1331_v49  ;;  %v1070_v49 = vld [vmem:[%s5645_s13 + $0x18] sm:$0xff] }
 0x384   : > { %1494 = vmatpush.msrb.mxu2 %v1070_v49 }
 0x38a   : > { %v1305_v50 = vpop.permute.xlu0 %1304 }
 0x38b   : > { %1325 = vmatpush.msrb.mxu0 %v1305_v50  ;;  %v1069_v50 = vld [vmem:[%s5645_s13 + $0x10] sm:$0xff] }
 0x38c   : > { %1495 = vmatpush.msrb.mxu2 %v1069_v50 }
 0x392   : > { %v1399_v51 = vpop.permute.xlu0 %1398 }
 0x393   : > { %3605 = vmatpush.xpose.msk.msra.mxu0 %vm1200_vm5, %v1399_v51  ;;  %v1068_v51 = vld [vmem:[%s5645_s13 + $0x8] sm:$0xff] }
 0x394   : > { %1496 = vmatpush.msrb.mxu2 %v1068_v51 }
 0x3e8   : > { %v1289_v52 = vpop.f32.mrf.mxu0 }
 0x3e9   : > { %v1292_v53 = vmul.f32 0.35355338, %v1289_v52  ;;  %v1067_v52 = vld [vmem:[%s5645_s13] sm:$0xff]  ;;  %s5676_s13 = sld [smem:[#allocation63_spill]] }
 0x3ea   : > { %1497 = vmatpush.msrb.mxu2 %v1067_v52 }
 0x3eb   : > { %v1293_v54 = vsel %vm1200_vm5, %v1292_v53, -inf }
 0x3ec   : > { %1294 = vmax.xlane.f32.xlu1 %v1293_v54  ;;  %1679 = vmatpush.msra.mxu2 %v4875_v14 }
 0x3ee   : > { %1680 = vmatpush.msra.mxu2 %v4880_v15 }
 0x3f0   : > { %1681 = vmatpush.msra.mxu2 %v4888_v16 }
 0x3f2   : > { %1682 = vmatpush.msra.mxu2 %v4897_v18 }
 0x3f9   : > { %v1223_v55 = vpop.f32.mrf.mxu3 }
 0x3fa   : > { %v1226_v56 = vmul.f32 0.35355338, %v1223_v55 }
 0x3fc   : > { %v1227_v57 = vsel %vm1200_vm5, %v1226_v56, -inf }
 0x3fd   : > { %1228 = vmax.xlane.f32.xlu0 %v1227_v57 }
 0x405   : > { %1396 = vrot.lane.b32.xlu1 %v1161_v44, %s5561_s22  ;;  %s5647_s22 = sld [smem:[#allocation47_spill]] }
 0x406   : > { %v1355_v63 = vpop.f32.mrf.mxu2 }
 0x407   : > { %v1358_v1 = vmul.f32 0.35355338, %v1355_v63  ;;  %v1075_v63 = vld [vmem:[#allocation8 + $0x18] sm:$0xff] }
 0x409   : > { %v1359_v2 = vsel %vm1200_vm5, %v1358_v1, -inf }
 0x45f   : > { %v1295_v58 = vpop.xlane.xlu1 %1294 }
 0x460   : > { %v1296_v59 = vsub.f32 %v1292_v53, %v1295_v58 }
 0x462   : > { %v1297_v60 = vmul.f32 1.442695, %v1296_v59 }
 0x464   : > { %3870 = vpow2.f32 %v1297_v60 }
 0x46a   : > { %v3871_v61 = vpop.eup %3870 }
 0x46b   : > { %v1299_v62 = vsel %vm1200_vm5, %v3871_v61, 0.0 }
 0x46c   : > { %1300 = vadd.xlane.f32.xlu2 %v1299_v62 }
 0x470   : > { %v1229_v12 = vpop.xlane.xlu0 %1228 }
 0x471   : > { %v1230_v20 = vsub.f32 %v1226_v56, %v1229_v12  ;;  %v3859_v12 = vld [vmem:[%s5646_s29] ss:$0 sm:$0xff]  ;;  %s5649_s29 = smov 96  }
 0x473   : > { %v1231_v21 = vmul.f32 1.442695, %v1230_v20 }
 0x474   : > { %1360 = vmax.xlane.f32.xlu2 %v1359_v2  ;;  %v1073_v2 = vld [vmem:[#allocation8 + $0x8] sm:$0xff] }
 0x477   : > { %v1397_v9 = vpop.permute.xlu1 %1396 }
 0x4df   : > { %v1301_v3 = vpop.xlane.xlu2 %1300 }
 0x4e0   : > { %3872 = vrcp.f32 %v1301_v3  ;;  %v1072_v3 = vld [vmem:[#allocation8] sm:$0xff] }
 0x4e6   : > { %v3873_v4 = vpop.eup %3872 }
 0x4e7   : > { %v1361_v5 = vpop.xlane.xlu2 %1360  ;;  %v1303_v6 = vmul.f32 %v3873_v4, %v3871_v61 }
 0x4e8   : > { %v1362_v7 = vsub.f32 %v1358_v1, %v1361_v5  ;;  %v1074_v1 = vld [vmem:[#allocation8 + $0x10] sm:$0xff] }
 0x4e9   : > { %3601 = vmatmul.msk.f32.vlgmr.msrb.gmra.mxu0 %vm1200_vm5, %v1303_v6 }
 0x4ea   : > { %v1363_v8 = vmul.f32 1.442695, %v1362_v7 }
 0x4ec   : > { %3874 = vpow2.f32 %v1363_v8 }
 0x4ed   : > { %3876 = vpow2.f32 %v1231_v21 }
 0x4f1   : > { %3606 = vmatmul.msk.f32.vlgmr.msra.gmra.mxu0 %vm1200_vm5, %v1397_v9 }
 0x4f2   : > { %v3875_v10 = vpop.eup %3874 }
 0x4f3   : > { %v1365_v11 = vsel %vm1200_vm5, %v3875_v10, 0.0  ;;  %v3877_v25 = vpop.eup %3876 }
 0x4f4   : > { %1366 = vadd.xlane.f32.xlu1 %v1365_v11  ;;  %v1233_v26 = vsel %vm1200_vm5, %v3877_v25, 0.0 }
 0x566   : > { %v1327_v19 = vpop.f32.mrf.mxu0 }
 0x567   : > { %v1367_v42 = vpop.xlane.xlu1 %1366 }
 0x56e   : > { %v1421_v22 = vpop.f32.mrf.mxu0 }
 0x56f   : > { %v1424_v23 = vmul.f32 0.35355338, %v1421_v22  ;;  %v1083_v22 = vld [vmem:[%s5647_s22 + $0x38] sm:$0xff] }
 0x571   : > { %v1425_v24 = vsel %vm1200_vm5, %v1424_v23, -inf }
 0x572   : > { %1426 = vmax.xlane.f32.xlu2 %v1425_v24  ;;  %v1081_v24 = vld [vmem:[%s5647_s22 + $0x28] sm:$0xff] }
 0x57a   : > { %1234 = vadd.xlane.f32.xlu2 %v1233_v26  ;;  %v1079_v26 = vld [vmem:[%s5647_s22 + $0x18] sm:$0xff] }
 0x592   : > { %1238 = vrot.lane.b32.xlu2 %v4910_v32, %s5575_s28 }
 0x59a   : > { %1436 = vrot.lane.b32.xlu2 %v4910_v32, %s5553_s2  ;;  %s5652_s2 = smov 88  }
 0x5a2   : > { %1463 = vrot.lane.b32.xlu2 %v1327_v19, %s5547_s1  ;;  %s5565_s1 = smov 24  }
 0x5e5   : > { %v1427_v27 = vpop.xlane.xlu2 %1426 }
 0x5e6   : > { %v1428_v28 = vsub.f32 %v1424_v23, %v1427_v27  ;;  %v1082_v23 = vld [vmem:[%s5647_s22 + $0x30] sm:$0xff] }
 0x5e7   : > { %v1078_v27 = vld [vmem:[%s5647_s22 + $0x10] sm:$0xff] }
 0x5e8   : > { %v1429_v29 = vmul.f32 1.442695, %v1428_v28  ;;  %v1077_v28 = vld [vmem:[%s5647_s22 + $0x8] sm:$0xff] }
 0x5ea   : > { %3878 = vpow2.f32 %v1429_v29 }
 0x5ed   : > { %v1235_v30 = vpop.xlane.xlu2 %1234 }
 0x5ee   : > { %3880 = vrcp.f32 %v1235_v30 }
 0x5f0   : > { %v3879_v31 = vpop.eup %3878 }
 0x5f1   : > { %v1431_v33 = vsel %vm1200_vm5, %v3879_v31, 0.0 }
 0x5f2   : > { %1432 = vadd.xlane.f32.xlu0 %v1431_v33 }
 0x5f4   : > { %v3881_v35 = vpop.eup %3880 }
 0x5f5   : > { %v1239_v36 = vpop.permute.xlu2 %1238  ;;  %v1237_v38 = vmul.f32 %v3881_v35, %v3877_v25  ;;  %v1080_v25 = vld [vmem:[%s5647_s22 + $0x20] sm:$0xff] }
 0x5f6   : > { %1259 = vmatpush.msrb.mxu3 %v1239_v36  ;;  %v1076_v35 = vld [vmem:[%s5647_s22] sm:$0xff] }
 0x5f7   : > { %3598 = vmatmul.msk.f32.vlgmr.msrb.gmra.mxu3 %vm1200_vm5, %v1237_v38 }
 0x5fd   : > { %v1437_v39 = vpop.permute.xlu2 %1436 }
 0x5fe   : > { %1457 = vmatpush.msrb.mxu1 %v1437_v39 }
 0x600   : > { %1584 = vmatpush.msra.mxu1 %v1083_v22 }
 0x602   : > { %1585 = vmatpush.msra.mxu1 %v1082_v23 }
 0x604   : > { %1586 = vmatpush.msra.mxu1 %v1081_v24 }
 0x605   : > { %v1464_v53 = vpop.permute.xlu2 %1463 }
 0x606   : > { %1370 = vrot.lane.b32.xlu0 %v4910_v32, %s5549_s27  ;;  %s5569_s27 = smov 16   ;;  %1587 = vmatpush.msra.mxu1 %v1080_v25 }
 0x608   : > { %1588 = vmatpush.msra.mxu1 %v1079_v26 }
 0x60a   : > { %1589 = vmatpush.msra.mxu1 %v1078_v27 }
 0x60c   : > { %1590 = vmatpush.msra.mxu1 %v1077_v28 }
 0x60e   : > { %1591 = vmatpush.msra.mxu1 %v1076_v35 }
 0x665   : > { %v1433_v40 = vpop.xlane.xlu0 %1432 }
 0x666   : > { %3882 = vrcp.f32 %v1433_v40 }
 0x667   : > { %3884 = vrcp.f32 %v1367_v42 }
 0x66c   : > { %v3883_v41 = vpop.eup %3882 }
 0x66d   : > { %v1435_v43 = vmul.f32 %v3883_v41, %v3879_v31  ;;  %v3885_v44 = vpop.eup %3884 }
 0x66e   : > { %v1369_v45 = vmul.f32 %v3885_v44, %v3875_v10 }
 0x66f   : > { %3607 = vmatmul.msk.f32.vlgmr.msrb.gmra.mxu1 %vm1200_vm5, %v1435_v43 }
 0x678   : > { %v1371_v46 = vpop.permute.xlu0 %1370 }
 0x679   : > { %1391 = vmatpush.msra.mxu3 %v1371_v46 }
 0x67a   : > { %3604 = vmatmul.msk.f32.vlgmr.msra.gmra.mxu3 %vm1200_vm5, %v1369_v45  ;;  %v1261_v48 = vpop.f32.mrf.mxu3 }
 0x67b   : > { %v1474_v54 = vsel %vm1200_vm5, %v1261_v48, %v1464_v53  ;;  %1539 = vmatpush.msrb.mxu3 %v1075_v63  ;;  %v1601_v53 = vld [vmem:[#allocation10 + $0x18] sm:$0xff] }
 0x67c   : > { %1655 = vmatpush.msrb.mxu1 %v1601_v53 }
 0x67d   : > { %1540 = vmatpush.msrb.mxu3 %v1074_v1 }
 0x67f   : > { %1541 = vmatpush.msrb.mxu3 %v1073_v2 }
 0x681   : > { %1542 = vmatpush.msrb.mxu3 %v1072_v3  ;;  %v3860_v3 = vld [vmem:[%s5648_s7] ss:$0 sm:$0xff]  ;;  %s5658_s7 = smov 56  }
 0x683   : > { %1706 = vmatpush.msra.mxu3 %v4875_v14 }
 0x685   : > { %1707 = vmatpush.msra.mxu3 %v4880_v15 }
 0x687   : > { %1708 = vmatpush.msra.mxu3 %v4888_v16 }
 0x689   : > { %1709 = vmatpush.msra.mxu3 %v4897_v18 }
 0x6ec   : > { %v1459_v47 = vpop.f32.mrf.mxu1 }
 0x6ed   : > { %1471 = vrot.lane.b32.xlu2 %v1459_v47, %s5565_s1  ;;  %s5653_s1 = smov 104  }
 0x6fd   : > { %v1393_v32 = vpop.f32.mrf.mxu3 }
 0x6fe   : > { %1467 = vrot.lane.b32.xlu1 %v1393_v32, %s5569_s27  ;;  %s5654_s27 = smov 120  }
 0x747   : > { %v1472_v56 = vpop.permute.xlu2 %1471 }
 0x770   : > { %v1468_v55 = vpop.permute.xlu1 %1467 }
 0x771   : > { %v1476_v57 = vsel %vm1475_vm6, %v1474_v54, %v1468_v55  ;;  %v1600_v54 = vld [vmem:[#allocation10 + $0x10] sm:$0xff]  ;;  %v1599_v55 = vld [vmem:[#allocation10 + $0x8] sm:$0xff] }
 0x772   : > { %v1478_v58 = vsel %vm1477_vm7, %v1476_v57, %v1472_v56  ;;  %1656 = vmatpush.msrb.mxu1 %v1600_v54  ;;  %v1598_v56 = vld [vmem:[#allocation10] sm:$0xff] }
 0x773   : > { %3608 = vmatmul.msk.f32.vlgmr.msrb.gmra.mxu2 %vm1085_vm0, %v1478_v58 }
 0x774   : > { %1657 = vmatpush.msrb.mxu1 %v1599_v55 }
 0x776   : > { %1658 = vmatpush.msrb.mxu1 %v1598_v56 }
 0x7f6   : > { %v1499_v59 = vpop.f32.mrf.mxu2 }
 0x7f7   : > { %v4987_v60 = vadd.f32 %v1499_v59, %v4853_v0 }
 0x7f9   : > { %v1503_v61 = vmul.f32 %v4987_v60, %v4987_v60 }
 0x7fb   : > { %v1504_v62 = vsel %vm1085_vm0, %v1503_v61, 0.0 }
 0x7fc   : > { %1505 = vadd.xlane.f32.xlu0 %v1504_v62 }
 0x86f   : > { %v1506_v0 = vpop.xlane.xlu0 %1505 }
 0x870   : > { %v1507_v4 = vmul.f32 %v1506_v0, %v4891_v17 }
 0x872   : > { %v1508_v5 = vadd.f32 1e-06, %v1507_v4 }
 0x874   : > { %3886 = vrsqrt.f32 %v1508_v5  ;;  %vm1515_vm9 = vweird.f32 %v1508_v5 }
 0x87a   : > { %v3887_v6 = vpop.eup %3886 }
 0x87b   : > { %v1510_v7 = vmul.f32 %v3887_v6, %v1508_v5  ;;  %vm1516_vm8 = vweird.f32 %v3887_v6 }
 0x87c   : > { %vm1517_vm10 = vmor %vm1515_vm9, %vm1516_vm8 }
 0x87d   : > { %v1511_v8 = vmul.f32 %v3887_v6, %v1510_v7 }
 0x87f   : > { %v1512_v9 = vmul.f32 0.5, %v1511_v8 }
 0x881   : > { %v1513_v10 = vsub.f32 1.5, %v1512_v9 }
 0x883   : > { %v1514_v11 = vmul.f32 %v3887_v6, %v1513_v10 }
 0x885   : > { %v1518_v19 = vsel %vm1517_vm10, %v3887_v6, %v1514_v11 }
 0x886   : > { %v1519_v20 = vmul.f32 %v1518_v19, %v4987_v60 }
 0x888   : > { %v1523_v21 = vmul.f32 %v3859_v12, %v1519_v20 }
 0x88a   : > { %3609 = vmatmul.msk.f32.vlgmr.msrb.gmra.mxu3 %vm1085_vm0, %v1523_v21 }
 0x90d   : > { %v1544_v29 = vpop.f32.mrf.mxu3 }
 0x90e   : > { %1568 = vrot.lane.b32.xlu2 %v1544_v29, %s5575_s28  ;;  %v3610_v30 = vmul.f32 -1.442695, %v1544_v29 }
 0x910   : > { %3888 = vpow2.f32 %v3610_v30 }
 0x916   : > { %v3889_v31 = vpop.eup %3888 }
 0x917   : > { %v1550_v33 = vadd.f32 1.0, %v3889_v31 }
 0x919   : > { %3890 = vrcp.f32 %v1550_v33  ;;  %v1562_v42 = vand.u32 2147483648, %v1550_v33  ;;  %vm1556_vm12 = vweird.f32 %v1550_v33  ;;  %v1560_v43 = vand.u32 2147483647, %v1550_v33 }
 0x91b   : > { %v1563_v45 = vor.u32 1.1754944e-38, %v1562_v42  ;;  %vm1561_vm14 = vcmp.eq.f32.partialorder %v1560_v43, 8.507059e+37 }
 0x91f   : > { %v3891_v36 = vpop.eup %3890 }
 0x920   : > { %v1552_v38 = vmul.f32 %v3891_v36, %v1550_v33  ;;  %vm1557_vm11 = vweird.f32 %v3891_v36 }
 0x921   : > { %vm1558_vm13 = vmor %vm1556_vm12, %vm1557_vm11 }
 0x922   : > { %v1553_v39 = vsub.f32 1.0, %v1552_v38 }
 0x924   : > { %v1554_v40 = vmul.f32 %v3891_v36, %v1553_v39 }
 0x926   : > { %v1555_v41 = vadd.f32 %v3891_v36, %v1554_v40 }
 0x928   : > { %v1559_v44 = vsel %vm1558_vm13, %v3891_v36, %v1555_v41 }
 0x929   : > { %v1564_v46 = vsel %vm1561_vm14, %v1563_v45, %v1559_v44 }
 0x92a   : > { %v1566_v47 = vmul.f32 %v1564_v46, %v1544_v29 }
 0x968   : > { %v1569_v48 = vpop.permute.xlu2 %1568 }
 0x969   : > { %v1571_v32 = vmul.f32 %v1569_v48, %v1566_v47 }
 0x96b   : > { %3611 = vmatmul.msk.f32.vlgmr.msra.gmra.mxu1 %vm1572_vm15, %v1571_v32 }
 0x9e8   : > { %v1593_v49 = vpop.f32.mrf.mxu1 }
 0x9e9   : > { %v5029_v50 = vadd.f32 %v1593_v49, %v4987_v60 }
 0x9eb   : > { %v1619_v51 = vmul.f32 %v5029_v50, %v5029_v50 }
 0x9ed   : > { %v1620_v52 = vsel %vm1085_vm0, %v1619_v51, 0.0 }
 0x9ee   : > { %1621 = vadd.xlane.f32.xlu2 %v1620_v52 }
 0xa61   : > { %v1622_v57 = vpop.xlane.xlu2 %1621 }
 0xa62   : > { %v1623_v58 = vmul.f32 %v1622_v57, %v4891_v17 }
 0xa64   : > { %v1624_v59 = vadd.f32 1e-06, %v1623_v58 }
 0xa66   : > { %3892 = vrsqrt.f32 %v1624_v59  ;;  %vm1631_vm2 = vweird.f32 %v1624_v59 }
 0xa6c   : > { %v3893_v60 = vpop.eup %3892 }
 0xa6d   : > { %v1626_v61 = vmul.f32 %v3893_v60, %v1624_v59  ;;  %vm1632_vm1 = vweird.f32 %v3893_v60 }
 0xa6e   : > { %vm1633_vm3 = vmor %vm1631_vm2, %vm1632_vm1 }
 0xa6f   : > { %v1627_v62 = vmul.f32 %v3893_v60, %v1626_v61 }
 0xa71   : > { %v1628_v63 = vmul.f32 0.5, %v1627_v62 }
 0xa73   : > { %v1629_v1 = vsub.f32 1.5, %v1628_v63 }
 0xa75   : > { %v1630_v2 = vmul.f32 %v3893_v60, %v1629_v1 }
 0xa77   : > { %v1634_v0 = vsel %vm1633_vm3, %v3893_v60, %v1630_v2 }
 0xa78   : > { %v1635_v4 = vmul.f32 %v1634_v0, %v5029_v50 }
 0xa7a   : > { %v1639_v5 = vmul.f32 %v3860_v3, %v1635_v4 }
 0xa7c   : > { %3612 = vmatmul.msk.f32.vlgmr.msrb.gmra.mxu1 %vm1085_vm0, %v1639_v5 }
 0xaf9   : > { %v5040_v6 = vpop.f32.mrf.mxu1 }
 0xafa   : > { %1690 = vrot.lane.b32.xlu1 %v5040_v6, %s5649_s29  ;;  %3613 = vmatmul.msk.f32.vlgmr.msra.gmra.mxu2 %vm1085_vm0, %v5040_v6  ;;  %v1689_v10 = vmul.f32 %v5040_v6, %v4921_v37  ;;  %v1663_v21 = vmul.f32 %v5040_v6, %v4870_v13 }
 0xb6c   : > { %v1691_v7 = vpop.permute.xlu1 %1690 }
 0xb6d   : > { %3614 = vmatmul.msk.f32.vlgmr.msra.gmra.mxu3 %vm1085_vm0, %v1691_v7 }
 0xb7d   : > { %v1684_v19 = vpop.f32.mrf.mxu2 }
 0xb7e   : > { %v1687_v20 = vmul.f32 %v1684_v19, %v4917_v34 }
 0xb80   : > { %v1688_v22 = vadd.f32 %v1687_v20, %v1663_v21 }
 0xbf0   : > { %v1711_v8 = vpop.f32.mrf.mxu3 }
 0xbf1   : > { %v1714_v9 = vmul.f32 %v1711_v8, %v4917_v34 }
 0xbf3   : > { %1716 = vrot.lane.b32.xlu1 %v1714_v9, %s5650_s18 }
 0xc65   : > { %v1717_v11 = vpop.permute.xlu1 %1716 }
 0xc66   : > { %v1719_v12 = vadd.f32 %v1717_v11, %v1689_v10 }
 0xc68   : > { %1920 = vrot.lane.b32.xlu2 %v1719_v12, %s5651_s12  ;;  %1788 = vrot.lane.b32.xlu0 %v1719_v12, %s5652_s2 }
 0xc69   : > { %1721 = vrot.lane.b32.xlu1 %v1719_v12, %s5649_s29 }
 0xc70   : > { %1918 = vrot.lane.b32.xlu0 %v1688_v22, %s5653_s1 }
 0xc71   : > { %1786 = vrot.lane.b32.xlu1 %v1688_v22, %s5654_s27 }
 0xc79   : > { %1854 = vrot.lane.b32.xlu1 %v1719_v12, %s5655_s17 }
 0xc81   : > { %1852 = vrot.lane.b32.xlu1 %v1688_v22, %s5656_s25 }
 0xcc2   : > { %v1921_v24 = vpop.permute.xlu2 %1920 }
 0xcda   : > { %v1789_v23 = vpop.permute.xlu0 %1788 }
 0xcdb   : > { %v1722_v25 = vpop.permute.xlu1 %1721  ;;  %3618 = vmatpush.xpose.msk.msrb.mxu3 %vm1200_vm5, %v1789_v23 }
 0xcdc   : > { %3615 = vmatpush.xpose.msk.msra.mxu1 %vm1200_vm5, %v1722_v25  ;;  %v1605_v25 = vld [vmem:[#allocation11 + $0x18] sm:$0xff] }
 0xcdf   : > { %3624 = vmatpush.xpose.msk.msra.mxu3 %vm1200_vm5, %v1921_v24  ;;  %3616 = vmatmul.msk.f32.vlgmr.msra.gmra.mxu1 %vm1200_vm5, %v1688_v22 }
 0xce2   : > { %v1919_v34 = vpop.permute.xlu0 %1918 }
 0xce3   : > { %v1787_v13 = vpop.permute.xlu1 %1786 }
 0xce4   : > { %3619 = vmatmul.msk.f32.vlgmr.msrb.gmra.mxu3 %vm1200_vm5, %v1787_v13  ;;  %v1604_v13 = vld [vmem:[#allocation11 + $0x10] sm:$0xff] }
 0xceb   : > { %v1855_v26 = vpop.permute.xlu1 %1854 }
 0xcec   : > { %3621 = vmatpush.xpose.msk.msrb.mxu1 %vm1200_vm5, %v1855_v26  ;;  %3625 = vmatmul.msk.f32.vlgmr.msra.gmra.mxu3 %vm1200_vm5, %v1919_v34  ;;  %v1603_v34 = vld [vmem:[#allocation11 + $0x8] sm:$0xff]  ;;  %v1602_v26 = vld [vmem:[#allocation11] sm:$0xff] }
 0xcf0   : > { %2014 = vmatpush.msra.mxu1 %v1605_v25  ;;  %v2118_v25 = vld [vmem:[#allocation16 + $0x8] sm:$0xff] }
 0xcf2   : > { %2015 = vmatpush.msra.mxu1 %v1604_v13  ;;  %v2117_v13 = vld [vmem:[#allocation16] sm:$0xff] }
 0xcf3   : > { %v1853_v27 = vpop.permute.xlu1 %1852 }
 0xcf4   : > { %3622 = vmatmul.msk.f32.vlgmr.msrb.gmra.mxu1 %vm1200_vm5, %v1853_v27 }
 0xcf5   : > { %2016 = vmatpush.msra.mxu1 %v1603_v34 }
 0xcf7   : > { %2017 = vmatpush.msra.mxu1 %v1602_v26 }
 0xcf9   : > { %2198 = vmatpush.msrb.mxu1 %v4875_v14 }
 0xcfb   : > { %2199 = vmatpush.msrb.mxu1 %v4880_v15 }
 0xcfd   : > { %2200 = vmatpush.msrb.mxu1 %v4888_v16 }
 0xcff   : > { %2201 = vmatpush.msrb.mxu1 %v4897_v18 }
 0xd5c   : > { %v1745_v28 = vpop.f32.mrf.mxu1 }
 0xd5d   : > { %v1748_v29 = vmul.f32 0.35355338, %v1745_v28 }
 0xd5f   : > { %v1749_v30 = vsel %vm1200_vm5, %v1748_v29, -inf }
 0xd60   : > { %1750 = vmax.xlane.f32.xlu1 %v1749_v30 }
 0xd67   : > { %v1811_v31 = vpop.f32.mrf.mxu3 }
 0xd68   : > { %v1814_v33 = vmul.f32 0.35355338, %v1811_v31 }
 0xd6a   : > { %v1815_v35 = vsel %vm1200_vm5, %v1814_v33, -inf }
 0xd6b   : > { %1816 = vmax.xlane.f32.xlu0 %v1815_v35 }
 0xd6f   : > { %v1943_v36 = vpop.f32.mrf.mxu3 }
 0xd70   : > { %v1946_v38 = vmul.f32 0.35355338, %v1943_v36 }
 0xd71   : > { %v1877_v39 = vpop.f32.mrf.mxu1 }
 0xd72   : > { %v1880_v40 = vmul.f32 0.35355338, %v1877_v39  ;;  %v1947_v41 = vsel %vm1200_vm5, %v1946_v38, -inf }
 0xd73   : > { %1948 = vmax.xlane.f32.xlu1 %v1947_v41  ;;  %v1609_v41 = vld [vmem:[#allocation14 + $0x10] sm:$0xff] }
 0xd74   : > { %v1881_v42 = vsel %vm1200_vm5, %v1880_v40, -inf }
 0xd75   : > { %1882 = vmax.xlane.f32.xlu2 %v1881_v42  ;;  %v1608_v42 = vld [vmem:[#allocation14 + $0x8] sm:$0xff] }
 0xd8d   : > { %1760 = vrot.lane.b32.xlu2 %v5040_v6, %s5575_s28  ;;  %s5659_s28 = smov 48  }
 0xd95   : > { %1958 = vrot.lane.b32.xlu2 %v5040_v6, %s5657_s10 }
 0xdd3   : > { %v1751_v43 = vpop.xlane.xlu1 %1750 }
 0xdd4   : > { %v1752_v44 = vsub.f32 %v1748_v29, %v1751_v43  ;;  %v1607_v43 = vld [vmem:[#allocation14] sm:$0xff] }
 0xdd6   : > { %v1753_v45 = vmul.f32 1.442695, %v1752_v44 }
 0xdd8   : > { %3894 = vpow2.f32 %v1753_v45 }
 0xdde   : > { %v3895_v46 = vpop.eup %3894  ;;  %v1817_v47 = vpop.xlane.xlu0 %1816 }
 0xddf   : > { %v1818_v48 = vsub.f32 %v1814_v33, %v1817_v47  ;;  %v1755_v32 = vsel %vm1200_vm5, %v3895_v46, 0.0 }
 0xde0   : > { %1756 = vadd.xlane.f32.xlu0 %v1755_v32 }
 0xde1   : > { %v1819_v49 = vmul.f32 1.442695, %v1818_v48 }
 0xde3   : > { %3896 = vpow2.f32 %v1819_v49 }
 0xde6   : > { %v1949_v51 = vpop.xlane.xlu1 %1948 }
 0xde7   : > { %v1950_v52 = vsub.f32 %v1946_v38, %v1949_v51 }
 0xde8   : > { %v1883_v53 = vpop.xlane.xlu2 %1882 }
 0xde9   : > { %v3897_v54 = vpop.eup %3896  ;;  %v1951_v55 = vmul.f32 1.442695, %v1950_v52  ;;  %v1884_v56 = vsub.f32 %v1880_v40, %v1883_v53  ;;  %v1610_v40 = vld [vmem:[#allocation14 + $0x18] sm:$0xff]  ;;  %v1617_v53 = vld [vmem:[%s5520_s15 + $0x30] sm:$0xff] }
 0xdea   : > { %v1821_v57 = vsel %vm1200_vm5, %v3897_v54, 0.0 }
 0xdeb   : > { %3898 = vpow2.f32 %v1951_v55  ;;  %v1885_v58 = vmul.f32 1.442695, %v1884_v56  ;;  %1822 = vadd.xlane.f32.xlu1 %v1821_v57  ;;  %v1615_v55 = vld [vmem:[%s5520_s15 + $0x20] sm:$0xff]  ;;  %v1614_v56 = vld [vmem:[%s5520_s15 + $0x18] sm:$0xff]  ;;  %v1613_v57 = vld [vmem:[%s5520_s15 + $0x10] sm:$0xff] }
 0xded   : > { %3900 = vpow2.f32 %v1885_v58  ;;  %v1612_v58 = vld [vmem:[%s5520_s15 + $0x8] sm:$0xff] }
 0xdf0   : > { %v1761_v59 = vpop.permute.xlu2 %1760 }
 0xdf1   : > { %v3899_v60 = vpop.eup %3898  ;;  %1781 = vmatpush.msrb.mxu2 %v1761_v59 }
 0xdf2   : > { %v1953_v61 = vsel %vm1200_vm5, %v3899_v60, 0.0 }
 0xdf3   : > { %v3901_v62 = vpop.eup %3900  ;;  %1954 = vadd.xlane.f32.xlu1 %v1953_v61 }
 0xdf4   : > { %v1887_v63 = vsel %vm1200_vm5, %v3901_v62, 0.0 }
 0xdf5   : > { %1888 = vadd.xlane.f32.xlu0 %v1887_v63  ;;  %v1611_v63 = vld [vmem:[%s5520_s15] sm:$0xff] }
 0xdf8   : > { %v1959_v11 = vpop.permute.xlu2 %1958 }
 0xe09   : > { %1826 = vrot.lane.b32.xlu0 %v5040_v6, %s5658_s7 }
 0xe0c   : > { %1892 = vrot.lane.b32.xlu1 %v5040_v6, %s5659_s28 }
 0xe53   : > { %v1757_v1 = vpop.xlane.xlu0 %1756 }
 0xe54   : > { %3902 = vrcp.f32 %v1757_v1 }
 0xe5a   : > { %v3903_v2 = vpop.eup %3902 }
 0xe5b   : > { %v1759_v3 = vmul.f32 %v3903_v2, %v3895_v46 }
 0xe5d   : > { %3617 = vmatmul.msk.f32.vlgmr.msrb.gmra.mxu2 %vm1200_vm5, %v1759_v3 }
 0xe5e   : > { %v1823_v0 = vpop.xlane.xlu1 %1822 }
 0xe5f   : > { %3904 = vrcp.f32 %v1823_v0 }
 0xe65   : > { %v3905_v7 = vpop.eup %3904 }
 0xe66   : > { %v1955_v5 = vpop.xlane.xlu1 %1954  ;;  %v1825_v9 = vmul.f32 %v3905_v7, %v3897_v54  ;;  %v1616_v54 = vld [vmem:[%s5520_s15 + $0x28] sm:$0xff] }
 0xe68   : > { %v1889_v4 = vpop.xlane.xlu0 %1888 }
 0xe69   : > { %3906 = vrcp.f32 %v1889_v4 }
 0xe6a   : > { %3908 = vrcp.f32 %v1955_v5 }
 0xe6f   : > { %v3907_v8 = vpop.eup %3906 }
 0xe70   : > { %v1891_v6 = vmul.f32 %v3907_v8, %v3901_v62  ;;  %v3909_v19 = vpop.eup %3908 }
 0xe71   : > { %v1957_v20 = vmul.f32 %v3909_v19, %v3899_v60 }
 0xe7b   : > { %v1827_v10 = vpop.permute.xlu0 %1826 }
 0xe7c   : > { %1847 = vmatpush.msrb.mxu0 %v1827_v10 }
 0xe7d   : > { %3620 = vmatmul.msk.f32.vlgmr.msrb.gmra.mxu0 %vm1200_vm5, %v1825_v9 }
 0xe7e   : > { %1979 = vmatpush.msra.mxu0 %v1959_v11  ;;  %v1893_v12 = vpop.permute.xlu1 %1892 }
 0xe7f   : > { %1913 = vmatpush.msra.mxu2 %v1893_v12 }
 0xe80   : > { %3623 = vmatmul.msk.f32.vlgmr.msra.gmra.mxu2 %vm1200_vm5, %v1891_v6 }
 0xe81   : > { %2059 = vmatpush.msrb.mxu2 %v1610_v40 }
 0xe83   : > { %2060 = vmatpush.msrb.mxu2 %v1609_v41 }
 0xe85   : > { %3626 = vmatmul.msk.f32.vlgmr.msra.gmra.mxu0 %vm1200_vm5, %v1957_v20  ;;  %2061 = vmatpush.msrb.mxu2 %v1608_v42 }
 0xe87   : > { %2062 = vmatpush.msrb.mxu2 %v1607_v43 }
 0xe89   : > { %2225 = vmatpush.msra.mxu2 %v4875_v14  ;;  %v3861_v14 = vld [vmem:[#allocation13] ss:$0 sm:$0xff] }
 0xe8b   : > { %2226 = vmatpush.msra.mxu2 %v4880_v15 }
 0xe8d   : > { %2227 = vmatpush.msra.mxu2 %v4888_v16 }
 0xe8f   : > { %2228 = vmatpush.msra.mxu2 %v4897_v18  ;;  %v1618_v18 = vld [vmem:[%s5520_s15 + $0x38] sm:$0xff] }
 0xe90   : > { %2103 = vmatpush.msrb.mxu3 %v1618_v18 }
 0xe92   : > { %2104 = vmatpush.msrb.mxu3 %v1617_v53 }
 0xe94   : > { %2105 = vmatpush.msrb.mxu3 %v1616_v54 }
 0xe96   : > { %2106 = vmatpush.msrb.mxu3 %v1615_v55 }
 0xe98   : > { %2107 = vmatpush.msrb.mxu3 %v1614_v56 }
 0xe9a   : > { %2108 = vmatpush.msrb.mxu3 %v1613_v57 }
 0xe9c   : > { %2109 = vmatpush.msrb.mxu3 %v1612_v58 }
 0xe9e   : > { %2110 = vmatpush.msrb.mxu3 %v1611_v63 }
 0xee0   : > { %v1783_v22 = vpop.f32.mrf.mxu2 }
 0xefa   : > { %v1849_v21 = vpop.f32.mrf.mxu0 }
 0xefb   : > { %1985 = vrot.lane.b32.xlu0 %v1849_v21, %s5660_s3 }
 0xf02   : > { %v1981_v23 = vpop.f32.mrf.mxu0 }
 0xf03   : > { %1993 = vrot.lane.b32.xlu0 %v1981_v23, %s5661_s4  ;;  %v1915_v24 = vpop.f32.mrf.mxu2  ;;  %v2120_v23 = vld [vmem:[#allocation16 + $0x18] sm:$0xff] }
 0xf04   : > { %1989 = vrot.lane.b32.xlu2 %v1915_v24, %s5662_s6  ;;  %2174 = vmatpush.msrb.mxu0 %v2120_v23  ;;  %v2119_v24 = vld [vmem:[#allocation16 + $0x10] sm:$0xff] }
 0xf06   : > { %2175 = vmatpush.msrb.mxu0 %v2119_v24 }
 0xf08   : > { %2176 = vmatpush.msrb.mxu0 %v2118_v25 }
 0xf0a   : > { %2177 = vmatpush.msrb.mxu0 %v2117_v13 }
 0xf5e   : > { %v1990_v29 = vpop.permute.xlu2 %1989 }
 0xf6d   : > { %v1986_v27 = vpop.permute.xlu0 %1985 }
 0xf6e   : > { %v1996_v28 = vsel %vm1200_vm5, %v1783_v22, %v1986_v27 }
 0xf6f   : > { %v1997_v31 = vsel %vm1475_vm6, %v1996_v28, %v1990_v29 }
 0xf75   : > { %v1994_v30 = vpop.permute.xlu0 %1993 }
 0xf76   : > { %v1998_v33 = vsel %vm1477_vm7, %v1997_v31, %v1994_v30 }
 0xf77   : > { %3627 = vmatmul.msk.f32.vlgmr.msra.gmra.mxu1 %vm1085_vm0, %v1998_v33 }
 0xff4   : > { %v2019_v35 = vpop.f32.mrf.mxu1 }
 0xff5   : > { %v5101_v36 = vadd.f32 %v2019_v35, %v5029_v50 }
 0xff7   : > { %v2023_v38 = vmul.f32 %v5101_v36, %v5101_v36 }
 0xff9   : > { %v2024_v39 = vsel %vm1085_vm0, %v2023_v38, 0.0 }
 0xffa   : > { %2025 = vadd.xlane.f32.xlu1 %v2024_v39 }
0x106d   : > { %v2026_v50 = vpop.xlane.xlu1 %2025 }
0x106e   : > { %v2027_v44 = vmul.f32 %v2026_v50, %v4891_v17  ;;  %v3976_v50 = vld [vmem:[#allocation5] sm:$0xff] }
0x1070   : > { %v2028_v45 = vadd.f32 1e-06, %v2027_v44 }
0x1072   : > { %3910 = vrsqrt.f32 %v2028_v45  ;;  %vm2035_vm8 = vweird.f32 %v2028_v45 }
0x1078   : > { %v3911_v46 = vpop.eup %3910 }
0x1079   : > { %v2030_v47 = vmul.f32 %v3911_v46, %v2028_v45  ;;  %vm2036_vm4 = vweird.f32 %v3911_v46  ;;  %v3977_v45 = vld [vmem:[#allocation7] sm:$0xff] }
0x107a   : > { %vm2037_vm9 = vmor %vm2035_vm8, %vm2036_vm4 }
0x107b   : > { %v2031_v48 = vmul.f32 %v3911_v46, %v2030_v47 }
0x107d   : > { %v2032_v32 = vmul.f32 0.5, %v2031_v48 }
0x107f   : > { %v2033_v49 = vsub.f32 1.5, %v2032_v32 }
0x1081   : > { %v2034_v51 = vmul.f32 %v3911_v46, %v2033_v49 }
0x1083   : > { %v2038_v15 = vsel %vm2037_vm9, %v3911_v46, %v2034_v51 }
0x1084   : > { %v2039_v52 = vmul.f32 %v2038_v15, %v5101_v36 }
0x1086   : > { %v2043_v16 = vmul.f32 %v3861_v14, %v2039_v52 }
0x1088   : > { %3628 = vmatmul.msk.f32.vlgmr.msrb.gmra.mxu2 %vm1085_vm0, %v2043_v16 }
0x110b   : > { %v2064_v59 = vpop.f32.mrf.mxu2 }
0x110c   : > { %2088 = vrot.lane.b32.xlu2 %v2064_v59, %s5663_s5  ;;  %v3629_v60 = vmul.f32 -1.442695, %v2064_v59 }
0x110e   : > { %3912 = vpow2.f32 %v3629_v60 }
0x1114   : > { %v3913_v61 = vpop.eup %3912 }
0x1115   : > { %v2070_v62 = vadd.f32 1.0, %v3913_v61 }
0x1117   : > { %3914 = vrcp.f32 %v2070_v62  ;;  %v2082_v5 = vand.u32 2147483648, %v2070_v62  ;;  %vm2076_vm11 = vweird.f32 %v2070_v62  ;;  %v2080_v7 = vand.u32 2147483647, %v2070_v62 }
0x1119   : > { %v2083_v9 = vor.u32 1.1754944e-38, %v2082_v5  ;;  %vm2081_vm13 = vcmp.eq.f32.partialorder %v2080_v7, 8.507059e+37 }
0x111d   : > { %v3915_v1 = vpop.eup %3914 }
0x111e   : > { %v2072_v2 = vmul.f32 %v3915_v1, %v2070_v62  ;;  %vm2077_vm10 = vweird.f32 %v3915_v1 }
0x111f   : > { %vm2078_vm12 = vmor %vm2076_vm11, %vm2077_vm10 }
0x1120   : > { %v2073_v3 = vsub.f32 1.0, %v2072_v2 }
0x1122   : > { %v2074_v0 = vmul.f32 %v3915_v1, %v2073_v3 }
0x1124   : > { %v2075_v4 = vadd.f32 %v3915_v1, %v2074_v0 }
0x1126   : > { %v2079_v8 = vsel %vm2078_vm12, %v3915_v1, %v2075_v4 }
0x1127   : > { %v2084_v10 = vsel %vm2081_vm13, %v2083_v9, %v2079_v8 }
0x1128   : > { %v2086_v11 = vmul.f32 %v2084_v10, %v2064_v59 }
0x1166   : > { %v2089_v6 = vpop.permute.xlu2 %2088 }
0x1167   : > { %v2091_v12 = vmul.f32 %v2089_v6, %v2086_v11 }
0x1169   : > { %3630 = vmatmul.msk.f32.vlgmr.msrb.gmra.mxu3 %vm1572_vm15, %v2091_v12 }
0x11ec   : > { %v2112_v19 = vpop.f32.mrf.mxu3 }
0x11ed   : > { %v5140_v20 = vadd.f32 %v2112_v19, %v5101_v36  ;;  %v3862_v36 = vld [vmem:[%s5521_s16] ss:$0 sm:$0xff] }
0x11ef   : > { %v2138_v21 = vmul.f32 %v5140_v20, %v5140_v20 }
0x11f1   : > { %v2139_v22 = vsel %vm1085_vm0, %v2138_v21, 0.0 }
0x11f2   : > { %2140 = vadd.xlane.f32.xlu0 %v2139_v22 }
0x1265   : > { %v2141_v34 = vpop.xlane.xlu0 %2140 }
0x1266   : > { %v2142_v26 = vmul.f32 %v2141_v34, %v4891_v17 }
0x1268   : > { %v2143_v27 = vadd.f32 1e-06, %v2142_v26 }
0x126a   : > { %3916 = vrsqrt.f32 %v2143_v27  ;;  %vm2150_vm1 = vweird.f32 %v2143_v27 }
0x1270   : > { %v3917_v28 = vpop.eup %3916 }
0x1271   : > { %v2145_v29 = vmul.f32 %v3917_v28, %v2143_v27  ;;  %vm2151_vm14 = vweird.f32 %v3917_v28 }
0x1272   : > { %vm2152_vm2 = vmor %vm2150_vm1, %vm2151_vm14 }
0x1273   : > { %v2146_v30 = vmul.f32 %v3917_v28, %v2145_v29 }
0x1275   : > { %v2147_v31 = vmul.f32 0.5, %v2146_v30 }
0x1277   : > { %v2148_v33 = vsub.f32 1.5, %v2147_v31 }
0x1279   : > { %v2149_v35 = vmul.f32 %v3917_v28, %v2148_v33 }
0x127b   : > { %v2153_v38 = vsel %vm2152_vm2, %v3917_v28, %v2149_v35 }
0x127c   : > { %v2154_v39 = vmul.f32 %v2153_v38, %v5140_v20 }
0x127e   : > { %v2158_v40 = vmul.f32 %v3862_v36, %v2154_v39 }
0x1280   : > { %3631 = vmatmul.msk.f32.vlgmr.msrb.gmra.mxu0 %vm1085_vm0, %v2158_v40 }
0x12fd   : > { %v5151_v41 = vpop.f32.mrf.mxu0 }
0x12fe   : > { %2209 = vrot.lane.b32.xlu2 %v5151_v41, %s5649_s29  ;;  %3632 = vmatmul.msk.f32.vlgmr.msrb.gmra.mxu1 %vm1085_vm0, %v5151_v41  ;;  %v2182_v44 = vmul.f32 %v3976_v50, %v5151_v41  ;;  %v2208_v49 = vmul.f32 %v5151_v41, %v4921_v37 }
0x1358   : > { %v2210_v42 = vpop.permute.xlu2 %2209 }
0x1359   : > { %3633 = vmatmul.msk.f32.vlgmr.msra.gmra.mxu2 %vm1085_vm0, %v2210_v42 }
0x137b   : > { %v2203_v43 = vpop.f32.mrf.mxu1 }
0x137c   : > { %v2206_v46 = vmul.f32 %v3977_v45, %v2203_v43 }
0x137e   : > { %v2207_v47 = vadd.f32 %v2206_v46, %v2182_v44 }
0x1380   : > { %2437 = vrot.lane.b32.xlu0 %v2207_v47, %s5653_s1 }
0x13dc   : > { %v2230_v48 = vpop.f32.mrf.mxu2 }
0x13dd   : > { %v2233_v32 = vmul.f32 %v3977_v45, %v2230_v48 }
0x13df   : > { %2235 = vrot.lane.b32.xlu2 %v2233_v32, %s5650_s18  ;;  %s5675_s18 = sld [smem:[#allocation60_spill]] }
0x13e7   : > { %2305 = vrot.lane.b32.xlu2 %v2207_v47, %s5654_s27 }
0x13f2   : > { %v2438_v54 = vpop.permute.xlu0 %2437 }
0x1439   : > { %v2236_v51 = vpop.permute.xlu2 %2235 }
0x143a   : > { %v2238_v14 = vadd.f32 %v2236_v51, %v2208_v49  ;;  %v2124_v49 = vld [vmem:[#allocation17 + $0x18] sm:$0xff]  ;;  %v2123_v51 = vld [vmem:[#allocation17 + $0x10] sm:$0xff] }
0x143c   : > { %2439 = vrot.lane.b32.xlu1 %v2238_v14, %s5651_s12  ;;  %2307 = vrot.lane.b32.xlu2 %v2238_v14, %s5652_s2  ;;  %s4388_s12 = scalar_lea.hbm %s5676_s13, 16 }
0x1441   : > { %v2306_v15 = vpop.permute.xlu2 %2305 }
0x1444   : > { %2240 = vrot.lane.b32.xlu2 %v2238_v14, %s5649_s29 }
0x144c   : > { %2373 = vrot.lane.b32.xlu2 %v2238_v14, %s5655_s17  ;;  %v2122_v14 = vld [vmem:[#allocation17 + $0x8] sm:$0xff] }
0x1454   : > { %2371 = vrot.lane.b32.xlu2 %v2207_v47, %s5656_s25 }
0x1496   : > { %v2308_v52 = vpop.permute.xlu2 %2307 }
0x1497   : > { %3637 = vmatpush.xpose.msk.msrb.mxu2 %vm1200_vm5, %v2308_v52 }
0x149a   : > { %3638 = vmatmul.msk.f32.vlgmr.msrb.gmra.mxu2 %vm1200_vm5, %v2306_v15  ;;  %v2121_v15 = vld [vmem:[#allocation17] sm:$0xff] }
0x149e   : > { %v2241_v16 = vpop.permute.xlu2 %2240 }
0x149f   : > { %3634 = vmatpush.xpose.msk.msra.mxu0 %vm1200_vm5, %v2241_v16 }
0x14a2   : > { %3635 = vmatmul.msk.f32.vlgmr.msra.gmra.mxu0 %vm1200_vm5, %v2207_v47 }
0x14a6   : > { %v2374_v37 = vpop.permute.xlu2 %2373 }
0x14a7   : > { %3640 = vmatpush.xpose.msk.msrb.mxu0 %vm1200_vm5, %v2374_v37 }
0x14ab   : > { %2533 = vmatpush.msra.mxu0 %v2124_v49  ;;  %v2643_v49 = vld [vmem:[#allocation20 + $0x40] sm:$0xff] }
0x14ad   : > { %2534 = vmatpush.msra.mxu0 %v2123_v51  ;;  %v2644_v51 = vld [vmem:[#allocation20 + $0x48] sm:$0xff] }
0x14ae   : > { %v2440_v18 = vpop.permute.xlu1 %2439  ;;  %v2372_v53 = vpop.permute.xlu2 %2371 }
0x14af   : > { %3641 = vmatmul.msk.f32.vlgmr.msrb.gmra.mxu0 %vm1200_vm5, %v2372_v53  ;;  %3643 = vmatpush.xpose.msk.msra.mxu2 %vm1200_vm5, %v2440_v18 }
0x14b0   : > { %2535 = vmatpush.msra.mxu0 %v2122_v14  ;;  %v2645_v14 = vld [vmem:[#allocation20 + $0x50] sm:$0xff] }
0x14b2   : > { %3644 = vmatmul.msk.f32.vlgmr.msra.gmra.mxu2 %vm1200_vm5, %v2438_v54  ;;  %2536 = vmatpush.msra.mxu0 %v2121_v15  ;;  %v2649_v15 = vld [vmem:[#allocation20 + $0x70] sm:$0xff] }
0x151d   : > { %v2330_v55 = vpop.f32.mrf.mxu2 }
0x151e   : > { %v2333_v56 = vmul.f32 0.35355338, %v2330_v55 }
0x151f   : > { %v2264_v57 = vpop.f32.mrf.mxu0 }
0x1520   : > { %v2267_v58 = vmul.f32 0.35355338, %v2264_v57  ;;  %v2334_v59 = vsel %vm1200_vm5, %v2333_v56, -inf }
0x1521   : > { %2335 = vmax.xlane.f32.xlu2 %v2334_v59  ;;  %v2129_v59 = vld [vmem:[#allocation19 + $0x18] sm:$0xff] }
0x1522   : > { %v2268_v60 = vsel %vm1200_vm5, %v2267_v58, -inf }
0x1523   : > { %2269 = vmax.xlane.f32.xlu0 %v2268_v60  ;;  %v2128_v60 = vld [vmem:[#allocation19 + $0x10] sm:$0xff] }
0x152c   : > { %v2396_v61 = vpop.f32.mrf.mxu0 }
0x152d   : > { %v2399_v62 = vmul.f32 0.35355338, %v2396_v61  ;;  %v2127_v61 = vld [vmem:[#allocation19 + $0x8] sm:$0xff] }
0x152f   : > { %v2400_v63 = vsel %vm1200_vm5, %v2399_v62, -inf }
0x1530   : > { %2401 = vmax.xlane.f32.xlu2 %v2400_v63 }
0x1535   : > { %v2462_v1 = vpop.f32.mrf.mxu2 }
0x1536   : > { %v2465_v2 = vmul.f32 0.35355338, %v2462_v1 }
0x1537   : > { %2345 = vrot.lane.b32.xlu0 %v5151_v41, %s5658_s7 }
0x1538   : > { %v2466_v3 = vsel %vm1200_vm5, %v2465_v2, -inf }
0x1539   : > { %2467 = vmax.xlane.f32.xlu1 %v2466_v3 }
0x1594   : > { %v2336_v0 = vpop.xlane.xlu2 %2335 }
0x1595   : > { %v2337_v4 = vsub.f32 %v2333_v56, %v2336_v0 }
0x1596   : > { %v2270_v5 = vpop.xlane.xlu0 %2269 }
0x1597   : > { %v2338_v7 = vmul.f32 1.442695, %v2337_v4  ;;  %v2271_v8 = vsub.f32 %v2267_v58, %v2270_v5 }
0x1599   : > { %3918 = vpow2.f32 %v2338_v7  ;;  %v2272_v9 = vmul.f32 1.442695, %v2271_v8  ;;  %v3863_v8 = vld [vmem:[%s5524_s19] ss:$0 sm:$0xff] }
0x159b   : > { %3920 = vpow2.f32 %v2272_v9 }
0x159f   : > { %v3919_v10 = vpop.eup %3918 }
0x15a0   : > { %v2340_v11 = vsel %vm1200_vm5, %v3919_v10, 0.0 }
0x15a1   : > { %v3921_v6 = vpop.eup %3920  ;;  %2341 = vadd.xlane.f32.xlu0 %v2340_v11 }
0x15a2   : > { %v2274_v12 = vsel %vm1200_vm5, %v3921_v6, 0.0 }
0x15a3   : > { %2275 = vadd.xlane.f32.xlu1 %v2274_v12  ;;  %v2402_v19 = vpop.xlane.xlu2 %2401 }
0x15a4   : > { %v2403_v21 = vsub.f32 %v2399_v62, %v2402_v19  ;;  %v2126_v62 = vld [vmem:[#allocation19] sm:$0xff] }
0x15a6   : > { %v2404_v22 = vmul.f32 1.442695, %v2403_v21 }
0x15a8   : > { %3922 = vpow2.f32 %v2404_v22 }
0x15a9   : > { %v2346_v23 = vpop.permute.xlu0 %2345 }
0x15aa   : > { %2366 = vmatpush.msra.mxu3 %v2346_v23 }
0x15ac   : > { %v2468_v24 = vpop.xlane.xlu1 %2467 }
0x15ad   : > { %v2469_v25 = vsub.f32 %v2465_v2, %v2468_v24 }
0x15ae   : > { %v3923_v13 = vpop.eup %3922 }
0x15af   : > { %v2470_v34 = vmul.f32 1.442695, %v2469_v25  ;;  %v2406_v26 = vsel %vm1200_vm5, %v3923_v13, 0.0 }
0x15b0   : > { %2407 = vadd.xlane.f32.xlu1 %v2406_v26 }
0x15b1   : > { %3924 = vpow2.f32 %v2470_v34 }
0x15b5   : > { %2411 = vrot.lane.b32.xlu0 %v5151_v41, %s5659_s28  ;;  %s5664_s28 = sld [smem:[#allocation56_spill]] }
0x15b7   : > { %v3925_v27 = vpop.eup %3924 }
0x15b8   : > { %v2472_v28 = vsel %vm1200_vm5, %v3925_v27, 0.0 }
0x15b9   : > { %2473 = vadd.xlane.f32.xlu2 %v2472_v28  ;;  %v2660_v28 = vld [vmem:[#allocation20 + $0xc8] sm:$0xff] }
0x15ba   : > { %2866 = vmatpush.msrb.mxu0 %v2660_v28  ;;  %v2680_v28 = vld [vmem:[#allocation22 + $0x60] sm:$0xff] }
0x15bb   : > { %v2135_v12 = vld [vmem:[%s5664_s28 + $0x28] sm:$0xff]  ;;  %v2134_v19 = vld [vmem:[%s5664_s28 + $0x20] sm:$0xff]  ;;  %v2133_v21 = vld [vmem:[%s5664_s28 + $0x18] sm:$0xff] }
0x15bc   : > { %v2132_v22 = vld [vmem:[%s5664_s28 + $0x10] sm:$0xff]  ;;  %v2131_v23 = vld [vmem:[%s5664_s28 + $0x8] sm:$0xff]  ;;  %v2130_v26 = vld [vmem:[%s5664_s28] sm:$0xff] }
0x15c9   : > { %2477 = vrot.lane.b32.xlu1 %v5151_v41, %s5657_s10  ;;  %s3668_s10 = sshll.u32 %s4661_s11, 3 }
0x15ca   : > { %s3372_s24 = scalar_lea.hbm %s5676_s13, %s3668_s10 }
0x15d1   : > { %2279 = vrot.lane.b32.xlu2 %v5151_v41, %s5663_s5 }
0x1614   : > { %v2342_v29 = vpop.xlane.xlu0 %2341 }
0x1615   : > { %3926 = vrcp.f32 %v2342_v29  ;;  %v2661_v29 = vld [vmem:[#allocation20 + $0xd0] sm:$0xff] }
0x1616   : > { %v2276_v33 = vpop.xlane.xlu1 %2275 }
0x1617   : > { %3928 = vrcp.f32 %v2276_v33  ;;  %v2652_v33 = vld [vmem:[#allocation20 + $0x88] sm:$0xff] }
0x1618   : > { %2867 = vmatpush.msrb.mxu0 %v2652_v33  ;;  %v2730_v33 = vld [vmem:[#allocation22 + $0x1f0] sm:$0xff] }
0x161a   : > { %2868 = vmatpush.msrb.mxu0 %v2644_v51  ;;  %v2687_v51 = vld [vmem:[#allocation22 + $0x98] sm:$0xff] }
0x161b   : > { %v3927_v30 = vpop.eup %3926 }
0x161c   : > { %v2344_v31 = vmul.f32 %v3927_v30, %v3919_v10  ;;  %v2665_v30 = vld [vmem:[#allocation20 + $0xf0] sm:$0xff] }
0x161d   : > { %v3929_v38 = vpop.eup %3928 }
0x161e   : > { %3639 = vmatmul.msk.f32.vlgmr.msra.gmra.mxu3 %vm1200_vm5, %v2344_v31  ;;  %v2278_v39 = vmul.f32 %v3929_v38, %v3921_v6  ;;  %v2136_v6 = vld [vmem:[%s5664_s28 + $0x30] sm:$0xff]  ;;  %v2651_v31 = vld [vmem:[#allocation20 + $0x80] sm:$0xff] }
0x1623   : > { %v2408_v36 = vpop.xlane.xlu1 %2407 }
0x1627   : > { %v2412_v42 = vpop.permute.xlu0 %2411 }
0x162c   : > { %v2474_v35 = vpop.xlane.xlu2 %2473 }
0x162d   : > { %3930 = vrcp.f32 %v2474_v35  ;;  %v2653_v35 = vld [vmem:[#allocation20 + $0x90] sm:$0xff] }
0x162e   : > { %3932 = vrcp.f32 %v2408_v36  ;;  %v2657_v36 = vld [vmem:[#allocation20 + $0xb0] sm:$0xff] }
0x1633   : > { %v3931_v41 = vpop.eup %3930 }
0x1634   : > { %v2280_v40 = vpop.permute.xlu2 %2279  ;;  %v3933_v43 = vpop.eup %3932  ;;  %v2476_v50 = vmul.f32 %v3931_v41, %v3925_v27  ;;  %v2659_v27 = vld [vmem:[#allocation20 + $0xc0] sm:$0xff] }
0x1635   : > { %2300 = vmatpush.msra.mxu1 %v2280_v40  ;;  %v2410_v45 = vmul.f32 %v3933_v43, %v3923_v13 }
0x1636   : > { %3636 = vmatmul.msk.f32.vlgmr.msra.gmra.mxu1 %vm1200_vm5, %v2278_v39 }
0x1637   : > { %2432 = vmatpush.msrb.mxu1 %v2412_v42 }
0x1639   : > { %2578 = vmatpush.msra.mxu1 %v2129_v59  ;;  %v2656_v59 = vld [vmem:[#allocation20 + $0xa8] sm:$0xff] }
0x163b   : > { %v2478_v44 = vpop.permute.xlu1 %2477  ;;  %2579 = vmatpush.msra.mxu1 %v2128_v60  ;;  %v2646_v60 = vld [vmem:[#allocation20 + $0x58] sm:$0xff] }
0x163c   : > { %2498 = vmatpush.msrb.mxu3 %v2478_v44 }
0x163d   : > { %3645 = vmatmul.msk.f32.vlgmr.msrb.gmra.mxu3 %vm1200_vm5, %v2476_v50  ;;  %2580 = vmatpush.msra.mxu1 %v2127_v61  ;;  %v2647_v61 = vld [vmem:[#allocation20 + $0x60] sm:$0xff] }
0x163e   : > { %3642 = vmatmul.msk.f32.vlgmr.msrb.gmra.mxu1 %vm1200_vm5, %v2410_v45  ;;  %2846 = vmatpush.msra.mxu3 %v2659_v27  ;;  %v2696_v27 = vld [vmem:[#allocation22 + $0xe0] sm:$0xff] }
0x163f   : > { %2581 = vmatpush.msra.mxu1 %v2126_v62  ;;  %v2648_v62 = vld [vmem:[#allocation20 + $0x68] sm:$0xff] }
0x1640   : > { %2847 = vmatpush.msra.mxu3 %v2651_v31  ;;  %v2679_v31 = vld [vmem:[#allocation22 + $0x58] sm:$0xff] }
0x1641   : > { %2886 = vmatpush.msrb.mxu1 %v2661_v29  ;;  %v2731_v29 = vld [vmem:[#allocation22 + $0x1f8] sm:$0xff] }
0x1642   : > { %2848 = vmatpush.msra.mxu3 %v2643_v49  ;;  %v2674_v49 = vld [vmem:[#allocation22 + $0x30] sm:$0xff] }
0x1643   : > { %2887 = vmatpush.msrb.mxu1 %v2653_v35  ;;  %v2694_v35 = vld [vmem:[#allocation22 + $0xd0] sm:$0xff] }
0x1645   : > { %2888 = vmatpush.msrb.mxu1 %v2645_v14  ;;  %v2703_v14 = vld [vmem:[#allocation22 + $0x118] sm:$0xff] }
0x16a1   : > { %v2368_v46 = vpop.f32.mrf.mxu3 }
0x16a2   : > { %2504 = vrot.lane.b32.xlu0 %v2368_v46, %s5660_s3  ;;  %s3362_s3 = scalar_lea.sflag [#allocation4], %s4819_s0 }
0x16b3   : > { %v2302_v47 = vpop.f32.mrf.mxu1 }
0x16bb   : > { %v2434_v48 = vpop.f32.mrf.mxu1 }
0x16bc   : > { %2508 = vrot.lane.b32.xlu2 %v2434_v48, %s5662_s6 }
0x16c0   : > { %v2500_v32 = vpop.f32.mrf.mxu3 }
0x16c1   : > { %2512 = vrot.lane.b32.xlu1 %v2500_v32, %s5661_s4  ;;  %s3376_s4 = sshll.u32 %s3372_s24, 4  ;;  %s3377_s4 = int_to_ptr.hbm [resolvable:$true] %s3376_s4 }
0x16c2   : > { %s4382_s11 = sshra.s32 %s3377_s4, 4  ;;  %s4383_s11 = int_to_ptr.hbm [resolvable:$true] %s4382_s11 }
0x16c3   : > { %s4384_s6 = scalar_lea.hbm %s4383_s11, 8  ;;  %p4389_p12 = scmp.lt.s32.totalorder %s4383_s11, %s5676_s13 }
0x16c4   : > { %p4385_p1 = scmp.ne.s32.totalorder %s4383_s11, %s4384_s6  ;;  %p4390_p7 = scmp.lt.s32.totalorder %s4388_s12, %s4384_s6 }
0x16c6   : > { %p4386_p3 = pnand %p4385_p1, %p4788_p5  ;;  %p4391_p8 = por %p4390_p7, %p4389_p12 }
0x16c8   : > { %p4387_p4 = pneg %p4386_p3 }
0x16ca   : > { %p4392_p9 = pnand %p4391_p8, %p4387_p4 }
0x1714   : > { %v2505_v52 = vpop.permute.xlu0 %2504 }
0x1715   : > { %v2515_v16 = vsel %vm1200_vm5, %v2302_v47, %v2505_v52  ;;  %v2635_v52 = vld [vmem:[#allocation20] sm:$0xff] }
0x1716   : > { %v2509_v37 = vpop.permute.xlu2 %2508  ;;  %2849 = vmatpush.msra.mxu3 %v2635_v52  ;;  %v2673_v52 = vld [vmem:[#allocation22 + $0x28] sm:$0xff] }
0x1717   : > { %v2516_v18 = vsel %vm1475_vm6, %v2515_v16, %v2509_v37  ;;  %v2636_v16 = vld [vmem:[#allocation20 + $0x8] sm:$0xff]  ;;  %v2637_v37 = vld [vmem:[#allocation20 + $0x10] sm:$0xff] }
0x1718   : > { %2869 = vmatpush.msrb.mxu0 %v2636_v16  ;;  %2889 = vmatpush.msrb.mxu1 %v2637_v37  ;;  %v2686_v16 = vld [vmem:[#allocation22 + $0x90] sm:$0xff] }
0x1719   : > { %v2702_v37 = vld [vmem:[#allocation22 + $0x110] sm:$0xff] }
0x1733   : > { %v2513_v53 = vpop.permute.xlu1 %2512 }
0x1734   : > { %v2517_v54 = vsel %vm1477_vm7, %v2516_v18, %v2513_v53  ;;  %v2641_v18 = vld [vmem:[#allocation20 + $0x30] sm:$0xff]  ;;  %v2662_v53 = vld [vmem:[#allocation20 + $0xd8] sm:$0xff] }
0x1735   : > { %3646 = vmatmul.msk.f32.vlgmr.msra.gmra.mxu0 %vm1085_vm0, %v2517_v54  ;;  %v2663_v54 = vld [vmem:[#allocation20 + $0xe0] sm:$0xff]  ;;  %2906 = vmatpush.msrb.mxu3 %v2662_v53 }
0x1736   : > { %2926 = vmatpush.msra.mxu0 %v2663_v54  ;;  %v2672_v53 = vld [vmem:[#allocation22 + $0x20] sm:$0xff]  ;;  %v2685_v54 = vld [vmem:[#allocation22 + $0x88] sm:$0xff] }
0x17b2   : > { %v2538_v55 = vpop.f32.mrf.mxu0 }
0x17b3   : > { %v5205_v56 = vadd.f32 %v2538_v55, %v5140_v20  ;;  %v2664_v55 = vld [vmem:[#allocation20 + $0xe8] sm:$0xff] }
0x17b5   : > { %v2542_v57 = vmul.f32 %v5205_v56, %v5205_v56 }
0x17b7   : > { %v2543_v58 = vsel %vm1085_vm0, %v2542_v57, 0.0  ;;  %v2654_v57 = vld [vmem:[#allocation20 + $0x98] sm:$0xff] }
0x17b8   : > { %2544 = vadd.xlane.f32.xlu0 %v2543_v58  ;;  %v2655_v58 = vld [vmem:[#allocation20 + $0xa0] sm:$0xff]  ;;  %2907 = vmatpush.msrb.mxu3 %v2654_v57 }
0x17b9   : > { %2927 = vmatpush.msra.mxu0 %v2655_v58  ;;  %v2724_v57 = vld [vmem:[#allocation22 + $0x1c0] sm:$0xff]  ;;  %v2671_v58 = vld [vmem:[#allocation22 + $0x18] sm:$0xff] }
0x17ba   : > { %2908 = vmatpush.msrb.mxu3 %v2646_v60  ;;  %v2700_v60 = vld [vmem:[#allocation22 + $0x100] sm:$0xff] }
0x17bb   : > { %2928 = vmatpush.msra.mxu0 %v2647_v61  ;;  %v2723_v61 = vld [vmem:[#allocation22 + $0x1b8] sm:$0xff] }
0x182b   : > { %v2545_v63 = vpop.xlane.xlu0 %2544 }
0x182c   : > { %v2546_v1 = vmul.f32 %v2545_v63, %v4891_v17  ;;  %v2137_v17 = vld [vmem:[%s5664_s28 + $0x38] sm:$0xff] }
0x182d   : > { %2622 = vmatpush.msrb.mxu2 %v2137_v17  ;;  %v2638_v63 = vld [vmem:[#allocation20 + $0x18] sm:$0xff] }
0x182e   : > { %v2547_v2 = vadd.f32 1e-06, %v2546_v1  ;;  %v2639_v1 = vld [vmem:[#allocation20 + $0x20] sm:$0xff]  ;;  %2909 = vmatpush.msrb.mxu3 %v2638_v63  ;;  %v2666_v17 = vld [vmem:[#allocation20 + $0xf8] sm:$0xff] }
0x182f   : > { %2623 = vmatpush.msrb.mxu2 %v2136_v6  ;;  %2929 = vmatpush.msra.mxu0 %v2639_v1  ;;  %v2699_v6 = vld [vmem:[#allocation22 + $0xf8] sm:$0xff]  ;;  %v2670_v1 = vld [vmem:[#allocation22 + $0x10] sm:$0xff] }
0x1830   : > { %3934 = vrsqrt.f32 %v2547_v2  ;;  %vm2554_vm6 = vweird.f32 %v2547_v2  ;;  %v2779_v63 = vld [vmem:[#allocation22 + $0x378] sm:$0xff] }
0x1831   : > { %2624 = vmatpush.msrb.mxu2 %v2135_v12  ;;  %v2683_v12 = vld [vmem:[#allocation22 + $0x78] sm:$0xff] }
0x1833   : > { %2625 = vmatpush.msrb.mxu2 %v2134_v19  ;;  %v2707_v19 = vld [vmem:[#allocation22 + $0x138] sm:$0xff] }
0x1835   : > { %2626 = vmatpush.msrb.mxu2 %v2133_v21  ;;  %v2658_v21 = vld [vmem:[#allocation20 + $0xb8] sm:$0xff] }
0x1836   : > { %v3935_v20 = vpop.eup %3934 }
0x1837   : > { %v2549_v3 = vmul.f32 %v3935_v20, %v2547_v2  ;;  %vm2555_vm5 = vweird.f32 %v3935_v20  ;;  %2627 = vmatpush.msrb.mxu2 %v2132_v22  ;;  %v2640_v2 = vld [vmem:[#allocation20 + $0x28] sm:$0xff]  ;;  %v2698_v22 = vld [vmem:[#allocation22 + $0xf0] sm:$0xff] }
0x1838   : > { %vm2556_vm7 = vmor %vm2554_vm6, %vm2555_vm5 }
0x1839   : > { %v2550_v0 = vmul.f32 %v3935_v20, %v2549_v3  ;;  %2628 = vmatpush.msrb.mxu2 %v2131_v23  ;;  %v2714_v3 = vld [vmem:[#allocation22 + $0x170] sm:$0xff] }
0x183a   : > { %v2682_v23 = vld [vmem:[#allocation22 + $0x70] sm:$0xff] }
0x183b   : > { %v2551_v4 = vmul.f32 0.5, %v2550_v0  ;;  %2629 = vmatpush.msrb.mxu2 %v2130_v26  ;;  %v2713_v0 = vld [vmem:[#allocation22 + $0x168] sm:$0xff]  ;;  %v2642_v26 = vld [vmem:[#allocation20 + $0x38] sm:$0xff] }
0x183d   : > { %v2552_v5 = vsub.f32 1.5, %v2551_v4  ;;  %2966 = vmatpush.msra.mxu2 %v2665_v30  ;;  %v2712_v4 = vld [vmem:[#allocation22 + $0x160] sm:$0xff]  ;;  %v2695_v30 = vld [vmem:[#allocation22 + $0xd8] sm:$0xff] }
0x183f   : > { %v2553_v7 = vmul.f32 %v3935_v20, %v2552_v5  ;;  %2967 = vmatpush.msra.mxu2 %v2657_v36  ;;  %v2711_v5 = vld [vmem:[#allocation22 + $0x158] sm:$0xff]  ;;  %v2678_v36 = vld [vmem:[#allocation22 + $0x50] sm:$0xff] }
0x1841   : > { %v2557_v9 = vsel %vm2556_vm7, %v3935_v20, %v2553_v7  ;;  %2968 = vmatpush.msra.mxu2 %v2649_v15  ;;  %v2715_v20 = vld [vmem:[#allocation22 + $0x178] sm:$0xff]  ;;  %v2710_v7 = vld [vmem:[#allocation22 + $0x150] sm:$0xff] }
0x1842   : > { %v2558_v10 = vmul.f32 %v2557_v9, %v5205_v56  ;;  %v2708_v9 = vld [vmem:[#allocation22 + $0x140] sm:$0xff]  ;;  %v2726_v15 = vld [vmem:[#allocation22 + $0x1d0] sm:$0xff] }
0x1843   : > { %2969 = vmatpush.msra.mxu2 %v2641_v18  ;;  %v2725_v18 = vld [vmem:[#allocation22 + $0x1c8] sm:$0xff] }
0x1844   : > { %v2562_v11 = vmul.f32 %v3863_v8, %v2558_v10  ;;  %v2709_v8 = vld [vmem:[#allocation22 + $0x148] sm:$0xff] }
0x1846   : > { %3647 = vmatmul.msk.f32.vlgmr.msra.gmra.mxu1 %vm1085_vm0, %v2562_v11 }
0x1847   : > { %2946 = vmatpush.msra.mxu1 %v2664_v55  ;;  %v2701_v55 = vld [vmem:[#allocation22 + $0x108] sm:$0xff] }
0x1849   : > { %2947 = vmatpush.msra.mxu1 %v2656_v59  ;;  %v2684_v59 = vld [vmem:[#allocation22 + $0x80] sm:$0xff] }
0x184b   : > { %2948 = vmatpush.msra.mxu1 %v2648_v62  ;;  %v2763_v62 = vld [vmem:[#allocation22 + $0x2f8] sm:$0xff] }
0x184d   : > { %2949 = vmatpush.msra.mxu1 %v2640_v2  ;;  %v2722_v2 = vld [vmem:[#allocation22 + $0x1b0] sm:$0xff] }
0x18c3   : > { %v2583_v24 = vpop.f32.mrf.mxu1 }
0x18c4   : > { %2607 = vrot.lane.b32.xlu2 %v2583_v24, %s5663_s5  ;;  %v3648_v25 = vmul.f32 -1.442695, %v2583_v24 }
0x18c6   : > { %3936 = vpow2.f32 %v3648_v25  ;;  %v2697_v25 = vld [vmem:[#allocation22 + $0xe8] sm:$0xff] }
0x18cc   : > { %v3937_v13 = vpop.eup %3936 }
0x18cd   : > { %v2589_v34 = vadd.f32 1.0, %v3937_v13  ;;  %v2681_v13 = vld [vmem:[#allocation22 + $0x68] sm:$0xff] }
0x18cf   : > { %3938 = vrcp.f32 %v2589_v34  ;;  %v2601_v43 = vand.u32 2147483648, %v2589_v34  ;;  %vm2595_vm4 = vweird.f32 %v2589_v34  ;;  %v2599_v50 = vand.u32 2147483647, %v2589_v34 }
0x18d1   : > { %v2602_v45 = vor.u32 1.1754944e-38, %v2601_v43  ;;  %vm2600_vm9 = vcmp.eq.f32.partialorder %v2599_v50, 8.507059e+37  ;;  %v2676_v43 = vld [vmem:[#allocation22 + $0x40] sm:$0xff]  ;;  %v2691_v50 = vld [vmem:[#allocation22 + $0xb8] sm:$0xff] }
0x18d5   : > { %v3939_v38 = vpop.eup %3938 }
0x18d6   : > { %v2591_v39 = vmul.f32 %v3939_v38, %v2589_v34  ;;  %vm2596_vm3 = vweird.f32 %v3939_v38  ;;  %v2705_v34 = vld [vmem:[#allocation22 + $0x128] sm:$0xff] }
0x18d7   : > { %vm2597_vm8 = vmor %vm2595_vm4, %vm2596_vm3 }
0x18d8   : > { %v2592_v40 = vsub.f32 1.0, %v2591_v39  ;;  %v2693_v39 = vld [vmem:[#allocation22 + $0xc8] sm:$0xff] }
0x18da   : > { %v2593_v42 = vmul.f32 %v3939_v38, %v2592_v40  ;;  %v2677_v40 = vld [vmem:[#allocation22 + $0x48] sm:$0xff] }
0x18dc   : > { %v2594_v41 = vadd.f32 %v3939_v38, %v2593_v42  ;;  %v2728_v42 = vld [vmem:[#allocation22 + $0x1e0] sm:$0xff] }
0x18de   : > { %v2598_v44 = vsel %vm2597_vm8, %v3939_v38, %v2594_v41  ;;  %v2729_v38 = vld [vmem:[#allocation22 + $0x1e8] sm:$0xff]  ;;  %v2692_v41 = vld [vmem:[#allocation22 + $0xc0] sm:$0xff] }
0x18df   : > { %v2603_v46 = vsel %vm2600_vm9, %v2602_v45, %v2598_v44  ;;  %v2690_v44 = vld [vmem:[#allocation22 + $0xb0] sm:$0xff]  ;;  %v2689_v45 = vld [vmem:[#allocation22 + $0xa8] sm:$0xff] }
0x18e0   : > { %v2605_v47 = vmul.f32 %v2603_v46, %v2583_v24  ;;  %v2706_v24 = vld [vmem:[#allocation22 + $0x130] sm:$0xff]  ;;  %v2675_v46 = vld [vmem:[#allocation22 + $0x38] sm:$0xff] }
0x191e   : > { %v2608_v48 = vpop.permute.xlu2 %2607 }
0x191f   : > { %v2610_v32 = vmul.f32 %v2608_v48, %v2605_v47  ;;  %v2688_v47 = vld [vmem:[#allocation22 + $0xa0] sm:$0xff] }
0x1920   : > { %v2704_v48 = vld [vmem:[#allocation22 + $0x120] sm:$0xff] }
0x1921   : > { %3649 = vmatmul.msk.f32.vlgmr.msrb.gmra.mxu2 %vm1572_vm15, %v2610_v32  ;;  %v2727_v32 = vld [vmem:[#allocation22 + $0x1d8] sm:$0xff] }
0x1922   : > { %3197 = vmatpush.msrb.mxu2 %v2715_v20  ;;  %v2762_v20 = vld [vmem:[#allocation22 + $0x2f0] sm:$0xff] }
0x1924   : > { %3198 = vmatpush.msrb.mxu2 %v2714_v3  ;;  %v2778_v3 = vld [vmem:[#allocation22 + $0x370] sm:$0xff] }
0x1926   : > { %3199 = vmatpush.msrb.mxu2 %v2713_v0  ;;  %v2669_v0 = vld [vmem:[#allocation22 + $0x8] sm:$0xff] }
0x1928   : > { %3200 = vmatpush.msrb.mxu2 %v2712_v4  ;;  %v2721_v4 = vld [vmem:[#allocation22 + $0x1a8] sm:$0xff] }
0x192a   : > { %3201 = vmatpush.msrb.mxu2 %v2711_v5  ;;  %v2761_v5 = vld [vmem:[#allocation22 + $0x2e8] sm:$0xff] }
0x192c   : > { %3202 = vmatpush.msrb.mxu2 %v2710_v7  ;;  %v2777_v7 = vld [vmem:[#allocation22 + $0x368] sm:$0xff] }
0x192e   : > { %3203 = vmatpush.msrb.mxu2 %v2709_v8  ;;  %v2668_v8 = vld [vmem:[#allocation22] sm:$0xff] }
0x1930   : > { %3204 = vmatpush.msrb.mxu2 %v2708_v9  ;;  %v2720_v9 = vld [vmem:[#allocation22 + $0x1a0] sm:$0xff] }
0x1932   : > { %3205 = vmatpush.msrb.mxu2 %v2707_v19  ;;  %v2746_v19 = vld [vmem:[#allocation22 + $0x270] sm:$0xff] }
0x1934   : > { %3206 = vmatpush.msrb.mxu2 %v2706_v24  ;;  %v2745_v24 = vld [vmem:[#allocation22 + $0x268] sm:$0xff] }
0x1936   : > { %3207 = vmatpush.msrb.mxu2 %v2705_v34  ;;  %v2717_v34 = vld [vmem:[#allocation22 + $0x188] sm:$0xff] }
0x1938   : > { %3208 = vmatpush.msrb.mxu2 %v2704_v48  ;;  %v2742_v48 = vld [vmem:[#allocation22 + $0x250] sm:$0xff] }
0x193a   : > { %3209 = vmatpush.msrb.mxu2 %v2703_v14 }
0x193c   : > { %3210 = vmatpush.msrb.mxu2 %v2702_v37  ;;  %v2741_v37 = vld [vmem:[#allocation22 + $0x248] sm:$0xff] }
0x193e   : > { %3211 = vmatpush.msrb.mxu2 %v2701_v55 }
0x1940   : > { %3212 = vmatpush.msrb.mxu2 %v2700_v60 }
0x19a4   : > { %v2631_v10 = vpop.f32.mrf.mxu2 }
0x19a5   : > { %v2634_v11 = vadd.f32 %v2631_v10, %v5205_v56  ;;  %v2650_v56 = vld [vmem:[#allocation20 + $0x78] sm:$0xff] }
0x19a6   : > { %v2747_v10 = vld [vmem:[#allocation22 + $0x278] sm:$0xff] }
0x19a7   : > { %3650 = vmatmul.msk.f32.vlgmr.msra.gmra.mxu3 %vm1085_vm0, %v2634_v11  ;;  %3651 = vmatmul.msk.f32.vlgmr.msrb.gmra.mxu0 %vm1085_vm0, %v2634_v11 }
0x19a8   : > { %3652 = vmatmul.msk.f32.vlgmr.msrb.gmra.mxu1 %vm1085_vm0, %v2634_v11  ;;  %3656 = vmatmul.msk.f32.vlgmr.msra.gmra.mxu2 %vm1085_vm0, %v2634_v11 }
0x19a9   : > { %2986 = vmatpush.msra.mxu3 %v2666_v17  ;;  %3177 = vmatpush.msrb.mxu1 %v2699_v6  ;;  %v2776_v17 = vld [vmem:[#allocation22 + $0x360] sm:$0xff] }
0x19aa   : > { %3157 = vmatpush.msrb.mxu0 %v2683_v12  ;;  %3277 = vmatpush.msra.mxu2 %v2779_v63  ;;  %v5254_v6 = vld [vmem:[%s5665_s30] sm:$0xff]  ;;  %v2769_v63 = vld [vmem:[#allocation22 + $0x328] sm:$0xff]  ;;  %s5678_s30 = sshll.u32 %s4819_s0, 3 }
0x19ab   : > { %2987 = vmatpush.msra.mxu3 %v2658_v21  ;;  %3178 = vmatpush.msrb.mxu1 %v2698_v22  ;;  %v2719_v12 = vld [vmem:[#allocation22 + $0x198] sm:$0xff]  ;;  %s1054_s14 = scalar_lea.vmem [#allocation23], %s5678_s30 }
0x19ac   : > { %3158 = vmatpush.msrb.mxu0 %v2682_v23  ;;  %3278 = vmatpush.msra.mxu2 %v2778_v3  ;;  %v2759_v21 = vld [vmem:[#allocation22 + $0x2d8] sm:$0xff]  ;;  %v2718_v23 = vld [vmem:[#allocation22 + $0x190] sm:$0xff]  ;;  %v2792_v3 = vld [vmem:[#allocation22 + $0x3e0] sm:$0xff]  ;;  %s3374_s21 = sshll.u32 %s1054_s14, 4  ;;  %s3375_s21 = int_to_ptr.vmem [resolvable:$true] %s3374_s21 }
0x19ad   : > { %2988 = vmatpush.msra.mxu3 %v2650_v56  ;;  %3179 = vmatpush.msrb.mxu1 %v2697_v25  ;;  %v2775_v22 = vld [vmem:[#allocation22 + $0x358] sm:$0xff]  ;;  %v2758_v56 = vld [vmem:[#allocation22 + $0x2d0] sm:$0xff] }
0x19ae   : > { %3159 = vmatpush.msrb.mxu0 %v2681_v13  ;;  %3279 = vmatpush.msra.mxu2 %v2777_v7  ;;  %v2774_v25 = vld [vmem:[#allocation22 + $0x350] sm:$0xff]  ;;  %v2816_v13 = vperm.slane %v5254_v6, 1  ;;  %v2739_v7 = vld [vmem:[#allocation22 + $0x238] sm:$0xff] }
0x19af   : > { %3653 = vmatmul.msk.f32.vlgmr.msrb.gmra.mxu3 %vm1085_vm0, %v2634_v11  ;;  %3654 = vmatmul.msk.f32.vlgmr.msra.gmra.mxu0 %vm1085_vm0, %v2634_v11 }
0x19b0   : > { %3655 = vmatmul.msk.f32.vlgmr.msra.gmra.mxu1 %vm1085_vm0, %v2634_v11  ;;  %2989 = vmatpush.msra.mxu3 %v2642_v26  ;;  %v2817_v26 = vperm.slane %v5254_v6, 2 }
0x19b1   : > { %3180 = vmatpush.msrb.mxu1 %v2696_v27  ;;  %3160 = vmatpush.msrb.mxu0 %v2680_v28 }
0x19b2   : > { %3217 = vmatpush.msrb.mxu3 %v2731_v29  ;;  %3280 = vmatpush.msra.mxu2 %v2776_v17 }
0x19b3   : > { %3181 = vmatpush.msrb.mxu1 %v2695_v30  ;;  %3161 = vmatpush.msrb.mxu0 %v2679_v31  ;;  %v2744_v31 = vld [vmem:[#allocation22 + $0x260] sm:$0xff] }
0x19b4   : > { %3218 = vmatpush.msrb.mxu3 %v2730_v33  ;;  %3281 = vmatpush.msra.mxu2 %v2775_v22  ;;  %v2757_v33 = vld [vmem:[#allocation22 + $0x2c8] sm:$0xff]  ;;  %v2790_v22 = vld [vmem:[#allocation22 + $0x3d0] sm:$0xff] }
0x19b5   : > { %3182 = vmatpush.msrb.mxu1 %v2694_v35  ;;  %3162 = vmatpush.msrb.mxu0 %v2678_v36  ;;  %v2773_v35 = vld [vmem:[#allocation22 + $0x348] sm:$0xff] }
0x19b6   : > { %3219 = vmatpush.msrb.mxu3 %v2729_v38  ;;  %3282 = vmatpush.msra.mxu2 %v2774_v25  ;;  %v2815_v38 = vperm.slane %v5254_v6, 0  ;;  %v2766_v25 = vld [vmem:[#allocation22 + $0x310] sm:$0xff] }
0x19b7   : > { %3657 = vmatmul.msk.f32.vlgmr.msra.gmra.mxu3 %vm1085_vm0, %v2634_v11  ;;  %3183 = vmatpush.msrb.mxu1 %v2693_v39  ;;  %v2760_v11 = vld [vmem:[#allocation22 + $0x2e0] sm:$0xff] }
0x19b8   : > { %3163 = vmatpush.msrb.mxu0 %v2677_v40  ;;  %3220 = vmatpush.msrb.mxu3 %v2728_v42  ;;  %v2716_v39 = vld [vmem:[#allocation22 + $0x180] sm:$0xff]  ;;  %v2821_v42 = vperm.slane %v5254_v6, 6 }
0x19b9   : > { %3184 = vmatpush.msrb.mxu1 %v2692_v41  ;;  %3283 = vmatpush.msra.mxu2 %v2773_v35  ;;  %v2743_v41 = vld [vmem:[#allocation22 + $0x258] sm:$0xff]  ;;  %v2749_v35 = vld [vmem:[#allocation22 + $0x288] sm:$0xff] }
0x19ba   : > { %3164 = vmatpush.msrb.mxu0 %v2676_v43  ;;  %3221 = vmatpush.msrb.mxu3 %v2727_v32  ;;  %v2756_v43 = vld [vmem:[#allocation22 + $0x2c0] sm:$0xff]  ;;  %v2755_v32 = vld [vmem:[#allocation22 + $0x2b8] sm:$0xff] }
0x19bb   : > { %3185 = vmatpush.msrb.mxu1 %v2691_v50  ;;  %v2772_v50 = vld [vmem:[#allocation22 + $0x340] sm:$0xff] }
0x19bc   : > { %3165 = vmatpush.msrb.mxu0 %v2675_v46  ;;  %3222 = vmatpush.msrb.mxu3 %v2726_v15  ;;  %v2794_v15 = vld [vmem:[#allocation22 + $0x3f0] sm:$0xff] }
0x19bd   : > { %3186 = vmatpush.msrb.mxu1 %v2690_v44  ;;  %v2819_v44 = vperm.slane %v5254_v6, 4  ;;  %3284 = vmatpush.msra.mxu2 %v2772_v50  ;;  %v2822_v50 = vperm.slane %v5254_v6, 7 }
0x19be   : > { %3166 = vmatpush.msrb.mxu0 %v2674_v49  ;;  %3223 = vmatpush.msrb.mxu3 %v2725_v18  ;;  %v2771_v49 = vld [vmem:[#allocation22 + $0x338] sm:$0xff]  ;;  %v2754_v18 = vld [vmem:[#allocation22 + $0x2b0] sm:$0xff] }
0x19bf   : > { %3187 = vmatpush.msrb.mxu1 %v2689_v45  ;;  %v2795_v45 = vld [vmem:[#allocation22 + $0x3f8] sm:$0xff]  ;;  %3285 = vmatpush.msra.mxu2 %v2771_v49 }
0x19c0   : > { %3167 = vmatpush.msrb.mxu0 %v2673_v52  ;;  %3224 = vmatpush.msrb.mxu3 %v2724_v57  ;;  %v2787_v49 = vld [vmem:[#allocation22 + $0x3b8] sm:$0xff] }
0x19c1   : > { %3188 = vmatpush.msrb.mxu1 %v2688_v47  ;;  %v2820_v47 = vperm.slane %v5254_v6, 5 }
0x19c2   : > { %3168 = vmatpush.msrb.mxu0 %v2672_v53  ;;  %3225 = vmatpush.msrb.mxu3 %v2723_v61  ;;  %v2770_v53 = vld [vmem:[#allocation22 + $0x330] sm:$0xff]  ;;  %v2740_v61 = vld [vmem:[#allocation22 + $0x240] sm:$0xff] }
0x19c3   : > { %3189 = vmatpush.msrb.mxu1 %v2687_v51  ;;  %3286 = vmatpush.msra.mxu2 %v2770_v53  ;;  %v2786_v53 = vld [vmem:[#allocation22 + $0x3b0] sm:$0xff] }
0x19c4   : > { %3169 = vmatpush.msrb.mxu0 %v2671_v58  ;;  %3226 = vmatpush.msrb.mxu3 %v2722_v2  ;;  %v2793_v58 = vld [vmem:[#allocation22 + $0x3e8] sm:$0xff] }
0x19c5   : > { %3190 = vmatpush.msrb.mxu1 %v2686_v16  ;;  %3287 = vmatpush.msra.mxu2 %v2769_v63 }
0x19c6   : > { %3170 = vmatpush.msrb.mxu0 %v2670_v1  ;;  %3227 = vmatpush.msrb.mxu3 %v2721_v4 }
0x19c7   : > { %3191 = vmatpush.msrb.mxu1 %v2685_v54 }
0x19c8   : > { %3171 = vmatpush.msrb.mxu0 %v2669_v0  ;;  %3228 = vmatpush.msrb.mxu3 %v2720_v9  ;;  %v2768_v9 = vld [vmem:[#allocation22 + $0x320] sm:$0xff] }
0x19c9   : > { %3192 = vmatpush.msrb.mxu1 %v2684_v59  ;;  %3288 = vmatpush.msra.mxu2 %v2768_v9  ;;  %v2732_v9 = vld [vmem:[#allocation22 + $0x200] sm:$0xff] }
0x19ca   : > { %3172 = vmatpush.msrb.mxu0 %v2668_v8  ;;  %3229 = vmatpush.msrb.mxu3 %v2719_v12  ;;  %v2752_v8 = vld [vmem:[#allocation22 + $0x2a0] sm:$0xff]  ;;  %v2738_v12 = vld [vmem:[#allocation22 + $0x230] sm:$0xff] }
0x19cb   : > { %3257 = vmatpush.msra.mxu1 %v2763_v62  ;;  %v2753_v62 = vld [vmem:[#allocation22 + $0x2a8] sm:$0xff] }
0x19cc   : > { %3237 = vmatpush.msra.mxu0 %v2747_v10  ;;  %3230 = vmatpush.msrb.mxu3 %v2718_v23 }
0x19cd   : > { %3258 = vmatpush.msra.mxu1 %v2762_v20  ;;  %v2818_v20 = vperm.slane %v5254_v6, 3 }
0x19ce   : > { %3238 = vmatpush.msra.mxu0 %v2746_v19  ;;  %3231 = vmatpush.msrb.mxu3 %v2717_v34  ;;  %v2751_v19 = vld [vmem:[#allocation22 + $0x298] sm:$0xff] }
0x19cf   : > { %3259 = vmatpush.msra.mxu1 %v2761_v5 }
0x19d0   : > { %3239 = vmatpush.msra.mxu0 %v2745_v24  ;;  %3232 = vmatpush.msrb.mxu3 %v2716_v39  ;;  %v2737_v24 = vld [vmem:[#allocation22 + $0x228] sm:$0xff] }
0x19d1   : > { %3260 = vmatpush.msra.mxu1 %v2760_v11  ;;  %v2791_v11 = vld [vmem:[#allocation22 + $0x3d8] sm:$0xff] }
0x19d2   : > { %3240 = vmatpush.msra.mxu0 %v2744_v31  ;;  %3297 = vmatpush.msra.mxu3 %v2795_v45  ;;  %v2748_v45 = vld [vmem:[#allocation22 + $0x280] sm:$0xff] }
0x19d3   : > { %3261 = vmatpush.msra.mxu1 %v2759_v21  ;;  %v2767_v21 = vld [vmem:[#allocation22 + $0x318] sm:$0xff] }
0x19d4   : > { %3241 = vmatpush.msra.mxu0 %v2743_v41  ;;  %3298 = vmatpush.msra.mxu3 %v2794_v15 }
0x19d5   : > { %3262 = vmatpush.msra.mxu1 %v2758_v56  ;;  %3289 = vmatpush.msra.mxu2 %v2767_v21  ;;  %v2750_v56 = vld [vmem:[#allocation22 + $0x290] sm:$0xff] }
0x19d6   : > { %3242 = vmatpush.msra.mxu0 %v2742_v48  ;;  %3299 = vmatpush.msra.mxu3 %v2793_v58 }
0x19d7   : > { %3263 = vmatpush.msra.mxu1 %v2757_v33  ;;  %3290 = vmatpush.msra.mxu2 %v2766_v25  ;;  %v2736_v33 = vld [vmem:[#allocation22 + $0x220] sm:$0xff]  ;;  %v2783_v25 = vld [vmem:[#allocation22 + $0x398] sm:$0xff] }
0x19d8   : > { %3243 = vmatpush.msra.mxu0 %v2741_v37  ;;  %3300 = vmatpush.msra.mxu3 %v2792_v3 }
0x19d9   : > { %3264 = vmatpush.msra.mxu1 %v2756_v43 }
0x19da   : > { %3244 = vmatpush.msra.mxu0 %v2740_v61  ;;  %3301 = vmatpush.msra.mxu3 %v2791_v11  ;;  %v2784_v11 = vld [vmem:[#allocation22 + $0x3a0] sm:$0xff] }
0x19db   : > { %3265 = vmatpush.msra.mxu1 %v2755_v32 }
0x19dc   : > { %3245 = vmatpush.msra.mxu0 %v2739_v7  ;;  %3302 = vmatpush.msra.mxu3 %v2790_v22 }
0x19dd   : > { %3266 = vmatpush.msra.mxu1 %v2754_v18  ;;  %v2734_v18 = vld [vmem:[#allocation22 + $0x210] sm:$0xff] }
0x19de   : > { %3246 = vmatpush.msra.mxu0 %v2738_v12 }
0x19df   : > { %3267 = vmatpush.msra.mxu1 %v2753_v62 }
0x19e0   : > { %3247 = vmatpush.msra.mxu0 %v2737_v24 }
0x19e1   : > { %3268 = vmatpush.msra.mxu1 %v2752_v8 }
0x19e2   : > { %3248 = vmatpush.msra.mxu0 %v2736_v33 }
0x19e3   : > { %3269 = vmatpush.msra.mxu1 %v2751_v19 }
0x19e5   : > { %3270 = vmatpush.msra.mxu1 %v2750_v56 }
0x19e7   : > { %3271 = vmatpush.msra.mxu1 %v2749_v35 }
0x19e9   : > { %3272 = vmatpush.msra.mxu1 %v2748_v45 }
0x1a24   : > { %v2871_v27 = vpop.f32.mrf.mxu0 }
0x1a25   : > { %v5258_v28 = vadd.f32 %v2871_v27, %v2816_v13  ;;  %v2891_v29 = vpop.f32.mrf.mxu1 }
0x1a26   : > { %v5260_v30 = vadd.f32 %v2891_v29, %v2817_v26  ;;  %v2789_v26 = vld [vmem:[#allocation22 + $0x3c8] sm:$0xff] }
0x1a27   : > { %v3659_v36 = vmul.f32 -1.442695, %v5258_v28  ;;  %3303 = vmatpush.msra.mxu3 %v2789_v26 }
0x1a28   : > { %v3660_v40 = vmul.f32 -1.442695, %v5260_v30 }
0x1a29   : > { %3940 = vpow2.f32 %v3659_v36  ;;  %v2765_v36 = vld [vmem:[#allocation22 + $0x308] sm:$0xff] }
0x1a2a   : > { %3942 = vpow2.f32 %v3660_v40  ;;  %v2851_v46 = vpop.f32.mrf.mxu3  ;;  %3291 = vmatpush.msra.mxu2 %v2765_v36 }
0x1a2b   : > { %v5268_v51 = vadd.f32 %v2851_v46, %v2815_v38  ;;  %v2971_v14 = vpop.f32.mrf.mxu2  ;;  %v2764_v46 = vld [vmem:[#allocation22 + $0x300] sm:$0xff] }
0x1a2c   : > { %v5270_v52 = vadd.f32 %v2971_v14, %v2821_v42  ;;  %v2931_v16 = vpop.f32.mrf.mxu0  ;;  %v2788_v42 = vld [vmem:[#allocation22 + $0x3c0] sm:$0xff]  ;;  %3292 = vmatpush.msra.mxu2 %v2764_v46 }
0x1a2d   : > { %v3658_v54 = vmul.f32 -1.442695, %v5268_v51  ;;  %v5273_v55 = vadd.f32 %v2931_v16, %v2819_v44  ;;  %v2951_v57 = vpop.f32.mrf.mxu1  ;;  %3304 = vmatpush.msra.mxu3 %v2788_v42  ;;  %v2735_v44 = vld [vmem:[#allocation22 + $0x218] sm:$0xff] }
0x1a2e   : > { %v3664_v59 = vmul.f32 -1.442695, %v5270_v52  ;;  %v5276_v60 = vadd.f32 %v2951_v57, %v2820_v47  ;;  %3249 = vmatpush.msra.mxu0 %v2735_v44  ;;  %v2781_v44 = vld [vmem:[#allocation22 + $0x388] sm:$0xff] }
0x1a2f   : > { %v3941_v1 = vpop.eup %3940  ;;  %3944 = vpow2.f32 %v3658_v54  ;;  %v3662_v2 = vmul.f32 -1.442695, %v5273_v55  ;;  %3305 = vmatpush.msra.mxu3 %v2787_v49 }
0x1a30   : > { %v3943_v0 = vpop.eup %3942  ;;  %v5280_v4 = vadd.f32 1.0, %v3941_v1  ;;  %3946 = vpow2.f32 %v3664_v59  ;;  %v3663_v5 = vmul.f32 -1.442695, %v5276_v60  ;;  %3250 = vmatpush.msra.mxu0 %v2734_v18  ;;  %v2733_v1 = vld [vmem:[#allocation22 + $0x208] sm:$0xff] }
0x1a31   : > { %v5283_v10 = vadd.f32 1.0, %v3943_v0  ;;  %3948 = vpow2.f32 %v3662_v2  ;;  %3306 = vmatpush.msra.mxu3 %v2786_v53  ;;  %v2785_v2 = vld [vmem:[#allocation22 + $0x3a8] sm:$0xff] }
0x1a32   : > { %3950 = vrcp.f32 %v5280_v4  ;;  %v2911_v17 = vpop.f32.mrf.mxu3  ;;  %v3050_v34 = vand.u32 2147483647, %v5280_v4  ;;  %v3052_v29 = vand.u32 2147483648, %v5280_v4  ;;  %vm3046_vm0 = vweird.f32 %v5280_v4  ;;  %3251 = vmatpush.msra.mxu0 %v2733_v1 }
0x1a33   : > { %3952 = vrcp.f32 %v5283_v10  ;;  %v5287_v23 = vadd.f32 %v2911_v17, %v2818_v20  ;;  %v3065_v39 = vand.u32 2147483647, %v5283_v10  ;;  %v3067_v32 = vand.u32 2147483648, %v5283_v10  ;;  %3307 = vmatpush.msra.mxu3 %v2785_v2 }
0x1a34   : > { %3954 = vpow2.f32 %v3663_v5  ;;  %vm5308_vm15 = vcmp.eq.f32.partialorder %v3050_v34, 8.507059e+37  ;;  %v3053_v16 = vor.u32 1.1754944e-38, %v3052_v29  ;;  %vm3061_vm10 = vweird.f32 %v5283_v10  ;;  %3252 = vmatpush.msra.mxu0 %v2732_v9 }
0x1a35   : > { %v3945_v13 = vpop.eup %3944  ;;  %v3661_v43 = vmul.f32 -1.442695, %v5287_v23  ;;  %vm5315_vm11 = vcmp.eq.f32.partialorder %v3065_v39, 8.507059e+37  ;;  %v3068_v3 = vor.u32 1.1754944e-38, %v3067_v32  ;;  %3308 = vmatpush.msra.mxu3 %v2784_v11 }
0x1a36   : > { %v3947_v27 = vpop.eup %3946  ;;  %v5291_v31 = vadd.f32 1.0, %v3945_v13 }
0x1a37   : > { %v3949_v38 = vpop.eup %3948  ;;  %v5294_v40 = vadd.f32 1.0, %v3947_v27  ;;  %3309 = vmatpush.msra.mxu3 %v2783_v25 }
0x1a38   : > { %v5296_v41 = vpop.eup %3950  ;;  %3956 = vrcp.f32 %v5291_v31  ;;  %v3035_v58 = vand.u32 2147483647, %v5291_v31  ;;  %v5320_v59 = vadd.f32 1.0, %v3949_v38  ;;  %v3037_v62 = vand.u32 2147483648, %v5291_v31 }
0x1a39   : > { %v5301_v47 = vpop.eup %3952  ;;  %v3042_v48 = vmul.f32 %v5296_v41, %v5280_v4  ;;  %3958 = vrcp.f32 %v5294_v40  ;;  %vm3047_vm12 = vweird.f32 %v5296_v41  ;;  %vm3031_vm14 = vweird.f32 %v5291_v31 }
0x1a3a   : > { %v3955_v14 = vpop.eup %3954  ;;  %v3057_v37 = vmul.f32 %v5301_v47, %v5283_v10  ;;  %3960 = vpow2.f32 %v3661_v43  ;;  %vm3062_vm13 = vweird.f32 %v5301_v47  ;;  %v3125_v7 = vand.u32 2147483647, %v5294_v40  ;;  %v2991_v8 = vpop.f32.mrf.mxu3  ;;  %vm3048_vm2 = vmor %vm3046_vm0, %vm3047_vm12  ;;  %v2782_v10 = vld [vmem:[#allocation22 + $0x390] sm:$0xff] }
0x1a3b   : > { %v3043_v54 = vsub.f32 1.0, %v3042_v48  ;;  %v5323_v63 = vadd.f32 1.0, %v3955_v14  ;;  %3962 = vrcp.f32 %v5320_v59  ;;  %vm3121_vm1 = vweird.f32 %v5294_v40  ;;  %vm3063_vm6 = vmor %vm3061_vm10, %vm3062_vm13  ;;  %3310 = vmatpush.msra.mxu3 %v2782_v10  ;;  %v2780_v14 = vld [vmem:[#allocation22 + $0x380] sm:$0xff] }
0x1a3c   : > { %v3058_v61 = vsub.f32 1.0, %v3057_v37  ;;  %vm5346_vm5 = vcmp.eq.f32.partialorder %v3035_v58, 8.507059e+37  ;;  %v3038_v24 = vor.u32 1.1754944e-38, %v3037_v62  ;;  %v3127_v34 = vand.u32 2147483648, %v5294_v40 }
0x1a3d   : > { %v3044_v20 = vmul.f32 %v5296_v41, %v3043_v54  ;;  %3964 = vrcp.f32 %v5323_v63  ;;  %v5360_v26 = vadd.f32 %v2991_v8, %v2822_v50  ;;  %vm5365_vm7 = vcmp.eq.f32.partialorder %v3125_v7, 8.507059e+37  ;;  %3311 = vmatpush.msra.mxu3 %v2781_v44  ;;  %v2808_v44 = vld [vmem:[%s5674_s23 + $0x58] sm:$0xff] }
0x1a3e   : > { %v5328_v0 = vpop.eup %3956  ;;  %v3059_v5 = vmul.f32 %v5301_v47, %v3058_v61  ;;  %v3128_v46 = vor.u32 1.1754944e-38, %v3127_v34  ;;  %vm3091_vm8 = vweird.f32 %v5320_v59  ;;  %v3095_v32 = vand.u32 2147483647, %v5320_v59 }
0x1a3f   : > { %v5334_v17 = vpop.eup %3958  ;;  %v3045_v12 = vadd.f32 %v5296_v41, %v3044_v20  ;;  %v3027_v19 = vmul.f32 %v5328_v0, %v5291_v31  ;;  %vm3032_vm3 = vweird.f32 %v5328_v0  ;;  %v3097_v31 = vand.u32 2147483648, %v5320_v59  ;;  %3312 = vmatpush.msra.mxu3 %v2780_v14 }
0x1a40   : > { %v3060_v21 = vadd.f32 %v5301_v47, %v3059_v5  ;;  %v3117_v56 = vmul.f32 %v5334_v17, %v5294_v40  ;;  %v3961_v27 = vpop.eup %3960  ;;  %vm3122_vm4 = vweird.f32 %v5334_v17  ;;  %vm3033_vm9 = vmor %vm3031_vm14, %vm3032_vm3  ;;  %v3110_v40 = vand.u32 2147483647, %v5323_v63 }
0x1a41   : > { %v3049_v13 = vsel %vm3048_vm2, %v5296_v41, %v3045_v12  ;;  %v3028_v4 = vsub.f32 1.0, %v3027_v19  ;;  %v3963_v38 = vpop.eup %3962  ;;  %vm3123_vm0 = vmor %vm3121_vm1, %vm3122_vm4  ;;  %v3112_v58 = vand.u32 2147483648, %v5323_v63  ;;  %v3665_v1 = vmul.f32 -1.442695, %v5360_v26 }
0x1a42   : > { %v3054_v29 = vsel %vm5308_vm15, %v3053_v16, %v3049_v13  ;;  %v3064_v33 = vsel %vm3063_vm6, %v5301_v47, %v3060_v21  ;;  %v3118_v35 = vsub.f32 1.0, %v3117_v56  ;;  %v3087_v50 = vmul.f32 %v3963_v38, %v5320_v59 }
0x1a43   : > { %v3147_v39 = vmul.f32 %v3054_v29, %v5258_v28  ;;  %v3069_v6 = vsel %vm5315_vm11, %v3068_v3, %v3064_v33  ;;  %v3029_v42 = vmul.f32 %v5328_v0, %v3028_v4  ;;  %v3965_v45 = vpop.eup %3964  ;;  %v5380_v47 = vadd.f32 1.0, %v3961_v27 }
0x1a44   : > { %v3148_v41 = vmul.f32 %v3069_v6, %v5260_v30  ;;  %v3119_v43 = vmul.f32 %v5334_v17, %v3118_v35  ;;  %v3088_v48 = vsub.f32 1.0, %v3087_v50  ;;  %v3102_v49 = vmul.f32 %v3965_v45, %v5323_v63  ;;  %v2811_v6 = vld [vmem:[%s5674_s23 + $0x70] sm:$0xff] }
0x1a45   : > { %v3030_v28 = vadd.f32 %v5328_v0, %v3029_v42  ;;  %3193 = vmatmul.f32.vlgmr.msrb.gmra.mxu1 %v3147_v39  ;;  %vm3092_vm15 = vweird.f32 %v3963_v38  ;;  %3966 = vrcp.f32 %v5380_v47  ;;  %vm3107_vm10 = vweird.f32 %v3965_v45  ;;  %v3864_v42 = vld [vmem:[%s5675_s18] ss:$0 sm:$0xff] }
0x1a46   : > { %v3120_v30 = vadd.f32 %v5334_v17, %v3119_v43  ;;  %3213 = vmatmul.f32.vlgmr.msrb.gmra.mxu2 %v3148_v41  ;;  %v3089_v18 = vmul.f32 %v3963_v38, %v3088_v48  ;;  %v3103_v53 = vsub.f32 1.0, %v3102_v49  ;;  %vm3093_vm11 = vmor %vm3091_vm8, %vm3092_vm15  ;;  %v3098_v2 = vor.u32 1.1754944e-38, %v3097_v31  ;;  %v2810_v41 = vld [vmem:[%s5674_s23 + $0x68] sm:$0xff]  ;;  %v2809_v43 = vld [vmem:[%s5674_s23 + $0x60] sm:$0xff] }
0x1a47   : > { %v3034_v15 = vsel %vm3033_vm9, %v5328_v0, %v3030_v28  ;;  %vm3106_vm12 = vweird.f32 %v5323_v63  ;;  %3968 = vpow2.f32 %v3665_v1  ;;  %vm3096_vm13 = vcmp.eq.f32.partialorder %v3095_v32, 8.507059e+37  ;;  %v2804_v49 = vld [vmem:[%s5674_s23 + $0x38] sm:$0xff]  ;;  %v2803_v31 = vld [vmem:[%s5674_s23 + $0x30] sm:$0xff]  ;;  %v2798_v1 = vld [vmem:[%s5674_s23 + $0x8] sm:$0xff] }
0x1a48   : > { %v3039_v16 = vsel %vm5346_vm5, %v3038_v24, %v3034_v15  ;;  %v3124_v37 = vsel %vm3123_vm0, %v5334_v17, %v3120_v30  ;;  %v3090_v61 = vadd.f32 %v3963_v38, %v3089_v18  ;;  %v3104_v62 = vmul.f32 %v3965_v45, %v3103_v53  ;;  %vm3108_vm14 = vmor %vm3106_vm12, %vm3107_vm10  ;;  %v2805_v30 = vld [vmem:[%s5674_s23 + $0x40] sm:$0xff]  ;;  %v2802_v18 = vld [vmem:[%s5674_s23 + $0x28] sm:$0xff] }
0x1a49   : > { %v3146_v54 = vmul.f32 %v3039_v16, %v5268_v51  ;;  %v3129_v57 = vsel %vm5365_vm7, %v3128_v46, %v3124_v37  ;;  %v3113_v5 = vor.u32 1.1754944e-38, %v3112_v58  ;;  %vm3111_vm1 = vcmp.eq.f32.partialorder %v3110_v40, 8.507059e+37  ;;  %v2801_v53 = vld [vmem:[%s5674_s23 + $0x20] sm:$0xff]  ;;  %v2800_v40 = vld [vmem:[%s5674_s23 + $0x18] sm:$0xff]  ;;  %v2799_v58 = vld [vmem:[%s5674_s23 + $0x10] sm:$0xff] }
0x1a4a   : > { %v3152_v51 = vmul.f32 %v3129_v57, %v5270_v52  ;;  %v3094_v20 = vsel %vm3093_vm11, %v3963_v38, %v3090_v61  ;;  %v3105_v3 = vadd.f32 %v3965_v45, %v3104_v62  ;;  %v3082_v52 = vand.u32 2147483648, %v5380_v47 }
0x1a4b   : > { %3173 = vmatmul.f32.vlgmr.msrb.gmra.mxu0 %v3146_v54  ;;  %v3967_v0 = vpop.eup %3966  ;;  %v3099_v7 = vsel %vm3096_vm13, %v3098_v2, %v3094_v20  ;;  %v3080_v21 = vand.u32 2147483647, %v5380_v47  ;;  %vm3076_vm5 = vweird.f32 %v5380_v47  ;;  %v2797_v2 = vld [vmem:[%s5674_s23] sm:$0xff] }
0x1a4c   : > { %v3109_v8 = vsel %vm3108_vm14, %v3965_v45, %v3105_v3  ;;  %v3072_v9 = vmul.f32 %v3967_v0, %v5380_v47  ;;  %v3150_v17 = vmul.f32 %v3099_v7, %v5273_v55  ;;  %vm3077_vm2 = vweird.f32 %v3967_v0  ;;  %v2807_v45 = vld [vmem:[%s5674_s23 + $0x50] sm:$0xff]  ;;  %v2806_v47 = vld [vmem:[%s5674_s23 + $0x48] sm:$0xff] }
0x1a4d   : > { %v3114_v59 = vsel %vm3111_vm1, %v3113_v5, %v3109_v8  ;;  %v3969_v12 = vpop.eup %3968  ;;  %vm3078_vm6 = vmor %vm3076_vm5, %vm3077_vm2  ;;  %v3083_v56 = vor.u32 1.1754944e-38, %v3082_v52  ;;  %vm3081_vm7 = vcmp.eq.f32.partialorder %v3080_v21, 8.507059e+37 }
0x1a4e   : > { %3293 = vmatmul.f32.vlgmr.msra.gmra.mxu2 %v3152_v51  ;;  %v3151_v11 = vmul.f32 %v3114_v59, %v5276_v60  ;;  %v3073_v63 = vsub.f32 1.0, %v3072_v9  ;;  %v3025_v22 = vadd.f32 1.0, %v3969_v12 }
0x1a50   : > { %v3074_v19 = vmul.f32 %v3967_v0, %v3073_v63  ;;  %3273 = vmatmul.f32.vlgmr.msra.gmra.mxu1 %v3151_v11  ;;  %3970 = vrcp.f32 %v3025_v22  ;;  %v3142_v27 = vand.u32 2147483648, %v3025_v22  ;;  %v3140_v33 = vand.u32 2147483647, %v3025_v22 }
0x1a51   : > { %vm3136_vm4 = vweird.f32 %v3025_v22 }
0x1a52   : > { %v3075_v24 = vadd.f32 %v3967_v0, %v3074_v19  ;;  %v3143_v36 = vor.u32 1.1754944e-38, %v3142_v27  ;;  %vm3141_vm9 = vcmp.eq.f32.partialorder %v3140_v33, 8.507059e+37 }
0x1a53   : > { %3253 = vmatmul.f32.vlgmr.msra.gmra.mxu0 %v3150_v17 }
0x1a54   : > { %v3079_v60 = vsel %vm3078_vm6, %v3967_v0, %v3075_v24 }
0x1a55   : > { %v3084_v25 = vsel %vm3081_vm7, %v3083_v56, %v3079_v60 }
0x1a56   : > { %v3149_v55 = vmul.f32 %v3084_v25, %v5287_v23  ;;  %v3971_v13 = vpop.eup %3970  ;;  %v2812_v23 = vld [vmem:[%s5674_s23 + $0x78] sm:$0xff] }
0x1a57   : > { %v3132_v4 = vmul.f32 %v3971_v13, %v3025_v22  ;;  %vm3137_vm3 = vweird.f32 %v3971_v13  ;;  %3340 = vmatpush.msrb.mxu0 %v2812_v23  ;;  %v3865_v22 = vld [vmem:[%s5677_s9] ss:$0 sm:$0xff] }
0x1a58   : > { %3233 = vmatmul.f32.vlgmr.msrb.gmra.mxu3 %v3149_v55  ;;  %vm3138_vm8 = vmor %vm3136_vm4, %vm3137_vm3 }
0x1a59   : > { %v3133_v34 = vsub.f32 1.0, %v3132_v4  ;;  %3341 = vmatpush.msrb.mxu0 %v2811_v6 }
0x1a5b   : > { %v3134_v29 = vmul.f32 %v3971_v13, %v3133_v34  ;;  %3342 = vmatpush.msrb.mxu0 %v2810_v41 }
0x1a5d   : > { %v3135_v35 = vadd.f32 %v3971_v13, %v3134_v29  ;;  %3343 = vmatpush.msrb.mxu0 %v2809_v43 }
0x1a5f   : > { %v3139_v10 = vsel %vm3138_vm8, %v3971_v13, %v3135_v35  ;;  %3344 = vmatpush.msrb.mxu0 %v2808_v44 }
0x1a60   : > { %v3144_v38 = vsel %vm3141_vm9, %v3143_v36, %v3139_v10 }
0x1a61   : > { %v3153_v39 = vmul.f32 %v3144_v38, %v5360_v26  ;;  %3345 = vmatpush.msrb.mxu0 %v2807_v45 }
0x1a63   : > { %3313 = vmatmul.f32.vlgmr.msra.gmra.mxu3 %v3153_v39  ;;  %3346 = vmatpush.msrb.mxu0 %v2806_v47 }
0x1a65   : > { %3347 = vmatpush.msrb.mxu0 %v2805_v30 }
0x1a67   : > { %3348 = vmatpush.msrb.mxu0 %v2804_v49 }
0x1a69   : > { %3349 = vmatpush.msrb.mxu0 %v2803_v31 }
0x1a6b   : > { %3350 = vmatpush.msrb.mxu0 %v2802_v18 }
0x1a6d   : > { %3351 = vmatpush.msrb.mxu0 %v2801_v53 }
0x1a6f   : > { %3352 = vmatpush.msrb.mxu0 %v2800_v40 }
0x1a71   : > { %3353 = vmatpush.msrb.mxu0 %v2799_v58 }
0x1a73   : > { %3354 = vmatpush.msrb.mxu0 %v2798_v1 }
0x1a75   : > { %3355 = vmatpush.msrb.mxu0 %v2797_v2 }
0x1ac2   : > { %v3194_v28 = vpop.f32.mrf.mxu1 }
0x1ac8   : > { %v3174_v26 = vpop.f32.mrf.mxu0 }
0x1ac9   : > { %v3175_v50 = vadd.f32 %v3864_v42, %v3174_v26  ;;  %v3214_v48 = vpop.f32.mrf.mxu2 }
0x1acb   : > { %v3195_v46 = vadd.f32 %v3194_v28, %v3175_v50 }
0x1acd   : > { %v3215_v32 = vadd.f32 %v3214_v48, %v3195_v46  ;;  %v3274_v54 = vpop.f32.mrf.mxu1 }
0x1ad0   : > { %v3254_v16 = vpop.f32.mrf.mxu0 }
0x1ad1   : > { %v3294_v61 = vpop.f32.mrf.mxu2 }
0x1adb   : > { %v3234_v14 = vpop.f32.mrf.mxu3 }
0x1adc   : > { %v3235_v15 = vadd.f32 %v3234_v14, %v3215_v32 }
0x1ade   : > { %v3255_v37 = vadd.f32 %v3254_v16, %v3235_v15 }
0x1ae0   : > { %v3275_v57 = vadd.f32 %v3274_v54, %v3255_v37 }
0x1ae2   : > { %v3295_v62 = vadd.f32 %v3294_v61, %v3275_v57 }
0x1ae6   : > { %v3314_v51 = vpop.f32.mrf.mxu3 }
0x1ae7   : > { %v3315_v20 = vadd.f32 %v3314_v51, %v3295_v62 }
0x1ae9   : > { %v3666_v3 = vmul.f32 -1.442695, %v3315_v20 }
0x1aeb   : > { %3972 = vpow2.f32 %v3666_v3 }
0x1af1   : > { %v3973_v0 = vpop.eup %3972 }
0x1af2   : > { %v3320_v5 = vadd.f32 1.0, %v3973_v0 }
0x1af4   : > { %3974 = vrcp.f32 %v3320_v5  ;;  %v3332_v59 = vand.u32 2147483648, %v3320_v5  ;;  %v3330_v63 = vand.u32 2147483647, %v3320_v5  ;;  %vm3326_vm15 = vweird.f32 %v3320_v5 }
0x1af6   : > { %v3333_v52 = vor.u32 1.1754944e-38, %v3332_v59  ;;  %vm3331_vm11 = vcmp.eq.f32.partialorder %v3330_v63, 8.507059e+37 }
0x1afa   : > { %v3975_v7 = vpop.eup %3974 }
0x1afb   : > { %v3322_v8 = vmul.f32 %v3975_v7, %v3320_v5  ;;  %vm3327_vm0 = vweird.f32 %v3975_v7 }
0x1afc   : > { %vm3328_vm10 = vmor %vm3326_vm15, %vm3327_vm0 }
0x1afd   : > { %v3323_v9 = vsub.f32 1.0, %v3322_v8 }
0x1aff   : > { %v3324_v11 = vmul.f32 %v3975_v7, %v3323_v9 }
0x1b01   : > { %v3325_v17 = vadd.f32 %v3975_v7, %v3324_v11 }
0x1b03   : > { %v3329_v12 = vsel %vm3328_vm10, %v3975_v7, %v3325_v17 }
0x1b04   : > { %v3334_v19 = vsel %vm3331_vm11, %v3333_v52, %v3329_v12 }
0x1b05   : > { %v3336_v21 = vmul.f32 %v3334_v19, %v3315_v20 }
0x1b07   : > { %3356 = vmatmul.f32.vlgmr.msrb.gmra.mxu0 %v3336_v21 }
0x1b84   : > { %v3357_v24 = vpop.f32.mrf.mxu0 }
0x1b85   : > { %v3358_v56 = vadd.f32 %v3865_v22, %v3357_v24 }
0x1b87   : > { %3360 = vst [vmem:[%s1054_s14] sm:$0xff] %v3358_v56 }
0x1b88   : > { %4395 = shalt.err (!%p4392_p9)
}
0x1b89   : > { %3721 = dma.vmem_to_hbm [thread:$0]  (%p4788_p5), %s3375_s21, 128, %s3377_s4, %s3362_s3  }
0x1b8a PF: > { %s5680_s27 = sld [smem:[#allocation34_spill]]  ;;  %s3388_s17 = sand.u32 1, %s4446_s8  }
0x1b8b   : > { %s3389_s25 = scalar_lea.sflag [#allocation4], %s3388_s17 }
0x1b90   : > { %p5681_p10 = scmp.ge.s32.totalorder %s5680_s27, 2 }
0x1b92   : > { %p3765_p13 = pnand %p5681_p10, %p4792_p6 }
0x1b94   : > { %p3766_p11 = pneg %p3765_p13 }
0x1b96   : > { %4441 = dma.done.wait (%p3766_p11), %s3389_s25, 128  }
0x1b97   : > { %4443 = vsyncadd (%p3766_p11), %s3389_s25, 4294967168  ;;  %s5682_s30 = sld [smem:[#allocation35_spill]] }
0x1b98   : > { %s5683_s8 = sld [smem:[#allocation32_spill]] }
0x1b99   : > { %s5684_s5 = sld [smem:[#allocation33_spill]] }
0x1b9a   : > { %s5685_s9 = sld [smem:[#allocation36_spill]] }
0x1b9d   : > { %p47_p0 = scmp.ge.s32.totalorder %s5682_s30, 4  }
0x1b9f   :  { %49 = sbr.rel (!%p47_p0) target bundleno = 38 (0x26), region = 225 }
0x1ba4   :  { %3395 = vsyncpa [#allocation3], 1 }
0x1ba5   :  { %3397 = vsyncpa [#allocation3 + $0x1], 1 }
0x1ba6   :  { %3398 = vsyncpa [#allocation6], 1 }
0x1ba7   :  { %3399 = vsyncpa [#allocation9], 1 }
0x1ba8   :  { %3400 = vsyncpa [#allocation12], 1 }
0x1ba9   :  { %3401 = vsyncpa [#allocation15], 1 }
0x1baa   :  { %3402 = vsyncpa [#allocation18], 1 }
0x1bab   :  { %3403 = vsyncpa [#allocation21], 1 }
0x1bac   :  { %3404 = vsyncpa [#allocation4], 1 }
0x1bad   :  { %3406 = vsyncpa [#allocation4 + $0x1], 1 }

</bundles_post_ra>
